<compile_context>
chip_gen: v5e
topology: v5e:2x2
jax: 0.10.0
libtpu: 0.0.40
codegen_flags: <defaults>
</compile_context>

<pallas_src>
import functools
import math

import jax
import jax.numpy as jnp
from jax.experimental import pallas as pl
from jax.experimental.pallas import tpu as pltpu


# --------------------------- in-kernel conv block ---------------------------
def _conv_block(in_ref, w_ref, out_ref, *, kh, kw, oh, ow, slope):
    """Stride-1 'valid' conv of the whole (Hi, Wi, Ci) ref into (oh, ow, Co)."""
    for r in range(oh):                      # static unroll (small OH here)
        acc = None
        for dh in range(kh):
            for dw in range(kw):
                lhs = in_ref[r + dh, dw:dw + ow, :]          # (OW, Ci)  static window
                rhs = w_ref[dh, dw]                          # (Ci, Co)
                part = jnp.dot(lhs, rhs, preferred_element_type=jnp.float32)
                acc = part if acc is None else acc + part
        if slope is not None:                                # fused LeakyReLU (f32)
            acc = jnp.where(acc >= 0.0, acc, slope * acc)
        out_ref[r, :, :] = acc.astype(out_ref.dtype)


def _encoder_kernel(*refs, layer_cfgs, n_layers):
    # refs = (x, w_0..w_{L-1}, out, act_0..act_{L-2})
    x_ref = refs[0]
    w_refs = refs[1:1 + n_layers]
    o_ref = refs[1 + n_layers]
    act_refs = refs[2 + n_layers:]

    src = x_ref
    for li, cfg in enumerate(layer_cfgs):
        dst = o_ref if li == n_layers - 1 else act_refs[li]
        _conv_block(src, w_refs[li], dst, **cfg)
        src = dst


# ------------------------------ the module ---------------------------------
class ImageEncoderModifiedPallas:
    """Mirror of ImageEncoderModified:
       Conv2d(n_channels, ngf, 4, 2, 1, bias=False) + LeakyReLU(0.2)
       [Conv2d(ngf, 2*ngf, 3, 1, 0, bias=False) + LeakyReLU(0.2)] x (n_layers-2)
       Conv2d(ngf_final, output_size, 3, 1, 0, bias=False)
    """

    def __init__(self, n_channels, output_size, ngf, n_layers, norm="None", key=None):
        if norm != "None":
            # TODO(synk): BatchNorm2d / InstanceNorm2d branches not ported.
            raise NotImplementedError("Only norm='None' is supported here.")
        if key is None:
            key = jax.random.PRNGKey(42)

        shapes, strides, pads, slopes = [], [], [], []
        shapes.append((ngf, n_channels, 4, 4)); strides.append(2); pads.append(1); slopes.append(0.2)
        cur = ngf
        for _ in range(1, n_layers - 1):
            shapes.append((cur * 2, cur, 3, 3)); strides.append(1); pads.append(0); slopes.append(0.2)
            cur *= 2
        shapes.append((output_size, cur, 3, 3)); strides.append(1); pads.append(0); slopes.append(None)

        keys = jax.random.split(key, len(shapes))
        self.weights = [0.05 * jax.random.normal(k, s, jnp.float32)
                        for k, s in zip(keys, shapes)]
        self.strides, self.pads, self.slopes = strides, pads, slopes

        # One-time weight packing: OIHW -> HWIO (f32).  The stride-2 first layer
        # is folded into a 2x2 stride-1 conv over the space-to-depth input:
        #   Wp[kh2, kw2, (py,px,ci), co] = W[2*kh2+py, 2*kw2+px, ci, co]
        self.packed = []
        for w, s in zip(self.weights, strides):
            w_hwio = jnp.transpose(w, (2, 3, 1, 0))          # (KH, KW, Ci, Co)
            if s == 1:
                w_p = w_hwio
            elif s == 2:
                KH, KW, Ci, Co = w_hwio.shape
                assert KH % 2 == 0 and KW % 2 == 0
                w_p = w_hwio.reshape(KH // 2, 2, KW // 2, 2, Ci, Co)   # (kh2,py,kw2,px,ci,co)
                w_p = jnp.transpose(w_p, (0, 2, 1, 3, 4, 5))           # (kh2,kw2,py,px,ci,co)
                w_p = w_p.reshape(KH // 2, KW // 2, 4 * Ci, Co)
            else:
                raise NotImplementedError("Only strides 1 and 2 are supported.")
            self.packed.append(w_p)

        self._forward = jax.jit(self._forward_impl)

    # ---------------------------- jitted forward ----------------------------
    def _forward_impl(self, x_nchw, packed):
        N = x_nchw.shape[0]
        x = jnp.transpose(x_nchw, (0, 2, 3, 1)).astype(jnp.float32)   # NCHW -> NHWC once

        # Layer-0 preprocessing: pad + (for stride 2) space-to-depth, so every
        # in-kernel conv is a static stride-1 valid conv.
        p0, s0 = self.pads[0], self.strides[0]
        if p0:
            x = jnp.pad(x, ((0, 0), (p0, p0), (p0, p0), (0, 0)))
        if s0 == 2:
            _, hp, wp, c = x.shape
            assert hp % 2 == 0 and wp % 2 == 0, "stride-2 layer needs even padded H/W"
            x = x.reshape(N, hp // 2, 2, wp // 2, 2, c)
            x = jnp.transpose(x, (0, 1, 3, 2, 4, 5)).reshape(N, hp // 2, wp // 2, 4 * c)
        for s, p in zip(self.strides[1:], self.pads[1:]):
            assert s == 1 and p == 0

        # Static per-layer geometry.
        _, h, w, _ = x.shape
        cfgs, act_shapes = [], []
        for wq, slope in zip(packed, self.slopes):
            kh, kw, _, co = wq.shape
            oh, ow = h - kh + 1, w - kw + 1
            cfgs.append(dict(kh=kh, kw=kw, oh=oh, ow=ow, slope=slope))
            act_shapes.append((oh, ow, co))
            h, w = oh, ow
        n_layers = len(packed)
        inter_shapes = act_shapes[:-1]
        out_shape = (N,) + act_shapes[-1]

        # VMEM working-set estimate; budget against v7x's 64 MiB physical VMEM.
        f32b = 4
        est = 2 * math.prod(x.shape[1:]) * f32b                       # input block (dbl-buffered)
        est += 2 * math.prod(act_shapes[-1]) * f32b                   # output block (dbl-buffered)
        est += sum(2 * wq.size * f32b for wq in packed)               # weights (conservative)
        est += sum(math.prod(s) * f32b for s in inter_shapes)         # activation scratch
        if est > 56 * 1024 * 1024:
            # TODO(synk): fall back to a per-layer pipelined kernel for very large images.
            raise ValueError("activation working set too large for the fused VMEM kernel")
        vmem_limit = int(min(64 * 1024 * 1024, max(32 * 1024 * 1024, 2 * est)))

        kernel = functools.partial(_encoder_kernel, layer_cfgs=cfgs, n_layers=n_layers)
        in_specs = [pl.BlockSpec((None,) + x.shape[1:], lambda n: (n, 0, 0, 0))]
        in_specs += [pl.BlockSpec(wq.shape, lambda n: (0, 0, 0, 0)) for wq in packed]
        out_specs = pl.BlockSpec((None,) + act_shapes[-1], lambda n: (n, 0, 0, 0))

        y = pl.pallas_call(
            kernel,
            out_shape=jax.ShapeDtypeStruct(out_shape, jnp.float32),
            grid=(N,),                                   # >=2 parallel steps when batch>=2
            in_specs=in_specs,
            out_specs=out_specs,
            scratch_shapes=[pltpu.VMEM(s, jnp.float32) for s in inter_shapes],
            compiler_params=pltpu.CompilerParams(
                dimension_semantics=("parallel",),
                vmem_limit_bytes=vmem_limit),
        )(x, *packed)

        return jnp.transpose(y, (0, 3, 1, 2))            # NHWC -> NCHW once

    def __call__(self, x_nchw):
        return self._forward(x_nchw, self.packed)


# ----------------------------- plain-JAX reference -------------------------
def _reference_forward(x, weights, strides, pads, slopes):
    for w, s, p, slope in zip(weights, strides, pads, slopes):
        x = jax.lax.conv_general_dilated(
            x, w, window_strides=(s, s), padding=[(p, p), (p, p)],
            dimension_numbers=("NCHW", "OIHW", "NCHW"),
            precision=jax.lax.Precision.HIGHEST)
        if slope is not None:
            x = jnp.where(x >= 0.0, x, slope * x)
    return x


if __name__ == "__main__":
    key = jax.random.PRNGKey(0)
    kx, kw = jax.random.split(key)

    # small config: n_channels=4, output_size=8, ngf=8, n_layers=3, norm='None'
    n_channels, output_size, ngf, n_layers = 4, 8, 8, 3
    enc = ImageEncoderModifiedPallas(n_channels, output_size, ngf, n_layers,
                                     norm="None", key=kw)

    x = jax.random.normal(kx, (2, n_channels, 16, 16), jnp.float32)  # NCHW

    y = jax.block_until_ready(enc(x))

    # 16x16 --(k4 s2 p1)--> 8x8 --(k3 s1 p0)--> 6x6 --(k3 s1 p0)--> 4x4
    assert y.shape == (2, output_size, 4, 4), y.shape

    y_ref = jax.block_until_ready(
        _reference_forward(x, enc.weights, enc.strides, enc.pads, enc.slopes))
    max_diff = float(jnp.max(jnp.abs(y - y_ref)))
    assert bool(jnp.allclose(y, y_ref, rtol=2e-2, atol=2e-2)), ("max abs diff:", max_diff)

    print("KERNEL_OK")
</pallas_src>

<mosaic_0001>
module attributes {stable_mosaic.version = 11 : i64} {
  func.func @_encoder_kernel(%arg0: i32, %arg1: memref<1x9x9x16xf32, #tpu.memory_space<vmem>>, %arg2: memref<2x2x16x8xf32, #tpu.memory_space<vmem>>, %arg3: memref<3x3x8x16xf32, #tpu.memory_space<vmem>>, %arg4: memref<3x3x16x8xf32, #tpu.memory_space<vmem>>, %arg5: memref<1x4x4x8xf32, #tpu.memory_space<vmem>>, %arg6: memref<8x8x8xf32, #tpu.memory_space<vmem>>, %arg7: memref<6x6x16xf32, #tpu.memory_space<vmem>>) attributes {dimension_semantics = [#tpu.dimension_semantics<parallel>], iteration_bounds = array<i64: 2>, scalar_prefetch = 0 : i64, scratch_operands = 2 : i64, tpu.core_type = #tpu.core_type<tc>, window_params = [{transform_indices = @transform_0, window_bounds = array<i64: 1, 9, 9, 16>}, {pipeline_mode = #tpu.pipeline_mode<synchronous>, transform_indices = @transform_1, window_bounds = array<i64: 2, 2, 16, 8>}, {pipeline_mode = #tpu.pipeline_mode<synchronous>, transform_indices = @transform_2, window_bounds = array<i64: 3, 3, 8, 16>}, {pipeline_mode = #tpu.pipeline_mode<synchronous>, transform_indices = @transform_3, window_bounds = array<i64: 3, 3, 16, 8>}, {transform_indices = @transform_4, window_bounds = array<i64: 1, 4, 4, 8>}]} {
    %c0 = arith.constant 0 : index
    %c0_0 = arith.constant 0 : index
    %c0_1 = arith.constant 0 : index
    %c0_2 = arith.constant 0 : index
    %0 = vector.load %arg1[%c0, %c0_0, %c0_1, %c0_2] : memref<1x9x9x16xf32, #tpu.memory_space<vmem>>, vector<1x1x8x16xf32>
    %1 = vector.shape_cast %0 : vector<1x1x8x16xf32> to vector<8x16xf32>
    %c0_3 = arith.constant 0 : index
    %c0_4 = arith.constant 0 : index
    %c0_5 = arith.constant 0 : index
    %c0_6 = arith.constant 0 : index
    %2 = vector.load %arg2[%c0_3, %c0_4, %c0_5, %c0_6] : memref<2x2x16x8xf32, #tpu.memory_space<vmem>>, vector<1x1x16x8xf32>
    %3 = vector.shape_cast %2 : vector<1x1x16x8xf32> to vector<16x8xf32>
    %cst = arith.constant dense<0.000000e+00> : vector<8x8xf32>
    %4 = tpu.matmul %1, %3, %cst {dimension_numbers = #tpu.dot_dimension_numbers<[1], [0], [0], [1], [0, 0, 1, 1], [], []>} : vector<8x16xf32>, vector<16x8xf32>, vector<8x8xf32> -> vector<8x8xf32>
    %c0_7 = arith.constant 0 : index
    %c0_8 = arith.constant 0 : index
    %c1 = arith.constant 1 : index
    %c0_9 = arith.constant 0 : index
    %5 = vector.load %arg1[%c0_7, %c0_8, %c1, %c0_9] : memref<1x9x9x16xf32, #tpu.memory_space<vmem>>, vector<1x1x8x16xf32>
    %6 = vector.shape_cast %5 : vector<1x1x8x16xf32> to vector<8x16xf32>
    %c0_10 = arith.constant 0 : index
    %c1_11 = arith.constant 1 : index
    %c0_12 = arith.constant 0 : index
    %c0_13 = arith.constant 0 : index
    %7 = vector.load %arg2[%c0_10, %c1_11, %c0_12, %c0_13] : memref<2x2x16x8xf32, #tpu.memory_space<vmem>>, vector<1x1x16x8xf32>
    %8 = vector.shape_cast %7 : vector<1x1x16x8xf32> to vector<16x8xf32>
    %cst_14 = arith.constant dense<0.000000e+00> : vector<8x8xf32>
    %9 = tpu.matmul %6, %8, %cst_14 {dimension_numbers = #tpu.dot_dimension_numbers<[1], [0], [0], [1], [0, 0, 1, 1], [], []>} : vector<8x16xf32>, vector<16x8xf32>, vector<8x8xf32> -> vector<8x8xf32>
    %10 = arith.addf %4, %9 : vector<8x8xf32>
    %c0_15 = arith.constant 0 : index
    %c1_16 = arith.constant 1 : index
    %c0_17 = arith.constant 0 : index
    %c0_18 = arith.constant 0 : index
    %11 = vector.load %arg1[%c0_15, %c1_16, %c0_17, %c0_18] : memref<1x9x9x16xf32, #tpu.memory_space<vmem>>, vector<1x1x8x16xf32>
    %12 = vector.shape_cast %11 : vector<1x1x8x16xf32> to vector<8x16xf32>
    %c1_19 = arith.constant 1 : index
    %c0_20 = arith.constant 0 : index
    %c0_21 = arith.constant 0 : index
    %c0_22 = arith.constant 0 : index
    %13 = vector.load %arg2[%c1_19, %c0_20, %c0_21, %c0_22] : memref<2x2x16x8xf32, #tpu.memory_space<vmem>>, vector<1x1x16x8xf32>
    %14 = vector.shape_cast %13 : vector<1x1x16x8xf32> to vector<16x8xf32>
    %cst_23 = arith.constant dense<0.000000e+00> : vector<8x8xf32>
    %15 = tpu.matmul %12, %14, %cst_23 {dimension_numbers = #tpu.dot_dimension_numbers<[1], [0], [0], [1], [0, 0, 1, 1], [], []>} : vector<8x16xf32>, vector<16x8xf32>, vector<8x8xf32> -> vector<8x8xf32>
    %16 = arith.addf %10, %15 : vector<8x8xf32>
    %c0_24 = arith.constant 0 : index
    %c1_25 = arith.constant 1 : index
    %c1_26 = arith.constant 1 : index
    %c0_27 = arith.constant 0 : index
    %17 = vector.load %arg1[%c0_24, %c1_25, %c1_26, %c0_27] : memref<1x9x9x16xf32, #tpu.memory_space<vmem>>, vector<1x1x8x16xf32>
    %18 = vector.shape_cast %17 : vector<1x1x8x16xf32> to vector<8x16xf32>
    %c1_28 = arith.constant 1 : index
    %c1_29 = arith.constant 1 : index
    %c0_30 = arith.constant 0 : index
    %c0_31 = arith.constant 0 : index
    %19 = vector.load %arg2[%c1_28, %c1_29, %c0_30, %c0_31] : memref<2x2x16x8xf32, #tpu.memory_space<vmem>>, vector<1x1x16x8xf32>
    %20 = vector.shape_cast %19 : vector<1x1x16x8xf32> to vector<16x8xf32>
    %cst_32 = arith.constant dense<0.000000e+00> : vector<8x8xf32>
    %21 = tpu.matmul %18, %20, %cst_32 {dimension_numbers = #tpu.dot_dimension_numbers<[1], [0], [0], [1], [0, 0, 1, 1], [], []>} : vector<8x16xf32>, vector<16x8xf32>, vector<8x8xf32> -> vector<8x8xf32>
    %22 = arith.addf %16, %21 : vector<8x8xf32>
    %cst_33 = arith.constant 0.000000e+00 : f32
    %23 = vector.broadcast %cst_33 : f32 to vector<8x8xf32>
    %24 = arith.cmpf oge, %22, %23 : vector<8x8xf32>
    %cst_34 = arith.constant 2.000000e-01 : f32
    %25 = vector.broadcast %cst_34 : f32 to vector<8x8xf32>
    %26 = arith.mulf %25, %22 : vector<8x8xf32>
    %27 = arith.select %24, %22, %26 : vector<8x8xi1>, vector<8x8xf32>
    %c0_35 = arith.constant 0 : index
    %c0_36 = arith.constant 0 : index
    %c0_37 = arith.constant 0 : index
    %28 = vector.load %arg6[%c0_35, %c0_36, %c0_37] : memref<8x8x8xf32, #tpu.memory_space<vmem>>, vector<1x8x8xf32>
    %29 = vector.shape_cast %28 : vector<1x8x8xf32> to vector<8x8xf32>
    %30 = vector.shape_cast %27 : vector<8x8xf32> to vector<1x8x8xf32>
    tpu.vector_store %arg6[%c0_35, %c0_36, %c0_37], %30 {strides = array<i32>} : memref<8x8x8xf32, #tpu.memory_space<vmem>>, vector<1x8x8xf32>,
    %c0_38 = arith.constant 0 : index
    %c1_39 = arith.constant 1 : index
    %c0_40 = arith.constant 0 : index
    %c0_41 = arith.constant 0 : index
    %31 = vector.load %arg1[%c0_38, %c1_39, %c0_40, %c0_41] : memref<1x9x9x16xf32, #tpu.memory_space<vmem>>, vector<1x1x8x16xf32>
    %32 = vector.shape_cast %31 : vector<1x1x8x16xf32> to vector<8x16xf32>
    %c0_42 = arith.constant 0 : index
    %c0_43 = arith.constant 0 : index
    %c0_44 = arith.constant 0 : index
    %c0_45 = arith.constant 0 : index
    %33 = vector.load %arg2[%c0_42, %c0_43, %c0_44, %c0_45] : memref<2x2x16x8xf32, #tpu.memory_space<vmem>>, vector<1x1x16x8xf32>
    %34 = vector.shape_cast %33 : vector<1x1x16x8xf32> to vector<16x8xf32>
    %cst_46 = arith.constant dense<0.000000e+00> : vector<8x8xf32>
    %35 = tpu.matmul %32, %34, %cst_46 {dimension_numbers = #tpu.dot_dimension_numbers<[1], [0], [0], [1], [0, 0, 1, 1], [], []>} : vector<8x16xf32>, vector<16x8xf32>, vector<8x8xf32> -> vector<8x8xf32>
    %c0_47 = arith.constant 0 : index
    %c1_48 = arith.constant 1 : index
    %c1_49 = arith.constant 1 : index
    %c0_50 = arith.constant 0 : index
    %36 = vector.load %arg1[%c0_47, %c1_48, %c1_49, %c0_50] : memref<1x9x9x16xf32, #tpu.memory_space<vmem>>, vector<1x1x8x16xf32>
    %37 = vector.shape_cast %36 : vector<1x1x8x16xf32> to vector<8x16xf32>
    %c0_51 = arith.constant 0 : index
    %c1_52 = arith.constant 1 : index
    %c0_53 = arith.constant 0 : index
    %c0_54 = arith.constant 0 : index
    %38 = vector.load %arg2[%c0_51, %c1_52, %c0_53, %c0_54] : memref<2x2x16x8xf32, #tpu.memory_space<vmem>>, vector<1x1x16x8xf32>
    %39 = vector.shape_cast %38 : vector<1x1x16x8xf32> to vector<16x8xf32>
    %cst_55 = arith.constant dense<0.000000e+00> : vector<8x8xf32>
    %40 = tpu.matmul %37, %39, %cst_55 {dimension_numbers = #tpu.dot_dimension_numbers<[1], [0], [0], [1], [0, 0, 1, 1], [], []>} : vector<8x16xf32>, vector<16x8xf32>, vector<8x8xf32> -> vector<8x8xf32>
    %41 = arith.addf %35, %40 : vector<8x8xf32>
    %c0_56 = arith.constant 0 : index
    %c2 = arith.constant 2 : index
    %c0_57 = arith.constant 0 : index
    %c0_58 = arith.constant 0 : index
    %42 = vector.load %arg1[%c0_56, %c2, %c0_57, %c0_58] : memref<1x9x9x16xf32, #tpu.memory_space<vmem>>, vector<1x1x8x16xf32>
    %43 = vector.shape_cast %42 : vector<1x1x8x16xf32> to vector<8x16xf32>
    %c1_59 = arith.constant 1 : index
    %c0_60 = arith.constant 0 : index
    %c0_61 = arith.constant 0 : index
    %c0_62 = arith.constant 0 : index
    %44 = vector.load %arg2[%c1_59, %c0_60, %c0_61, %c0_62] : memref<2x2x16x8xf32, #tpu.memory_space<vmem>>, vector<1x1x16x8xf32>
    %45 = vector.shape_cast %44 : vector<1x1x16x8xf32> to vector<16x8xf32>
    %cst_63 = arith.constant dense<0.000000e+00> : vector<8x8xf32>
    %46 = tpu.matmul %43, %45, %cst_63 {dimension_numbers = #tpu.dot_dimension_numbers<[1], [0], [0], [1], [0, 0, 1, 1], [], []>} : vector<8x16xf32>, vector<16x8xf32>, vector<8x8xf32> -> vector<8x8xf32>
    %47 = arith.addf %41, %46 : vector<8x8xf32>
    %c0_64 = arith.constant 0 : index
    %c2_65 = arith.constant 2 : index
    %c1_66 = arith.constant 1 : index
    %c0_67 = arith.constant 0 : index
    %48 = vector.load %arg1[%c0_64, %c2_65, %c1_66, %c0_67] : memref<1x9x9x16xf32, #tpu.memory_space<vmem>>, vector<1x1x8x16xf32>
    %49 = vector.shape_cast %48 : vector<1x1x8x16xf32> to vector<8x16xf32>
    %c1_68 = arith.constant 1 : index
    %c1_69 = arith.constant 1 : index
    %c0_70 = arith.constant 0 : index
    %c0_71 = arith.constant 0 : index
    %50 = vector.load %arg2[%c1_68, %c1_69, %c0_70, %c0_71] : memref<2x2x16x8xf32, #tpu.memory_space<vmem>>, vector<1x1x16x8xf32>
    %51 = vector.shape_cast %50 : vector<1x1x16x8xf32> to vector<16x8xf32>
    %cst_72 = arith.constant dense<0.000000e+00> : vector<8x8xf32>
    %52 = tpu.matmul %49, %51, %cst_72 {dimension_numbers = #tpu.dot_dimension_numbers<[1], [0], [0], [1], [0, 0, 1, 1], [], []>} : vector<8x16xf32>, vector<16x8xf32>, vector<8x8xf32> -> vector<8x8xf32>
    %53 = arith.addf %47, %52 : vector<8x8xf32>
    %cst_73 = arith.constant 0.000000e+00 : f32
    %54 = vector.broadcast %cst_73 : f32 to vector<8x8xf32>
    %55 = arith.cmpf oge, %53, %54 : vector<8x8xf32>
    %cst_74 = arith.constant 2.000000e-01 : f32
    %56 = vector.broadcast %cst_74 : f32 to vector<8x8xf32>
    %57 = arith.mulf %56, %53 : vector<8x8xf32>
    %58 = arith.select %55, %53, %57 : vector<8x8xi1>, vector<8x8xf32>
    %c1_75 = arith.constant 1 : index
    %c0_76 = arith.constant 0 : index
    %c0_77 = arith.constant 0 : index
    %59 = vector.load %arg6[%c1_75, %c0_76, %c0_77] : memref<8x8x8xf32, #tpu.memory_space<vmem>>, vector<1x8x8xf32>
    %60 = vector.shape_cast %59 : vector<1x8x8xf32> to vector<8x8xf32>
    %61 = vector.shape_cast %58 : vector<8x8xf32> to vector<1x8x8xf32>
    tpu.vector_store %arg6[%c1_75, %c0_76, %c0_77], %61 {strides = array<i32>} : memref<8x8x8xf32, #tpu.memory_space<vmem>>, vector<1x8x8xf32>,
    %c0_78 = arith.constant 0 : index
    %c2_79 = arith.constant 2 : index
    %c0_80 = arith.constant 0 : index
    %c0_81 = arith.constant 0 : index
    %62 = vector.load %arg1[%c0_78, %c2_79, %c0_80, %c0_81] : memref<1x9x9x16xf32, #tpu.memory_space<vmem>>, vector<1x1x8x16xf32>
    %63 = vector.shape_cast %62 : vector<1x1x8x16xf32> to vector<8x16xf32>
    %c0_82 = arith.constant 0 : index
    %c0_83 = arith.constant 0 : index
    %c0_84 = arith.constant 0 : index
    %c0_85 = arith.constant 0 : index
    %64 = vector.load %arg2[%c0_82, %c0_83, %c0_84, %c0_85] : memref<2x2x16x8xf32, #tpu.memory_space<vmem>>, vector<1x1x16x8xf32>
    %65 = vector.shape_cast %64 : vector<1x1x16x8xf32> to vector<16x8xf32>
    %cst_86 = arith.constant dense<0.000000e+00> : vector<8x8xf32>
    %66 = tpu.matmul %63, %65, %cst_86 {dimension_numbers = #tpu.dot_dimension_numbers<[1], [0], [0], [1], [0, 0, 1, 1], [], []>} : vector<8x16xf32>, vector<16x8xf32>, vector<8x8xf32> -> vector<8x8xf32>
    %c0_87 = arith.constant 0 : index
    %c2_88 = arith.constant 2 : index
    %c1_89 = arith.constant 1 : index
    %c0_90 = arith.constant 0 : index
    %67 = vector.load %arg1[%c0_87, %c2_88, %c1_89, %c0_90] : memref<1x9x9x16xf32, #tpu.memory_space<vmem>>, vector<1x1x8x16xf32>
    %68 = vector.shape_cast %67 : vector<1x1x8x16xf32> to vector<8x16xf32>
    %c0_91 = arith.constant 0 : index
    %c1_92 = arith.constant 1 : index
    %c0_93 = arith.constant 0 : index
    %c0_94 = arith.constant 0 : index
    %69 = vector.load %arg2[%c0_91, %c1_92, %c0_93, %c0_94] : memref<2x2x16x8xf32, #tpu.memory_space<vmem>>, vector<1x1x16x8xf32>
    %70 = vector.shape_cast %69 : vector<1x1x16x8xf32> to vector<16x8xf32>
    %cst_95 = arith.constant dense<0.000000e+00> : vector<8x8xf32>
    %71 = tpu.matmul %68, %70, %cst_95 {dimension_numbers = #tpu.dot_dimension_numbers<[1], [0], [0], [1], [0, 0, 1, 1], [], []>} : vector<8x16xf32>, vector<16x8xf32>, vector<8x8xf32> -> vector<8x8xf32>
    %72 = arith.addf %66, %71 : vector<8x8xf32>
    %c0_96 = arith.constant 0 : index
    %c3 = arith.constant 3 : index
    %c0_97 = arith.constant 0 : index
    %c0_98 = arith.constant 0 : index
    %73 = vector.load %arg1[%c0_96, %c3, %c0_97, %c0_98] : memref<1x9x9x16xf32, #tpu.memory_space<vmem>>, vector<1x1x8x16xf32>
    %74 = vector.shape_cast %73 : vector<1x1x8x16xf32> to vector<8x16xf32>
    %c1_99 = arith.constant 1 : index
    %c0_100 = arith.constant 0 : index
    %c0_101 = arith.constant 0 : index
    %c0_102 = arith.constant 0 : index
    %75 = vector.load %arg2[%c1_99, %c0_100, %c0_101, %c0_102] : memref<2x2x16x8xf32, #tpu.memory_space<vmem>>, vector<1x1x16x8xf32>
    %76 = vector.shape_cast %75 : vector<1x1x16x8xf32> to vector<16x8xf32>
    %cst_103 = arith.constant dense<0.000000e+00> : vector<8x8xf32>
    %77 = tpu.matmul %74, %76, %cst_103 {dimension_numbers = #tpu.dot_dimension_numbers<[1], [0], [0], [1], [0, 0, 1, 1], [], []>} : vector<8x16xf32>, vector<16x8xf32>, vector<8x8xf32> -> vector<8x8xf32>
    %78 = arith.addf %72, %77 : vector<8x8xf32>
    %c0_104 = arith.constant 0 : index
    %c3_105 = arith.constant 3 : index
    %c1_106 = arith.constant 1 : index
    %c0_107 = arith.constant 0 : index
    %79 = vector.load %arg1[%c0_104, %c3_105, %c1_106, %c0_107] : memref<1x9x9x16xf32, #tpu.memory_space<vmem>>, vector<1x1x8x16xf32>
    %80 = vector.shape_cast %79 : vector<1x1x8x16xf32> to vector<8x16xf32>
    %c1_108 = arith.constant 1 : index
    %c1_109 = arith.constant 1 : index
    %c0_110 = arith.constant 0 : index
    %c0_111 = arith.constant 0 : index
    %81 = vector.load %arg2[%c1_108, %c1_109, %c0_110, %c0_111] : memref<2x2x16x8xf32, #tpu.memory_space<vmem>>, vector<1x1x16x8xf32>
    %82 = vector.shape_cast %81 : vector<1x1x16x8xf32> to vector<16x8xf32>
    %cst_112 = arith.constant dense<0.000000e+00> : vector<8x8xf32>
    %83 = tpu.matmul %80, %82, %cst_112 {dimension_numbers = #tpu.dot_dimension_numbers<[1], [0], [0], [1], [0, 0, 1, 1], [], []>} : vector<8x16xf32>, vector<16x8xf32>, vector<8x8xf32> -> vector<8x8xf32>
    %84 = arith.addf %78, %83 : vector<8x8xf32>
    %cst_113 = arith.constant 0.000000e+00 : f32
    %85 = vector.broadcast %cst_113 : f32 to vector<8x8xf32>
    %86 = arith.cmpf oge, %84, %85 : vector<8x8xf32>
    %cst_114 = arith.constant 2.000000e-01 : f32
    %87 = vector.broadcast %cst_114 : f32 to vector<8x8xf32>
    %88 = arith.mulf %87, %84 : vector<8x8xf32>
    %89 = arith.select %86, %84, %88 : vector<8x8xi1>, vector<8x8xf32>
    %c2_115 = arith.constant 2 : index
    %c0_116 = arith.constant 0 : index
    %c0_117 = arith.constant 0 : index
    %90 = vector.load %arg6[%c2_115, %c0_116, %c0_117] : memref<8x8x8xf32, #tpu.memory_space<vmem>>, vector<1x8x8xf32>
    %91 = vector.shape_cast %90 : vector<1x8x8xf32> to vector<8x8xf32>
    %92 = vector.shape_cast %89 : vector<8x8xf32> to vector<1x8x8xf32>
    tpu.vector_store %arg6[%c2_115, %c0_116, %c0_117], %92 {strides = array<i32>} : memref<8x8x8xf32, #tpu.memory_space<vmem>>, vector<1x8x8xf32>,
    %c0_118 = arith.constant 0 : index
    %c3_119 = arith.constant 3 : index
    %c0_120 = arith.constant 0 : index
    %c0_121 = arith.constant 0 : index
    %93 = vector.load %arg1[%c0_118, %c3_119, %c0_120, %c0_121] : memref<1x9x9x16xf32, #tpu.memory_space<vmem>>, vector<1x1x8x16xf32>
    %94 = vector.shape_cast %93 : vector<1x1x8x16xf32> to vector<8x16xf32>
    %c0_122 = arith.constant 0 : index
    %c0_123 = arith.constant 0 : index
    %c0_124 = arith.constant 0 : index
    %c0_125 = arith.constant 0 : index
    %95 = vector.load %arg2[%c0_122, %c0_123, %c0_124, %c0_125] : memref<2x2x16x8xf32, #tpu.memory_space<vmem>>, vector<1x1x16x8xf32>
    %96 = vector.shape_cast %95 : vector<1x1x16x8xf32> to vector<16x8xf32>
    %cst_126 = arith.constant dense<0.000000e+00> : vector<8x8xf32>
    %97 = tpu.matmul %94, %96, %cst_126 {dimension_numbers = #tpu.dot_dimension_numbers<[1], [0], [0], [1], [0, 0, 1, 1], [], []>} : vector<8x16xf32>, vector<16x8xf32>, vector<8x8xf32> -> vector<8x8xf32>
    %c0_127 = arith.constant 0 : index
    %c3_128 = arith.constant 3 : index
    %c1_129 = arith.constant 1 : index
    %c0_130 = arith.constant 0 : index
    %98 = vector.load %arg1[%c0_127, %c3_128, %c1_129, %c0_130] : memref<1x9x9x16xf32, #tpu.memory_space<vmem>>, vector<1x1x8x16xf32>
    %99 = vector.shape_cast %98 : vector<1x1x8x16xf32> to vector<8x16xf32>
    %c0_131 = arith.constant 0 : index
    %c1_132 = arith.constant 1 : index
    %c0_133 = arith.constant 0 : index
    %c0_134 = arith.constant 0 : index
    %100 = vector.load %arg2[%c0_131, %c1_132, %c0_133, %c0_134] : memref<2x2x16x8xf32, #tpu.memory_space<vmem>>, vector<1x1x16x8xf32>
    %101 = vector.shape_cast %100 : vector<1x1x16x8xf32> to vector<16x8xf32>
    %cst_135 = arith.constant dense<0.000000e+00> : vector<8x8xf32>
    %102 = tpu.matmul %99, %101, %cst_135 {dimension_numbers = #tpu.dot_dimension_numbers<[1], [0], [0], [1], [0, 0, 1, 1], [], []>} : vector<8x16xf32>, vector<16x8xf32>, vector<8x8xf32> -> vector<8x8xf32>
    %103 = arith.addf %97, %102 : vector<8x8xf32>
    %c0_136 = arith.constant 0 : index
    %c4 = arith.constant 4 : index
    %c0_137 = arith.constant 0 : index
    %c0_138 = arith.constant 0 : index
    %104 = vector.load %arg1[%c0_136, %c4, %c0_137, %c0_138] : memref<1x9x9x16xf32, #tpu.memory_space<vmem>>, vector<1x1x8x16xf32>
    %105 = vector.shape_cast %104 : vector<1x1x8x16xf32> to vector<8x16xf32>
    %c1_139 = arith.constant 1 : index
    %c0_140 = arith.constant 0 : index
    %c0_141 = arith.constant 0 : index
    %c0_142 = arith.constant 0 : index
    %106 = vector.load %arg2[%c1_139, %c0_140, %c0_141, %c0_142] : memref<2x2x16x8xf32, #tpu.memory_space<vmem>>, vector<1x1x16x8xf32>
    %107 = vector.shape_cast %106 : vector<1x1x16x8xf32> to vector<16x8xf32>
    %cst_143 = arith.constant dense<0.000000e+00> : vector<8x8xf32>
    %108 = tpu.matmul %105, %107, %cst_143 {dimension_numbers = #tpu.dot_dimension_numbers<[1], [0], [0], [1], [0, 0, 1, 1], [], []>} : vector<8x16xf32>, vector<16x8xf32>, vector<8x8xf32> -> vector<8x8xf32>
    %109 = arith.addf %103, %108 : vector<8x8xf32>
    %c0_144 = arith.constant 0 : index
    %c4_145 = arith.constant 4 : index
    %c1_146 = arith.constant 1 : index
    %c0_147 = arith.constant 0 : index
    %110 = vector.load %arg1[%c0_144, %c4_145, %c1_146, %c0_147] : memref<1x9x9x16xf32, #tpu.memory_space<vmem>>, vector<1x1x8x16xf32>
    %111 = vector.shape_cast %110 : vector<1x1x8x16xf32> to vector<8x16xf32>
    %c1_148 = arith.constant 1 : index
    %c1_149 = arith.constant 1 : index
    %c0_150 = arith.constant 0 : index
    %c0_151 = arith.constant 0 : index
    %112 = vector.load %arg2[%c1_148, %c1_149, %c0_150, %c0_151] : memref<2x2x16x8xf32, #tpu.memory_space<vmem>>, vector<1x1x16x8xf32>
    %113 = vector.shape_cast %112 : vector<1x1x16x8xf32> to vector<16x8xf32>
    %cst_152 = arith.constant dense<0.000000e+00> : vector<8x8xf32>
    %114 = tpu.matmul %111, %113, %cst_152 {dimension_numbers = #tpu.dot_dimension_numbers<[1], [0], [0], [1], [0, 0, 1, 1], [], []>} : vector<8x16xf32>, vector<16x8xf32>, vector<8x8xf32> -> vector<8x8xf32>
    %115 = arith.addf %109, %114 : vector<8x8xf32>
    %cst_153 = arith.constant 0.000000e+00 : f32
    %116 = vector.broadcast %cst_153 : f32 to vector<8x8xf32>
    %117 = arith.cmpf oge, %115, %116 : vector<8x8xf32>
    %cst_154 = arith.constant 2.000000e-01 : f32
    %118 = vector.broadcast %cst_154 : f32 to vector<8x8xf32>
    %119 = arith.mulf %118, %115 : vector<8x8xf32>
    %120 = arith.select %117, %115, %119 : vector<8x8xi1>, vector<8x8xf32>
    %c3_155 = arith.constant 3 : index
    %c0_156 = arith.constant 0 : index
    %c0_157 = arith.constant 0 : index
    %121 = vector.load %arg6[%c3_155, %c0_156, %c0_157] : memref<8x8x8xf32, #tpu.memory_space<vmem>>, vector<1x8x8xf32>
    %122 = vector.shape_cast %121 : vector<1x8x8xf32> to vector<8x8xf32>
    %123 = vector.shape_cast %120 : vector<8x8xf32> to vector<1x8x8xf32>
    tpu.vector_store %arg6[%c3_155, %c0_156, %c0_157], %123 {strides = array<i32>} : memref<8x8x8xf32, #tpu.memory_space<vmem>>, vector<1x8x8xf32>,
    %c0_158 = arith.constant 0 : index
    %c4_159 = arith.constant 4 : index
    %c0_160 = arith.constant 0 : index
    %c0_161 = arith.constant 0 : index
    %124 = vector.load %arg1[%c0_158, %c4_159, %c0_160, %c0_161] : memref<1x9x9x16xf32, #tpu.memory_space<vmem>>, vector<1x1x8x16xf32>
    %125 = vector.shape_cast %124 : vector<1x1x8x16xf32> to vector<8x16xf32>
    %c0_162 = arith.constant 0 : index
    %c0_163 = arith.constant 0 : index
    %c0_164 = arith.constant 0 : index
    %c0_165 = arith.constant 0 : index
    %126 = vector.load %arg2[%c0_162, %c0_163, %c0_164, %c0_165] : memref<2x2x16x8xf32, #tpu.memory_space<vmem>>, vector<1x1x16x8xf32>
    %127 = vector.shape_cast %126 : vector<1x1x16x8xf32> to vector<16x8xf32>
    %cst_166 = arith.constant dense<0.000000e+00> : vector<8x8xf32>
    %128 = tpu.matmul %125, %127, %cst_166 {dimension_numbers = #tpu.dot_dimension_numbers<[1], [0], [0], [1], [0, 0, 1, 1], [], []>} : vector<8x16xf32>, vector<16x8xf32>, vector<8x8xf32> -> vector<8x8xf32>
    %c0_167 = arith.constant 0 : index
    %c4_168 = arith.constant 4 : index
    %c1_169 = arith.constant 1 : index
    %c0_170 = arith.constant 0 : index
    %129 = vector.load %arg1[%c0_167, %c4_168, %c1_169, %c0_170] : memref<1x9x9x16xf32, #tpu.memory_space<vmem>>, vector<1x1x8x16xf32>
    %130 = vector.shape_cast %129 : vector<1x1x8x16xf32> to vector<8x16xf32>
    %c0_171 = arith.constant 0 : index
    %c1_172 = arith.constant 1 : index
    %c0_173 = arith.constant 0 : index
    %c0_174 = arith.constant 0 : index
    %131 = vector.load %arg2[%c0_171, %c1_172, %c0_173, %c0_174] : memref<2x2x16x8xf32, #tpu.memory_space<vmem>>, vector<1x1x16x8xf32>
    %132 = vector.shape_cast %131 : vector<1x1x16x8xf32> to vector<16x8xf32>
    %cst_175 = arith.constant dense<0.000000e+00> : vector<8x8xf32>
    %133 = tpu.matmul %130, %132, %cst_175 {dimension_numbers = #tpu.dot_dimension_numbers<[1], [0], [0], [1], [0, 0, 1, 1], [], []>} : vector<8x16xf32>, vector<16x8xf32>, vector<8x8xf32> -> vector<8x8xf32>
    %134 = arith.addf %128, %133 : vector<8x8xf32>
    %c0_176 = arith.constant 0 : index
    %c5 = arith.constant 5 : index
    %c0_177 = arith.constant 0 : index
    %c0_178 = arith.constant 0 : index
    %135 = vector.load %arg1[%c0_176, %c5, %c0_177, %c0_178] : memref<1x9x9x16xf32, #tpu.memory_space<vmem>>, vector<1x1x8x16xf32>
    %136 = vector.shape_cast %135 : vector<1x1x8x16xf32> to vector<8x16xf32>
    %c1_179 = arith.constant 1 : index
    %c0_180 = arith.constant 0 : index
    %c0_181 = arith.constant 0 : index
    %c0_182 = arith.constant 0 : index
    %137 = vector.load %arg2[%c1_179, %c0_180, %c0_181, %c0_182] : memref<2x2x16x8xf32, #tpu.memory_space<vmem>>, vector<1x1x16x8xf32>
    %138 = vector.shape_cast %137 : vector<1x1x16x8xf32> to vector<16x8xf32>
    %cst_183 = arith.constant dense<0.000000e+00> : vector<8x8xf32>
    %139 = tpu.matmul %136, %138, %cst_183 {dimension_numbers = #tpu.dot_dimension_numbers<[1], [0], [0], [1], [0, 0, 1, 1], [], []>} : vector<8x16xf32>, vector<16x8xf32>, vector<8x8xf32> -> vector<8x8xf32>
    %140 = arith.addf %134, %139 : vector<8x8xf32>
    %c0_184 = arith.constant 0 : index
    %c5_185 = arith.constant 5 : index
    %c1_186 = arith.constant 1 : index
    %c0_187 = arith.constant 0 : index
    %141 = vector.load %arg1[%c0_184, %c5_185, %c1_186, %c0_187] : memref<1x9x9x16xf32, #tpu.memory_space<vmem>>, vector<1x1x8x16xf32>
    %142 = vector.shape_cast %141 : vector<1x1x8x16xf32> to vector<8x16xf32>
    %c1_188 = arith.constant 1 : index
    %c1_189 = arith.constant 1 : index
    %c0_190 = arith.constant 0 : index
    %c0_191 = arith.constant 0 : index
    %143 = vector.load %arg2[%c1_188, %c1_189, %c0_190, %c0_191] : memref<2x2x16x8xf32, #tpu.memory_space<vmem>>, vector<1x1x16x8xf32>
    %144 = vector.shape_cast %143 : vector<1x1x16x8xf32> to vector<16x8xf32>
    %cst_192 = arith.constant dense<0.000000e+00> : vector<8x8xf32>
    %145 = tpu.matmul %142, %144, %cst_192 {dimension_numbers = #tpu.dot_dimension_numbers<[1], [0], [0], [1], [0, 0, 1, 1], [], []>} : vector<8x16xf32>, vector<16x8xf32>, vector<8x8xf32> -> vector<8x8xf32>
    %146 = arith.addf %140, %145 : vector<8x8xf32>
    %cst_193 = arith.constant 0.000000e+00 : f32
    %147 = vector.broadcast %cst_193 : f32 to vector<8x8xf32>
    %148 = arith.cmpf oge, %146, %147 : vector<8x8xf32>
    %cst_194 = arith.constant 2.000000e-01 : f32
    %149 = vector.broadcast %cst_194 : f32 to vector<8x8xf32>
    %150 = arith.mulf %149, %146 : vector<8x8xf32>
    %151 = arith.select %148, %146, %150 : vector<8x8xi1>, vector<8x8xf32>
    %c4_195 = arith.constant 4 : index
    %c0_196 = arith.constant 0 : index
    %c0_197 = arith.constant 0 : index
    %152 = vector.load %arg6[%c4_195, %c0_196, %c0_197] : memref<8x8x8xf32, #tpu.memory_space<vmem>>, vector<1x8x8xf32>
    %153 = vector.shape_cast %152 : vector<1x8x8xf32> to vector<8x8xf32>
    %154 = vector.shape_cast %151 : vector<8x8xf32> to vector<1x8x8xf32>
    tpu.vector_store %arg6[%c4_195, %c0_196, %c0_197], %154 {strides = array<i32>} : memref<8x8x8xf32, #tpu.memory_space<vmem>>, vector<1x8x8xf32>,
    %c0_198 = arith.constant 0 : index
    %c5_199 = arith.constant 5 : index
    %c0_200 = arith.constant 0 : index
    %c0_201 = arith.constant 0 : index
    %155 = vector.load %arg1[%c0_198, %c5_199, %c0_200, %c0_201] : memref<1x9x9x16xf32, #tpu.memory_space<vmem>>, vector<1x1x8x16xf32>
    %156 = vector.shape_cast %155 : vector<1x1x8x16xf32> to vector<8x16xf32>
    %c0_202 = arith.constant 0 : index
    %c0_203 = arith.constant 0 : index
    %c0_204 = arith.constant 0 : index
    %c0_205 = arith.constant 0 : index
    %157 = vector.load %arg2[%c0_202, %c0_203, %c0_204, %c0_205] : memref<2x2x16x8xf32, #tpu.memory_space<vmem>>, vector<1x1x16x8xf32>
    %158 = vector.shape_cast %157 : vector<1x1x16x8xf32> to vector<16x8xf32>
    %cst_206 = arith.constant dense<0.000000e+00> : vector<8x8xf32>
    %159 = tpu.matmul %156, %158, %cst_206 {dimension_numbers = #tpu.dot_dimension_numbers<[1], [0], [0], [1], [0, 0, 1, 1], [], []>} : vector<8x16xf32>, vector<16x8xf32>, vector<8x8xf32> -> vector<8x8xf32>
    %c0_207 = arith.constant 0 : index
    %c5_208 = arith.constant 5 : index
    %c1_209 = arith.constant 1 : index
    %c0_210 = arith.constant 0 : index
    %160 = vector.load %arg1[%c0_207, %c5_208, %c1_209, %c0_210] : memref<1x9x9x16xf32, #tpu.memory_space<vmem>>, vector<1x1x8x16xf32>
    %161 = vector.shape_cast %160 : vector<1x1x8x16xf32> to vector<8x16xf32>
    %c0_211 = arith.constant 0 : index
    %c1_212 = arith.constant 1 : index
    %c0_213 = arith.constant 0 : index
    %c0_214 = arith.constant 0 : index
    %162 = vector.load %arg2[%c0_211, %c1_212, %c0_213, %c0_214] : memref<2x2x16x8xf32, #tpu.memory_space<vmem>>, vector<1x1x16x8xf32>
    %163 = vector.shape_cast %162 : vector<1x1x16x8xf32> to vector<16x8xf32>
    %cst_215 = arith.constant dense<0.000000e+00> : vector<8x8xf32>
    %164 = tpu.matmul %161, %163, %cst_215 {dimension_numbers = #tpu.dot_dimension_numbers<[1], [0], [0], [1], [0, 0, 1, 1], [], []>} : vector<8x16xf32>, vector<16x8xf32>, vector<8x8xf32> -> vector<8x8xf32>
    %165 = arith.addf %159, %164 : vector<8x8xf32>
    %c0_216 = arith.constant 0 : index
    %c6 = arith.constant 6 : index
    %c0_217 = arith.constant 0 : index
    %c0_218 = arith.constant 0 : index
    %166 = vector.load %arg1[%c0_216, %c6, %c0_217, %c0_218] : memref<1x9x9x16xf32, #tpu.memory_space<vmem>>, vector<1x1x8x16xf32>
    %167 = vector.shape_cast %166 : vector<1x1x8x16xf32> to vector<8x16xf32>
    %c1_219 = arith.constant 1 : index
    %c0_220 = arith.constant 0 : index
    %c0_221 = arith.constant 0 : index
    %c0_222 = arith.constant 0 : index
    %168 = vector.load %arg2[%c1_219, %c0_220, %c0_221, %c0_222] : memref<2x2x16x8xf32, #tpu.memory_space<vmem>>, vector<1x1x16x8xf32>
    %169 = vector.shape_cast %168 : vector<1x1x16x8xf32> to vector<16x8xf32>
    %cst_223 = arith.constant dense<0.000000e+00> : vector<8x8xf32>
    %170 = tpu.matmul %167, %169, %cst_223 {dimension_numbers = #tpu.dot_dimension_numbers<[1], [0], [0], [1], [0, 0, 1, 1], [], []>} : vector<8x16xf32>, vector<16x8xf32>, vector<8x8xf32> -> vector<8x8xf32>
    %171 = arith.addf %165, %170 : vector<8x8xf32>
    %c0_224 = arith.constant 0 : index
    %c6_225 = arith.constant 6 : index
    %c1_226 = arith.constant 1 : index
    %c0_227 = arith.constant 0 : index
    %172 = vector.load %arg1[%c0_224, %c6_225, %c1_226, %c0_227] : memref<1x9x9x16xf32, #tpu.memory_space<vmem>>, vector<1x1x8x16xf32>
    %173 = vector.shape_cast %172 : vector<1x1x8x16xf32> to vector<8x16xf32>
    %c1_228 = arith.constant 1 : index
    %c1_229 = arith.constant 1 : index
    %c0_230 = arith.constant 0 : index
    %c0_231 = arith.constant 0 : index
    %174 = vector.load %arg2[%c1_228, %c1_229, %c0_230, %c0_231] : memref<2x2x16x8xf32, #tpu.memory_space<vmem>>, vector<1x1x16x8xf32>
    %175 = vector.shape_cast %174 : vector<1x1x16x8xf32> to vector<16x8xf32>
    %cst_232 = arith.constant dense<0.000000e+00> : vector<8x8xf32>
    %176 = tpu.matmul %173, %175, %cst_232 {dimension_numbers = #tpu.dot_dimension_numbers<[1], [0], [0], [1], [0, 0, 1, 1], [], []>} : vector<8x16xf32>, vector<16x8xf32>, vector<8x8xf32> -> vector<8x8xf32>
    %177 = arith.addf %171, %176 : vector<8x8xf32>
    %cst_233 = arith.constant 0.000000e+00 : f32
    %178 = vector.broadcast %cst_233 : f32 to vector<8x8xf32>
    %179 = arith.cmpf oge, %177, %178 : vector<8x8xf32>
    %cst_234 = arith.constant 2.000000e-01 : f32
    %180 = vector.broadcast %cst_234 : f32 to vector<8x8xf32>
    %181 = arith.mulf %180, %177 : vector<8x8xf32>
    %182 = arith.select %179, %177, %181 : vector<8x8xi1>, vector<8x8xf32>
    %c5_235 = arith.constant 5 : index
    %c0_236 = arith.constant 0 : index
    %c0_237 = arith.constant 0 : index
    %183 = vector.load %arg6[%c5_235, %c0_236, %c0_237] : memref<8x8x8xf32, #tpu.memory_space<vmem>>, vector<1x8x8xf32>
    %184 = vector.shape_cast %183 : vector<1x8x8xf32> to vector<8x8xf32>
    %185 = vector.shape_cast %182 : vector<8x8xf32> to vector<1x8x8xf32>
    tpu.vector_store %arg6[%c5_235, %c0_236, %c0_237], %185 {strides = array<i32>} : memref<8x8x8xf32, #tpu.memory_space<vmem>>, vector<1x8x8xf32>,
    %c0_238 = arith.constant 0 : index
    %c6_239 = arith.constant 6 : index
    %c0_240 = arith.constant 0 : index
    %c0_241 = arith.constant 0 : index
    %186 = vector.load %arg1[%c0_238, %c6_239, %c0_240, %c0_241] : memref<1x9x9x16xf32, #tpu.memory_space<vmem>>, vector<1x1x8x16xf32>
    %187 = vector.shape_cast %186 : vector<1x1x8x16xf32> to vector<8x16xf32>
    %c0_242 = arith.constant 0 : index
    %c0_243 = arith.constant 0 : index
    %c0_244 = arith.constant 0 : index
    %c0_245 = arith.constant 0 : index
    %188 = vector.load %arg2[%c0_242, %c0_243, %c0_244, %c0_245] : memref<2x2x16x8xf32, #tpu.memory_space<vmem>>, vector<1x1x16x8xf32>
    %189 = vector.shape_cast %188 : vector<1x1x16x8xf32> to vector<16x8xf32>
    %cst_246 = arith.constant dense<0.000000e+00> : vector<8x8xf32>
    %190 = tpu.matmul %187, %189, %cst_246 {dimension_numbers = #tpu.dot_dimension_numbers<[1], [0], [0], [1], [0, 0, 1, 1], [], []>} : vector<8x16xf32>, vector<16x8xf32>, vector<8x8xf32> -> vector<8x8xf32>
    %c0_247 = arith.constant 0 : index
    %c6_248 = arith.constant 6 : index
    %c1_249 = arith.constant 1 : index
    %c0_250 = arith.constant 0 : index
    %191 = vector.load %arg1[%c0_247, %c6_248, %c1_249, %c0_250] : memref<1x9x9x16xf32, #tpu.memory_space<vmem>>, vector<1x1x8x16xf32>
    %192 = vector.shape_cast %191 : vector<1x1x8x16xf32> to vector<8x16xf32>
    %c0_251 = arith.constant 0 : index
    %c1_252 = arith.constant 1 : index
    %c0_253 = arith.constant 0 : index
    %c0_254 = arith.constant 0 : index
    %193 = vector.load %arg2[%c0_251, %c1_252, %c0_253, %c0_254] : memref<2x2x16x8xf32, #tpu.memory_space<vmem>>, vector<1x1x16x8xf32>
    %194 = vector.shape_cast %193 : vector<1x1x16x8xf32> to vector<16x8xf32>
    %cst_255 = arith.constant dense<0.000000e+00> : vector<8x8xf32>
    %195 = tpu.matmul %192, %194, %cst_255 {dimension_numbers = #tpu.dot_dimension_numbers<[1], [0], [0], [1], [0, 0, 1, 1], [], []>} : vector<8x16xf32>, vector<16x8xf32>, vector<8x8xf32> -> vector<8x8xf32>
    %196 = arith.addf %190, %195 : vector<8x8xf32>
    %c0_256 = arith.constant 0 : index
    %c7 = arith.constant 7 : index
    %c0_257 = arith.constant 0 : index
    %c0_258 = arith.constant 0 : index
    %197 = vector.load %arg1[%c0_256, %c7, %c0_257, %c0_258] : memref<1x9x9x16xf32, #tpu.memory_space<vmem>>, vector<1x1x8x16xf32>
    %198 = vector.shape_cast %197 : vector<1x1x8x16xf32> to vector<8x16xf32>
    %c1_259 = arith.constant 1 : index
    %c0_260 = arith.constant 0 : index
    %c0_261 = arith.constant 0 : index
    %c0_262 = arith.constant 0 : index
    %199 = vector.load %arg2[%c1_259, %c0_260, %c0_261, %c0_262] : memref<2x2x16x8xf32, #tpu.memory_space<vmem>>, vector<1x1x16x8xf32>
    %200 = vector.shape_cast %199 : vector<1x1x16x8xf32> to vector<16x8xf32>
    %cst_263 = arith.constant dense<0.000000e+00> : vector<8x8xf32>
    %201 = tpu.matmul %198, %200, %cst_263 {dimension_numbers = #tpu.dot_dimension_numbers<[1], [0], [0], [1], [0, 0, 1, 1], [], []>} : vector<8x16xf32>, vector<16x8xf32>, vector<8x8xf32> -> vector<8x8xf32>
    %202 = arith.addf %196, %201 : vector<8x8xf32>
    %c0_264 = arith.constant 0 : index
    %c7_265 = arith.constant 7 : index
    %c1_266 = arith.constant 1 : index
    %c0_267 = arith.constant 0 : index
    %203 = vector.load %arg1[%c0_264, %c7_265, %c1_266, %c0_267] : memref<1x9x9x16xf32, #tpu.memory_space<vmem>>, vector<1x1x8x16xf32>
    %204 = vector.shape_cast %203 : vector<1x1x8x16xf32> to vector<8x16xf32>
    %c1_268 = arith.constant 1 : index
    %c1_269 = arith.constant 1 : index
    %c0_270 = arith.constant 0 : index
    %c0_271 = arith.constant 0 : index
    %205 = vector.load %arg2[%c1_268, %c1_269, %c0_270, %c0_271] : memref<2x2x16x8xf32, #tpu.memory_space<vmem>>, vector<1x1x16x8xf32>
    %206 = vector.shape_cast %205 : vector<1x1x16x8xf32> to vector<16x8xf32>
    %cst_272 = arith.constant dense<0.000000e+00> : vector<8x8xf32>
    %207 = tpu.matmul %204, %206, %cst_272 {dimension_numbers = #tpu.dot_dimension_numbers<[1], [0], [0], [1], [0, 0, 1, 1], [], []>} : vector<8x16xf32>, vector<16x8xf32>, vector<8x8xf32> -> vector<8x8xf32>
    %208 = arith.addf %202, %207 : vector<8x8xf32>
    %cst_273 = arith.constant 0.000000e+00 : f32
    %209 = vector.broadcast %cst_273 : f32 to vector<8x8xf32>
    %210 = arith.cmpf oge, %208, %209 : vector<8x8xf32>
    %cst_274 = arith.constant 2.000000e-01 : f32
    %211 = vector.broadcast %cst_274 : f32 to vector<8x8xf32>
    %212 = arith.mulf %211, %208 : vector<8x8xf32>
    %213 = arith.select %210, %208, %212 : vector<8x8xi1>, vector<8x8xf32>
    %c6_275 = arith.constant 6 : index
    %c0_276 = arith.constant 0 : index
    %c0_277 = arith.constant 0 : index
    %214 = vector.load %arg6[%c6_275, %c0_276, %c0_277] : memref<8x8x8xf32, #tpu.memory_space<vmem>>, vector<1x8x8xf32>
    %215 = vector.shape_cast %214 : vector<1x8x8xf32> to vector<8x8xf32>
    %216 = vector.shape_cast %213 : vector<8x8xf32> to vector<1x8x8xf32>
    tpu.vector_store %arg6[%c6_275, %c0_276, %c0_277], %216 {strides = array<i32>} : memref<8x8x8xf32, #tpu.memory_space<vmem>>, vector<1x8x8xf32>,
    %c0_278 = arith.constant 0 : index
    %c7_279 = arith.constant 7 : index
    %c0_280 = arith.constant 0 : index
    %c0_281 = arith.constant 0 : index
    %217 = vector.load %arg1[%c0_278, %c7_279, %c0_280, %c0_281] : memref<1x9x9x16xf32, #tpu.memory_space<vmem>>, vector<1x1x8x16xf32>
    %218 = vector.shape_cast %217 : vector<1x1x8x16xf32> to vector<8x16xf32>
    %c0_282 = arith.constant 0 : index
    %c0_283 = arith.constant 0 : index
    %c0_284 = arith.constant 0 : index
    %c0_285 = arith.constant 0 : index
    %219 = vector.load %arg2[%c0_282, %c0_283, %c0_284, %c0_285] : memref<2x2x16x8xf32, #tpu.memory_space<vmem>>, vector<1x1x16x8xf32>
    %220 = vector.shape_cast %219 : vector<1x1x16x8xf32> to vector<16x8xf32>
    %cst_286 = arith.constant dense<0.000000e+00> : vector<8x8xf32>
    %221 = tpu.matmul %218, %220, %cst_286 {dimension_numbers = #tpu.dot_dimension_numbers<[1], [0], [0], [1], [0, 0, 1, 1], [], []>} : vector<8x16xf32>, vector<16x8xf32>, vector<8x8xf32> -> vector<8x8xf32>
    %c0_287 = arith.constant 0 : index
    %c7_288 = arith.constant 7 : index
    %c1_289 = arith.constant 1 : index
    %c0_290 = arith.constant 0 : index
    %222 = vector.load %arg1[%c0_287, %c7_288, %c1_289, %c0_290] : memref<1x9x9x16xf32, #tpu.memory_space<vmem>>, vector<1x1x8x16xf32>
    %223 = vector.shape_cast %222 : vector<1x1x8x16xf32> to vector<8x16xf32>
    %c0_291 = arith.constant 0 : index
    %c1_292 = arith.constant 1 : index
    %c0_293 = arith.constant 0 : index
    %c0_294 = arith.constant 0 : index
    %224 = vector.load %arg2[%c0_291, %c1_292, %c0_293, %c0_294] : memref<2x2x16x8xf32, #tpu.memory_space<vmem>>, vector<1x1x16x8xf32>
    %225 = vector.shape_cast %224 : vector<1x1x16x8xf32> to vector<16x8xf32>
    %cst_295 = arith.constant dense<0.000000e+00> : vector<8x8xf32>
    %226 = tpu.matmul %223, %225, %cst_295 {dimension_numbers = #tpu.dot_dimension_numbers<[1], [0], [0], [1], [0, 0, 1, 1], [], []>} : vector<8x16xf32>, vector<16x8xf32>, vector<8x8xf32> -> vector<8x8xf32>
    %227 = arith.addf %221, %226 : vector<8x8xf32>
    %c0_296 = arith.constant 0 : index
    %c8 = arith.constant 8 : index
    %c0_297 = arith.constant 0 : index
    %c0_298 = arith.constant 0 : index
    %228 = vector.load %arg1[%c0_296, %c8, %c0_297, %c0_298] : memref<1x9x9x16xf32, #tpu.memory_space<vmem>>, vector<1x1x8x16xf32>
    %229 = vector.shape_cast %228 : vector<1x1x8x16xf32> to vector<8x16xf32>
    %c1_299 = arith.constant 1 : index
    %c0_300 = arith.constant 0 : index
    %c0_301 = arith.constant 0 : index
    %c0_302 = arith.constant 0 : index
    %230 = vector.load %arg2[%c1_299, %c0_300, %c0_301, %c0_302] : memref<2x2x16x8xf32, #tpu.memory_space<vmem>>, vector<1x1x16x8xf32>
    %231 = vector.shape_cast %230 : vector<1x1x16x8xf32> to vector<16x8xf32>
    %cst_303 = arith.constant dense<0.000000e+00> : vector<8x8xf32>
    %232 = tpu.matmul %229, %231, %cst_303 {dimension_numbers = #tpu.dot_dimension_numbers<[1], [0], [0], [1], [0, 0, 1, 1], [], []>} : vector<8x16xf32>, vector<16x8xf32>, vector<8x8xf32> -> vector<8x8xf32>
    %233 = arith.addf %227, %232 : vector<8x8xf32>
    %c0_304 = arith.constant 0 : index
    %c8_305 = arith.constant 8 : index
    %c1_306 = arith.constant 1 : index
    %c0_307 = arith.constant 0 : index
    %234 = vector.load %arg1[%c0_304, %c8_305, %c1_306, %c0_307] : memref<1x9x9x16xf32, #tpu.memory_space<vmem>>, vector<1x1x8x16xf32>
    %235 = vector.shape_cast %234 : vector<1x1x8x16xf32> to vector<8x16xf32>
    %c1_308 = arith.constant 1 : index
    %c1_309 = arith.constant 1 : index
    %c0_310 = arith.constant 0 : index
    %c0_311 = arith.constant 0 : index
    %236 = vector.load %arg2[%c1_308, %c1_309, %c0_310, %c0_311] : memref<2x2x16x8xf32, #tpu.memory_space<vmem>>, vector<1x1x16x8xf32>
    %237 = vector.shape_cast %236 : vector<1x1x16x8xf32> to vector<16x8xf32>
    %cst_312 = arith.constant dense<0.000000e+00> : vector<8x8xf32>
    %238 = tpu.matmul %235, %237, %cst_312 {dimension_numbers = #tpu.dot_dimension_numbers<[1], [0], [0], [1], [0, 0, 1, 1], [], []>} : vector<8x16xf32>, vector<16x8xf32>, vector<8x8xf32> -> vector<8x8xf32>
    %239 = arith.addf %233, %238 : vector<8x8xf32>
    %cst_313 = arith.constant 0.000000e+00 : f32
    %240 = vector.broadcast %cst_313 : f32 to vector<8x8xf32>
    %241 = arith.cmpf oge, %239, %240 : vector<8x8xf32>
    %cst_314 = arith.constant 2.000000e-01 : f32
    %242 = vector.broadcast %cst_314 : f32 to vector<8x8xf32>
    %243 = arith.mulf %242, %239 : vector<8x8xf32>
    %244 = arith.select %241, %239, %243 : vector<8x8xi1>, vector<8x8xf32>
    %c7_315 = arith.constant 7 : index
    %c0_316 = arith.constant 0 : index
    %c0_317 = arith.constant 0 : index
    %245 = vector.load %arg6[%c7_315, %c0_316, %c0_317] : memref<8x8x8xf32, #tpu.memory_space<vmem>>, vector<1x8x8xf32>
    %246 = vector.shape_cast %245 : vector<1x8x8xf32> to vector<8x8xf32>
    %247 = vector.shape_cast %244 : vector<8x8xf32> to vector<1x8x8xf32>
    tpu.vector_store %arg6[%c7_315, %c0_316, %c0_317], %247 {strides = array<i32>} : memref<8x8x8xf32, #tpu.memory_space<vmem>>, vector<1x8x8xf32>,
    %c0_318 = arith.constant 0 : index
    %c0_319 = arith.constant 0 : index
    %c0_320 = arith.constant 0 : index
    %248 = vector.load %arg6[%c0_318, %c0_319, %c0_320] : memref<8x8x8xf32, #tpu.memory_space<vmem>>, vector<1x6x8xf32>
    %249 = vector.shape_cast %248 : vector<1x6x8xf32> to vector<6x8xf32>
    %c0_321 = arith.constant 0 : index
    %c0_322 = arith.constant 0 : index
    %c0_323 = arith.constant 0 : index
    %c0_324 = arith.constant 0 : index
    %250 = vector.load %arg3[%c0_321, %c0_322, %c0_323, %c0_324] : memref<3x3x8x16xf32, #tpu.memory_space<vmem>>, vector<1x1x8x16xf32>
    %251 = vector.shape_cast %250 : vector<1x1x8x16xf32> to vector<8x16xf32>
    %cst_325 = arith.constant dense<0.000000e+00> : vector<6x16xf32>
    %252 = tpu.matmul %249, %251, %cst_325 {dimension_numbers = #tpu.dot_dimension_numbers<[1], [0], [0], [1], [0, 0, 1, 1], [], []>} : vector<6x8xf32>, vector<8x16xf32>, vector<6x16xf32> -> vector<6x16xf32>
    %c0_326 = arith.constant 0 : index
    %c1_327 = arith.constant 1 : index
    %c0_328 = arith.constant 0 : index
    %253 = vector.load %arg6[%c0_326, %c1_327, %c0_328] : memref<8x8x8xf32, #tpu.memory_space<vmem>>, vector<1x6x8xf32>
    %254 = vector.shape_cast %253 : vector<1x6x8xf32> to vector<6x8xf32>
    %c0_329 = arith.constant 0 : index
    %c1_330 = arith.constant 1 : index
    %c0_331 = arith.constant 0 : index
    %c0_332 = arith.constant 0 : index
    %255 = vector.load %arg3[%c0_329, %c1_330, %c0_331, %c0_332] : memref<3x3x8x16xf32, #tpu.memory_space<vmem>>, vector<1x1x8x16xf32>
    %256 = vector.shape_cast %255 : vector<1x1x8x16xf32> to vector<8x16xf32>
    %cst_333 = arith.constant dense<0.000000e+00> : vector<6x16xf32>
    %257 = tpu.matmul %254, %256, %cst_333 {dimension_numbers = #tpu.dot_dimension_numbers<[1], [0], [0], [1], [0, 0, 1, 1], [], []>} : vector<6x8xf32>, vector<8x16xf32>, vector<6x16xf32> -> vector<6x16xf32>
    %258 = arith.addf %252, %257 : vector<6x16xf32>
    %c0_334 = arith.constant 0 : index
    %c2_335 = arith.constant 2 : index
    %c0_336 = arith.constant 0 : index
    %259 = vector.load %arg6[%c0_334, %c2_335, %c0_336] : memref<8x8x8xf32, #tpu.memory_space<vmem>>, vector<1x6x8xf32>
    %260 = vector.shape_cast %259 : vector<1x6x8xf32> to vector<6x8xf32>
    %c0_337 = arith.constant 0 : index
    %c2_338 = arith.constant 2 : index
    %c0_339 = arith.constant 0 : index
    %c0_340 = arith.constant 0 : index
    %261 = vector.load %arg3[%c0_337, %c2_338, %c0_339, %c0_340] : memref<3x3x8x16xf32, #tpu.memory_space<vmem>>, vector<1x1x8x16xf32>
    %262 = vector.shape_cast %261 : vector<1x1x8x16xf32> to vector<8x16xf32>
    %cst_341 = arith.constant dense<0.000000e+00> : vector<6x16xf32>
    %263 = tpu.matmul %260, %262, %cst_341 {dimension_numbers = #tpu.dot_dimension_numbers<[1], [0], [0], [1], [0, 0, 1, 1], [], []>} : vector<6x8xf32>, vector<8x16xf32>, vector<6x16xf32> -> vector<6x16xf32>
    %264 = arith.addf %258, %263 : vector<6x16xf32>
    %c1_342 = arith.constant 1 : index
    %c0_343 = arith.constant 0 : index
    %c0_344 = arith.constant 0 : index
    %265 = vector.load %arg6[%c1_342, %c0_343, %c0_344] : memref<8x8x8xf32, #tpu.memory_space<vmem>>, vector<1x6x8xf32>
    %266 = vector.shape_cast %265 : vector<1x6x8xf32> to vector<6x8xf32>
    %c1_345 = arith.constant 1 : index
    %c0_346 = arith.constant 0 : index
    %c0_347 = arith.constant 0 : index
    %c0_348 = arith.constant 0 : index
    %267 = vector.load %arg3[%c1_345, %c0_346, %c0_347, %c0_348] : memref<3x3x8x16xf32, #tpu.memory_space<vmem>>, vector<1x1x8x16xf32>
    %268 = vector.shape_cast %267 : vector<1x1x8x16xf32> to vector<8x16xf32>
    %cst_349 = arith.constant dense<0.000000e+00> : vector<6x16xf32>
    %269 = tpu.matmul %266, %268, %cst_349 {dimension_numbers = #tpu.dot_dimension_numbers<[1], [0], [0], [1], [0, 0, 1, 1], [], []>} : vector<6x8xf32>, vector<8x16xf32>, vector<6x16xf32> -> vector<6x16xf32>
    %270 = arith.addf %264, %269 : vector<6x16xf32>
    %c1_350 = arith.constant 1 : index
    %c1_351 = arith.constant 1 : index
    %c0_352 = arith.constant 0 : index
    %271 = vector.load %arg6[%c1_350, %c1_351, %c0_352] : memref<8x8x8xf32, #tpu.memory_space<vmem>>, vector<1x6x8xf32>
    %272 = vector.shape_cast %271 : vector<1x6x8xf32> to vector<6x8xf32>
    %c1_353 = arith.constant 1 : index
    %c1_354 = arith.constant 1 : index
    %c0_355 = arith.constant 0 : index
    %c0_356 = arith.constant 0 : index
    %273 = vector.load %arg3[%c1_353, %c1_354, %c0_355, %c0_356] : memref<3x3x8x16xf32, #tpu.memory_space<vmem>>, vector<1x1x8x16xf32>
    %274 = vector.shape_cast %273 : vector<1x1x8x16xf32> to vector<8x16xf32>
    %cst_357 = arith.constant dense<0.000000e+00> : vector<6x16xf32>
    %275 = tpu.matmul %272, %274, %cst_357 {dimension_numbers = #tpu.dot_dimension_numbers<[1], [0], [0], [1], [0, 0, 1, 1], [], []>} : vector<6x8xf32>, vector<8x16xf32>, vector<6x16xf32> -> vector<6x16xf32>
    %276 = arith.addf %270, %275 : vector<6x16xf32>
    %c1_358 = arith.constant 1 : index
    %c2_359 = arith.constant 2 : index
    %c0_360 = arith.constant 0 : index
    %277 = vector.load %arg6[%c1_358, %c2_359, %c0_360] : memref<8x8x8xf32, #tpu.memory_space<vmem>>, vector<1x6x8xf32>
    %278 = vector.shape_cast %277 : vector<1x6x8xf32> to vector<6x8xf32>
    %c1_361 = arith.constant 1 : index
    %c2_362 = arith.constant 2 : index
    %c0_363 = arith.constant 0 : index
    %c0_364 = arith.constant 0 : index
    %279 = vector.load %arg3[%c1_361, %c2_362, %c0_363, %c0_364] : memref<3x3x8x16xf32, #tpu.memory_space<vmem>>, vector<1x1x8x16xf32>
    %280 = vector.shape_cast %279 : vector<1x1x8x16xf32> to vector<8x16xf32>
    %cst_365 = arith.constant dense<0.000000e+00> : vector<6x16xf32>
    %281 = tpu.matmul %278, %280, %cst_365 {dimension_numbers = #tpu.dot_dimension_numbers<[1], [0], [0], [1], [0, 0, 1, 1], [], []>} : vector<6x8xf32>, vector<8x16xf32>, vector<6x16xf32> -> vector<6x16xf32>
    %282 = arith.addf %276, %281 : vector<6x16xf32>
    %c2_366 = arith.constant 2 : index
    %c0_367 = arith.constant 0 : index
    %c0_368 = arith.constant 0 : index
    %283 = vector.load %arg6[%c2_366, %c0_367, %c0_368] : memref<8x8x8xf32, #tpu.memory_space<vmem>>, vector<1x6x8xf32>
    %284 = vector.shape_cast %283 : vector<1x6x8xf32> to vector<6x8xf32>
    %c2_369 = arith.constant 2 : index
    %c0_370 = arith.constant 0 : index
    %c0_371 = arith.constant 0 : index
    %c0_372 = arith.constant 0 : index
    %285 = vector.load %arg3[%c2_369, %c0_370, %c0_371, %c0_372] : memref<3x3x8x16xf32, #tpu.memory_space<vmem>>, vector<1x1x8x16xf32>
    %286 = vector.shape_cast %285 : vector<1x1x8x16xf32> to vector<8x16xf32>
    %cst_373 = arith.constant dense<0.000000e+00> : vector<6x16xf32>
    %287 = tpu.matmul %284, %286, %cst_373 {dimension_numbers = #tpu.dot_dimension_numbers<[1], [0], [0], [1], [0, 0, 1, 1], [], []>} : vector<6x8xf32>, vector<8x16xf32>, vector<6x16xf32> -> vector<6x16xf32>
    %288 = arith.addf %282, %287 : vector<6x16xf32>
    %c2_374 = arith.constant 2 : index
    %c1_375 = arith.constant 1 : index
    %c0_376 = arith.constant 0 : index
    %289 = vector.load %arg6[%c2_374, %c1_375, %c0_376] : memref<8x8x8xf32, #tpu.memory_space<vmem>>, vector<1x6x8xf32>
    %290 = vector.shape_cast %289 : vector<1x6x8xf32> to vector<6x8xf32>
    %c2_377 = arith.constant 2 : index
    %c1_378 = arith.constant 1 : index
    %c0_379 = arith.constant 0 : index
    %c0_380 = arith.constant 0 : index
    %291 = vector.load %arg3[%c2_377, %c1_378, %c0_379, %c0_380] : memref<3x3x8x16xf32, #tpu.memory_space<vmem>>, vector<1x1x8x16xf32>
    %292 = vector.shape_cast %291 : vector<1x1x8x16xf32> to vector<8x16xf32>
    %cst_381 = arith.constant dense<0.000000e+00> : vector<6x16xf32>
    %293 = tpu.matmul %290, %292, %cst_381 {dimension_numbers = #tpu.dot_dimension_numbers<[1], [0], [0], [1], [0, 0, 1, 1], [], []>} : vector<6x8xf32>, vector<8x16xf32>, vector<6x16xf32> -> vector<6x16xf32>
    %294 = arith.addf %288, %293 : vector<6x16xf32>
    %c2_382 = arith.constant 2 : index
    %c2_383 = arith.constant 2 : index
    %c0_384 = arith.constant 0 : index
    %295 = vector.load %arg6[%c2_382, %c2_383, %c0_384] : memref<8x8x8xf32, #tpu.memory_space<vmem>>, vector<1x6x8xf32>
    %296 = vector.shape_cast %295 : vector<1x6x8xf32> to vector<6x8xf32>
    %c2_385 = arith.constant 2 : index
    %c2_386 = arith.constant 2 : index
    %c0_387 = arith.constant 0 : index
    %c0_388 = arith.constant 0 : index
    %297 = vector.load %arg3[%c2_385, %c2_386, %c0_387, %c0_388] : memref<3x3x8x16xf32, #tpu.memory_space<vmem>>, vector<1x1x8x16xf32>
    %298 = vector.shape_cast %297 : vector<1x1x8x16xf32> to vector<8x16xf32>
    %cst_389 = arith.constant dense<0.000000e+00> : vector<6x16xf32>
    %299 = tpu.matmul %296, %298, %cst_389 {dimension_numbers = #tpu.dot_dimension_numbers<[1], [0], [0], [1], [0, 0, 1, 1], [], []>} : vector<6x8xf32>, vector<8x16xf32>, vector<6x16xf32> -> vector<6x16xf32>
    %300 = arith.addf %294, %299 : vector<6x16xf32>
    %cst_390 = arith.constant 0.000000e+00 : f32
    %301 = vector.broadcast %cst_390 : f32 to vector<6x16xf32>
    %302 = arith.cmpf oge, %300, %301 : vector<6x16xf32>
    %cst_391 = arith.constant 2.000000e-01 : f32
    %303 = vector.broadcast %cst_391 : f32 to vector<6x16xf32>
    %304 = arith.mulf %303, %300 : vector<6x16xf32>
    %305 = arith.select %302, %300, %304 : vector<6x16xi1>, vector<6x16xf32>
    %c0_392 = arith.constant 0 : index
    %c0_393 = arith.constant 0 : index
    %c0_394 = arith.constant 0 : index
    %306 = vector.load %arg7[%c0_392, %c0_393, %c0_394] : memref<6x6x16xf32, #tpu.memory_space<vmem>>, vector<1x6x16xf32>
    %307 = vector.shape_cast %306 : vector<1x6x16xf32> to vector<6x16xf32>
    %308 = vector.shape_cast %305 : vector<6x16xf32> to vector<1x6x16xf32>
    tpu.vector_store %arg7[%c0_392, %c0_393, %c0_394], %308 {strides = array<i32>} : memref<6x6x16xf32, #tpu.memory_space<vmem>>, vector<1x6x16xf32>,
    %c1_395 = arith.constant 1 : index
    %c0_396 = arith.constant 0 : index
    %c0_397 = arith.constant 0 : index
    %309 = vector.load %arg6[%c1_395, %c0_396, %c0_397] : memref<8x8x8xf32, #tpu.memory_space<vmem>>, vector<1x6x8xf32>
    %310 = vector.shape_cast %309 : vector<1x6x8xf32> to vector<6x8xf32>
    %c0_398 = arith.constant 0 : index
    %c0_399 = arith.constant 0 : index
    %c0_400 = arith.constant 0 : index
    %c0_401 = arith.constant 0 : index
    %311 = vector.load %arg3[%c0_398, %c0_399, %c0_400, %c0_401] : memref<3x3x8x16xf32, #tpu.memory_space<vmem>>, vector<1x1x8x16xf32>
    %312 = vector.shape_cast %311 : vector<1x1x8x16xf32> to vector<8x16xf32>
    %cst_402 = arith.constant dense<0.000000e+00> : vector<6x16xf32>
    %313 = tpu.matmul %310, %312, %cst_402 {dimension_numbers = #tpu.dot_dimension_numbers<[1], [0], [0], [1], [0, 0, 1, 1], [], []>} : vector<6x8xf32>, vector<8x16xf32>, vector<6x16xf32> -> vector<6x16xf32>
    %c1_403 = arith.constant 1 : index
    %c1_404 = arith.constant 1 : index
    %c0_405 = arith.constant 0 : index
    %314 = vector.load %arg6[%c1_403, %c1_404, %c0_405] : memref<8x8x8xf32, #tpu.memory_space<vmem>>, vector<1x6x8xf32>
    %315 = vector.shape_cast %314 : vector<1x6x8xf32> to vector<6x8xf32>
    %c0_406 = arith.constant 0 : index
    %c1_407 = arith.constant 1 : index
    %c0_408 = arith.constant 0 : index
    %c0_409 = arith.constant 0 : index
    %316 = vector.load %arg3[%c0_406, %c1_407, %c0_408, %c0_409] : memref<3x3x8x16xf32, #tpu.memory_space<vmem>>, vector<1x1x8x16xf32>
    %317 = vector.shape_cast %316 : vector<1x1x8x16xf32> to vector<8x16xf32>
    %cst_410 = arith.constant dense<0.000000e+00> : vector<6x16xf32>
    %318 = tpu.matmul %315, %317, %cst_410 {dimension_numbers = #tpu.dot_dimension_numbers<[1], [0], [0], [1], [0, 0, 1, 1], [], []>} : vector<6x8xf32>, vector<8x16xf32>, vector<6x16xf32> -> vector<6x16xf32>
    %319 = arith.addf %313, %318 : vector<6x16xf32>
    %c1_411 = arith.constant 1 : index
    %c2_412 = arith.constant 2 : index
    %c0_413 = arith.constant 0 : index
    %320 = vector.load %arg6[%c1_411, %c2_412, %c0_413] : memref<8x8x8xf32, #tpu.memory_space<vmem>>, vector<1x6x8xf32>
    %321 = vector.shape_cast %320 : vector<1x6x8xf32> to vector<6x8xf32>
    %c0_414 = arith.constant 0 : index
    %c2_415 = arith.constant 2 : index
    %c0_416 = arith.constant 0 : index
    %c0_417 = arith.constant 0 : index
    %322 = vector.load %arg3[%c0_414, %c2_415, %c0_416, %c0_417] : memref<3x3x8x16xf32, #tpu.memory_space<vmem>>, vector<1x1x8x16xf32>
    %323 = vector.shape_cast %322 : vector<1x1x8x16xf32> to vector<8x16xf32>
    %cst_418 = arith.constant dense<0.000000e+00> : vector<6x16xf32>
    %324 = tpu.matmul %321, %323, %cst_418 {dimension_numbers = #tpu.dot_dimension_numbers<[1], [0], [0], [1], [0, 0, 1, 1], [], []>} : vector<6x8xf32>, vector<8x16xf32>, vector<6x16xf32> -> vector<6x16xf32>
    %325 = arith.addf %319, %324 : vector<6x16xf32>
    %c2_419 = arith.constant 2 : index
    %c0_420 = arith.constant 0 : index
    %c0_421 = arith.constant 0 : index
    %326 = vector.load %arg6[%c2_419, %c0_420, %c0_421] : memref<8x8x8xf32, #tpu.memory_space<vmem>>, vector<1x6x8xf32>
    %327 = vector.shape_cast %326 : vector<1x6x8xf32> to vector<6x8xf32>
    %c1_422 = arith.constant 1 : index
    %c0_423 = arith.constant 0 : index
    %c0_424 = arith.constant 0 : index
    %c0_425 = arith.constant 0 : index
    %328 = vector.load %arg3[%c1_422, %c0_423, %c0_424, %c0_425] : memref<3x3x8x16xf32, #tpu.memory_space<vmem>>, vector<1x1x8x16xf32>
    %329 = vector.shape_cast %328 : vector<1x1x8x16xf32> to vector<8x16xf32>
    %cst_426 = arith.constant dense<0.000000e+00> : vector<6x16xf32>
    %330 = tpu.matmul %327, %329, %cst_426 {dimension_numbers = #tpu.dot_dimension_numbers<[1], [0], [0], [1], [0, 0, 1, 1], [], []>} : vector<6x8xf32>, vector<8x16xf32>, vector<6x16xf32> -> vector<6x16xf32>
    %331 = arith.addf %325, %330 : vector<6x16xf32>
    %c2_427 = arith.constant 2 : index
    %c1_428 = arith.constant 1 : index
    %c0_429 = arith.constant 0 : index
    %332 = vector.load %arg6[%c2_427, %c1_428, %c0_429] : memref<8x8x8xf32, #tpu.memory_space<vmem>>, vector<1x6x8xf32>
    %333 = vector.shape_cast %332 : vector<1x6x8xf32> to vector<6x8xf32>
    %c1_430 = arith.constant 1 : index
    %c1_431 = arith.constant 1 : index
    %c0_432 = arith.constant 0 : index
    %c0_433 = arith.constant 0 : index
    %334 = vector.load %arg3[%c1_430, %c1_431, %c0_432, %c0_433] : memref<3x3x8x16xf32, #tpu.memory_space<vmem>>, vector<1x1x8x16xf32>
    %335 = vector.shape_cast %334 : vector<1x1x8x16xf32> to vector<8x16xf32>
    %cst_434 = arith.constant dense<0.000000e+00> : vector<6x16xf32>
    %336 = tpu.matmul %333, %335, %cst_434 {dimension_numbers = #tpu.dot_dimension_numbers<[1], [0], [0], [1], [0, 0, 1, 1], [], []>} : vector<6x8xf32>, vector<8x16xf32>, vector<6x16xf32> -> vector<6x16xf32>
    %337 = arith.addf %331, %336 : vector<6x16xf32>
    %c2_435 = arith.constant 2 : index
    %c2_436 = arith.constant 2 : index
    %c0_437 = arith.constant 0 : index
    %338 = vector.load %arg6[%c2_435, %c2_436, %c0_437] : memref<8x8x8xf32, #tpu.memory_space<vmem>>, vector<1x6x8xf32>
    %339 = vector.shape_cast %338 : vector<1x6x8xf32> to vector<6x8xf32>
    %c1_438 = arith.constant 1 : index
    %c2_439 = arith.constant 2 : index
    %c0_440 = arith.constant 0 : index
    %c0_441 = arith.constant 0 : index
    %340 = vector.load %arg3[%c1_438, %c2_439, %c0_440, %c0_441] : memref<3x3x8x16xf32, #tpu.memory_space<vmem>>, vector<1x1x8x16xf32>
    %341 = vector.shape_cast %340 : vector<1x1x8x16xf32> to vector<8x16xf32>
    %cst_442 = arith.constant dense<0.000000e+00> : vector<6x16xf32>
    %342 = tpu.matmul %339, %341, %cst_442 {dimension_numbers = #tpu.dot_dimension_numbers<[1], [0], [0], [1], [0, 0, 1, 1], [], []>} : vector<6x8xf32>, vector<8x16xf32>, vector<6x16xf32> -> vector<6x16xf32>
    %343 = arith.addf %337, %342 : vector<6x16xf32>
    %c3_443 = arith.constant 3 : index
    %c0_444 = arith.constant 0 : index
    %c0_445 = arith.constant 0 : index
    %344 = vector.load %arg6[%c3_443, %c0_444, %c0_445] : memref<8x8x8xf32, #tpu.memory_space<vmem>>, vector<1x6x8xf32>
    %345 = vector.shape_cast %344 : vector<1x6x8xf32> to vector<6x8xf32>
    %c2_446 = arith.constant 2 : index
    %c0_447 = arith.constant 0 : index
    %c0_448 = arith.constant 0 : index
    %c0_449 = arith.constant 0 : index
    %346 = vector.load %arg3[%c2_446, %c0_447, %c0_448, %c0_449] : memref<3x3x8x16xf32, #tpu.memory_space<vmem>>, vector<1x1x8x16xf32>
    %347 = vector.shape_cast %346 : vector<1x1x8x16xf32> to vector<8x16xf32>
    %cst_450 = arith.constant dense<0.000000e+00> : vector<6x16xf32>
    %348 = tpu.matmul %345, %347, %cst_450 {dimension_numbers = #tpu.dot_dimension_numbers<[1], [0], [0], [1], [0, 0, 1, 1], [], []>} : vector<6x8xf32>, vector<8x16xf32>, vector<6x16xf32> -> vector<6x16xf32>
    %349 = arith.addf %343, %348 : vector<6x16xf32>
    %c3_451 = arith.constant 3 : index
    %c1_452 = arith.constant 1 : index
    %c0_453 = arith.constant 0 : index
    %350 = vector.load %arg6[%c3_451, %c1_452, %c0_453] : memref<8x8x8xf32, #tpu.memory_space<vmem>>, vector<1x6x8xf32>
    %351 = vector.shape_cast %350 : vector<1x6x8xf32> to vector<6x8xf32>
    %c2_454 = arith.constant 2 : index
    %c1_455 = arith.constant 1 : index
    %c0_456 = arith.constant 0 : index
    %c0_457 = arith.constant 0 : index
    %352 = vector.load %arg3[%c2_454, %c1_455, %c0_456, %c0_457] : memref<3x3x8x16xf32, #tpu.memory_space<vmem>>, vector<1x1x8x16xf32>
    %353 = vector.shape_cast %352 : vector<1x1x8x16xf32> to vector<8x16xf32>
    %cst_458 = arith.constant dense<0.000000e+00> : vector<6x16xf32>
    %354 = tpu.matmul %351, %353, %cst_458 {dimension_numbers = #tpu.dot_dimension_numbers<[1], [0], [0], [1], [0, 0, 1, 1], [], []>} : vector<6x8xf32>, vector<8x16xf32>, vector<6x16xf32> -> vector<6x16xf32>
    %355 = arith.addf %349, %354 : vector<6x16xf32>
    %c3_459 = arith.constant 3 : index
    %c2_460 = arith.constant 2 : index
    %c0_461 = arith.constant 0 : index
    %356 = vector.load %arg6[%c3_459, %c2_460, %c0_461] : memref<8x8x8xf32, #tpu.memory_space<vmem>>, vector<1x6x8xf32>
    %357 = vector.shape_cast %356 : vector<1x6x8xf32> to vector<6x8xf32>
    %c2_462 = arith.constant 2 : index
    %c2_463 = arith.constant 2 : index
    %c0_464 = arith.constant 0 : index
    %c0_465 = arith.constant 0 : index
    %358 = vector.load %arg3[%c2_462, %c2_463, %c0_464, %c0_465] : memref<3x3x8x16xf32, #tpu.memory_space<vmem>>, vector<1x1x8x16xf32>
    %359 = vector.shape_cast %358 : vector<1x1x8x16xf32> to vector<8x16xf32>
    %cst_466 = arith.constant dense<0.000000e+00> : vector<6x16xf32>
    %360 = tpu.matmul %357, %359, %cst_466 {dimension_numbers = #tpu.dot_dimension_numbers<[1], [0], [0], [1], [0, 0, 1, 1], [], []>} : vector<6x8xf32>, vector<8x16xf32>, vector<6x16xf32> -> vector<6x16xf32>
    %361 = arith.addf %355, %360 : vector<6x16xf32>
    %cst_467 = arith.constant 0.000000e+00 : f32
    %362 = vector.broadcast %cst_467 : f32 to vector<6x16xf32>
    %363 = arith.cmpf oge, %361, %362 : vector<6x16xf32>
    %cst_468 = arith.constant 2.000000e-01 : f32
    %364 = vector.broadcast %cst_468 : f32 to vector<6x16xf32>
    %365 = arith.mulf %364, %361 : vector<6x16xf32>
    %366 = arith.select %363, %361, %365 : vector<6x16xi1>, vector<6x16xf32>
    %c1_469 = arith.constant 1 : index
    %c0_470 = arith.constant 0 : index
    %c0_471 = arith.constant 0 : index
    %367 = vector.load %arg7[%c1_469, %c0_470, %c0_471] : memref<6x6x16xf32, #tpu.memory_space<vmem>>, vector<1x6x16xf32>
    %368 = vector.shape_cast %367 : vector<1x6x16xf32> to vector<6x16xf32>
    %369 = vector.shape_cast %366 : vector<6x16xf32> to vector<1x6x16xf32>
    tpu.vector_store %arg7[%c1_469, %c0_470, %c0_471], %369 {strides = array<i32>} : memref<6x6x16xf32, #tpu.memory_space<vmem>>, vector<1x6x16xf32>,
    %c2_472 = arith.constant 2 : index
    %c0_473 = arith.constant 0 : index
    %c0_474 = arith.constant 0 : index
    %370 = vector.load %arg6[%c2_472, %c0_473, %c0_474] : memref<8x8x8xf32, #tpu.memory_space<vmem>>, vector<1x6x8xf32>
    %371 = vector.shape_cast %370 : vector<1x6x8xf32> to vector<6x8xf32>
    %c0_475 = arith.constant 0 : index
    %c0_476 = arith.constant 0 : index
    %c0_477 = arith.constant 0 : index
    %c0_478 = arith.constant 0 : index
    %372 = vector.load %arg3[%c0_475, %c0_476, %c0_477, %c0_478] : memref<3x3x8x16xf32, #tpu.memory_space<vmem>>, vector<1x1x8x16xf32>
    %373 = vector.shape_cast %372 : vector<1x1x8x16xf32> to vector<8x16xf32>
    %cst_479 = arith.constant dense<0.000000e+00> : vector<6x16xf32>
    %374 = tpu.matmul %371, %373, %cst_479 {dimension_numbers = #tpu.dot_dimension_numbers<[1], [0], [0], [1], [0, 0, 1, 1], [], []>} : vector<6x8xf32>, vector<8x16xf32>, vector<6x16xf32> -> vector<6x16xf32>
    %c2_480 = arith.constant 2 : index
    %c1_481 = arith.constant 1 : index
    %c0_482 = arith.constant 0 : index
    %375 = vector.load %arg6[%c2_480, %c1_481, %c0_482] : memref<8x8x8xf32, #tpu.memory_space<vmem>>, vector<1x6x8xf32>
    %376 = vector.shape_cast %375 : vector<1x6x8xf32> to vector<6x8xf32>
    %c0_483 = arith.constant 0 : index
    %c1_484 = arith.constant 1 : index
    %c0_485 = arith.constant 0 : index
    %c0_486 = arith.constant 0 : index
    %377 = vector.load %arg3[%c0_483, %c1_484, %c0_485, %c0_486] : memref<3x3x8x16xf32, #tpu.memory_space<vmem>>, vector<1x1x8x16xf32>
    %378 = vector.shape_cast %377 : vector<1x1x8x16xf32> to vector<8x16xf32>
    %cst_487 = arith.constant dense<0.000000e+00> : vector<6x16xf32>
    %379 = tpu.matmul %376, %378, %cst_487 {dimension_numbers = #tpu.dot_dimension_numbers<[1], [0], [0], [1], [0, 0, 1, 1], [], []>} : vector<6x8xf32>, vector<8x16xf32>, vector<6x16xf32> -> vector<6x16xf32>
    %380 = arith.addf %374, %379 : vector<6x16xf32>
    %c2_488 = arith.constant 2 : index
    %c2_489 = arith.constant 2 : index
    %c0_490 = arith.constant 0 : index
    %381 = vector.load %arg6[%c2_488, %c2_489, %c0_490] : memref<8x8x8xf32, #tpu.memory_space<vmem>>, vector<1x6x8xf32>
    %382 = vector.shape_cast %381 : vector<1x6x8xf32> to vector<6x8xf32>
    %c0_491 = arith.constant 0 : index
    %c2_492 = arith.constant 2 : index
    %c0_493 = arith.constant 0 : index
    %c0_494 = arith.constant 0 : index
    %383 = vector.load %arg3[%c0_491, %c2_492, %c0_493, %c0_494] : memref<3x3x8x16xf32, #tpu.memory_space<vmem>>, vector<1x1x8x16xf32>
    %384 = vector.shape_cast %383 : vector<1x1x8x16xf32> to vector<8x16xf32>
    %cst_495 = arith.constant dense<0.000000e+00> : vector<6x16xf32>
    %385 = tpu.matmul %382, %384, %cst_495 {dimension_numbers = #tpu.dot_dimension_numbers<[1], [0], [0], [1], [0, 0, 1, 1], [], []>} : vector<6x8xf32>, vector<8x16xf32>, vector<6x16xf32> -> vector<6x16xf32>
    %386 = arith.addf %380, %385 : vector<6x16xf32>
    %c3_496 = arith.constant 3 : index
    %c0_497 = arith.constant 0 : index
    %c0_498 = arith.constant 0 : index
    %387 = vector.load %arg6[%c3_496, %c0_497, %c0_498] : memref<8x8x8xf32, #tpu.memory_space<vmem>>, vector<1x6x8xf32>
    %388 = vector.shape_cast %387 : vector<1x6x8xf32> to vector<6x8xf32>
    %c1_499 = arith.constant 1 : index
    %c0_500 = arith.constant 0 : index
    %c0_501 = arith.constant 0 : index
    %c0_502 = arith.constant 0 : index
    %389 = vector.load %arg3[%c1_499, %c0_500, %c0_501, %c0_502] : memref<3x3x8x16xf32, #tpu.memory_space<vmem>>, vector<1x1x8x16xf32>
    %390 = vector.shape_cast %389 : vector<1x1x8x16xf32> to vector<8x16xf32>
    %cst_503 = arith.constant dense<0.000000e+00> : vector<6x16xf32>
    %391 = tpu.matmul %388, %390, %cst_503 {dimension_numbers = #tpu.dot_dimension_numbers<[1], [0], [0], [1], [0, 0, 1, 1], [], []>} : vector<6x8xf32>, vector<8x16xf32>, vector<6x16xf32> -> vector<6x16xf32>
    %392 = arith.addf %386, %391 : vector<6x16xf32>
    %c3_504 = arith.constant 3 : index
    %c1_505 = arith.constant 1 : index
    %c0_506 = arith.constant 0 : index
    %393 = vector.load %arg6[%c3_504, %c1_505, %c0_506] : memref<8x8x8xf32, #tpu.memory_space<vmem>>, vector<1x6x8xf32>
    %394 = vector.shape_cast %393 : vector<1x6x8xf32> to vector<6x8xf32>
    %c1_507 = arith.constant 1 : index
    %c1_508 = arith.constant 1 : index
    %c0_509 = arith.constant 0 : index
    %c0_510 = arith.constant 0 : index
    %395 = vector.load %arg3[%c1_507, %c1_508, %c0_509, %c0_510] : memref<3x3x8x16xf32, #tpu.memory_space<vmem>>, vector<1x1x8x16xf32>
    %396 = vector.shape_cast %395 : vector<1x1x8x16xf32> to vector<8x16xf32>
    %cst_511 = arith.constant dense<0.000000e+00> : vector<6x16xf32>
    %397 = tpu.matmul %394, %396, %cst_511 {dimension_numbers = #tpu.dot_dimension_numbers<[1], [0], [0], [1], [0, 0, 1, 1], [], []>} : vector<6x8xf32>, vector<8x16xf32>, vector<6x16xf32> -> vector<6x16xf32>
    %398 = arith.addf %392, %397 : vector<6x16xf32>
    %c3_512 = arith.constant 3 : index
    %c2_513 = arith.constant 2 : index
    %c0_514 = arith.constant 0 : index
    %399 = vector.load %arg6[%c3_512, %c2_513, %c0_514] : memref<8x8x8xf32, #tpu.memory_space<vmem>>, vector<1x6x8xf32>
    %400 = vector.shape_cast %399 : vector<1x6x8xf32> to vector<6x8xf32>
    %c1_515 = arith.constant 1 : index
    %c2_516 = arith.constant 2 : index
    %c0_517 = arith.constant 0 : index
    %c0_518 = arith.constant 0 : index
    %401 = vector.load %arg3[%c1_515, %c2_516, %c0_517, %c0_518] : memref<3x3x8x16xf32, #tpu.memory_space<vmem>>, vector<1x1x8x16xf32>
    %402 = vector.shape_cast %401 : vector<1x1x8x16xf32> to vector<8x16xf32>
    %cst_519 = arith.constant dense<0.000000e+00> : vector<6x16xf32>
    %403 = tpu.matmul %400, %402, %cst_519 {dimension_numbers = #tpu.dot_dimension_numbers<[1], [0], [0], [1], [0, 0, 1, 1], [], []>} : vector<6x8xf32>, vector<8x16xf32>, vector<6x16xf32> -> vector<6x16xf32>
    %404 = arith.addf %398, %403 : vector<6x16xf32>
    %c4_520 = arith.constant 4 : index
    %c0_521 = arith.constant 0 : index
    %c0_522 = arith.constant 0 : index
    %405 = vector.load %arg6[%c4_520, %c0_521, %c0_522] : memref<8x8x8xf32, #tpu.memory_space<vmem>>, vector<1x6x8xf32>
    %406 = vector.shape_cast %405 : vector<1x6x8xf32> to vector<6x8xf32>
    %c2_523 = arith.constant 2 : index
    %c0_524 = arith.constant 0 : index
    %c0_525 = arith.constant 0 : index
    %c0_526 = arith.constant 0 : index
    %407 = vector.load %arg3[%c2_523, %c0_524, %c0_525, %c0_526] : memref<3x3x8x16xf32, #tpu.memory_space<vmem>>, vector<1x1x8x16xf32>
    %408 = vector.shape_cast %407 : vector<1x1x8x16xf32> to vector<8x16xf32>
    %cst_527 = arith.constant dense<0.000000e+00> : vector<6x16xf32>
    %409 = tpu.matmul %406, %408, %cst_527 {dimension_numbers = #tpu.dot_dimension_numbers<[1], [0], [0], [1], [0, 0, 1, 1], [], []>} : vector<6x8xf32>, vector<8x16xf32>, vector<6x16xf32> -> vector<6x16xf32>
    %410 = arith.addf %404, %409 : vector<6x16xf32>
    %c4_528 = arith.constant 4 : index
    %c1_529 = arith.constant 1 : index
    %c0_530 = arith.constant 0 : index
    %411 = vector.load %arg6[%c4_528, %c1_529, %c0_530] : memref<8x8x8xf32, #tpu.memory_space<vmem>>, vector<1x6x8xf32>
    %412 = vector.shape_cast %411 : vector<1x6x8xf32> to vector<6x8xf32>
    %c2_531 = arith.constant 2 : index
    %c1_532 = arith.constant 1 : index
    %c0_533 = arith.constant 0 : index
    %c0_534 = arith.constant 0 : index
    %413 = vector.load %arg3[%c2_531, %c1_532, %c0_533, %c0_534] : memref<3x3x8x16xf32, #tpu.memory_space<vmem>>, vector<1x1x8x16xf32>
    %414 = vector.shape_cast %413 : vector<1x1x8x16xf32> to vector<8x16xf32>
    %cst_535 = arith.constant dense<0.000000e+00> : vector<6x16xf32>
    %415 = tpu.matmul %412, %414, %cst_535 {dimension_numbers = #tpu.dot_dimension_numbers<[1], [0], [0], [1], [0, 0, 1, 1], [], []>} : vector<6x8xf32>, vector<8x16xf32>, vector<6x16xf32> -> vector<6x16xf32>
    %416 = arith.addf %410, %415 : vector<6x16xf32>
    %c4_536 = arith.constant 4 : index
    %c2_537 = arith.constant 2 : index
    %c0_538 = arith.constant 0 : index
    %417 = vector.load %arg6[%c4_536, %c2_537, %c0_538] : memref<8x8x8xf32, #tpu.memory_space<vmem>>, vector<1x6x8xf32>
    %418 = vector.shape_cast %417 : vector<1x6x8xf32> to vector<6x8xf32>
    %c2_539 = arith.constant 2 : index
    %c2_540 = arith.constant 2 : index
    %c0_541 = arith.constant 0 : index
    %c0_542 = arith.constant 0 : index
    %419 = vector.load %arg3[%c2_539, %c2_540, %c0_541, %c0_542] : memref<3x3x8x16xf32, #tpu.memory_space<vmem>>, vector<1x1x8x16xf32>
    %420 = vector.shape_cast %419 : vector<1x1x8x16xf32> to vector<8x16xf32>
    %cst_543 = arith.constant dense<0.000000e+00> : vector<6x16xf32>
    %421 = tpu.matmul %418, %420, %cst_543 {dimension_numbers = #tpu.dot_dimension_numbers<[1], [0], [0], [1], [0, 0, 1, 1], [], []>} : vector<6x8xf32>, vector<8x16xf32>, vector<6x16xf32> -> vector<6x16xf32>
    %422 = arith.addf %416, %421 : vector<6x16xf32>
    %cst_544 = arith.constant 0.000000e+00 : f32
    %423 = vector.broadcast %cst_544 : f32 to vector<6x16xf32>
    %424 = arith.cmpf oge, %422, %423 : vector<6x16xf32>
    %cst_545 = arith.constant 2.000000e-01 : f32
    %425 = vector.broadcast %cst_545 : f32 to vector<6x16xf32>
    %426 = arith.mulf %425, %422 : vector<6x16xf32>
    %427 = arith.select %424, %422, %426 : vector<6x16xi1>, vector<6x16xf32>
    %c2_546 = arith.constant 2 : index
    %c0_547 = arith.constant 0 : index
    %c0_548 = arith.constant 0 : index
    %428 = vector.load %arg7[%c2_546, %c0_547, %c0_548] : memref<6x6x16xf32, #tpu.memory_space<vmem>>, vector<1x6x16xf32>
    %429 = vector.shape_cast %428 : vector<1x6x16xf32> to vector<6x16xf32>
    %430 = vector.shape_cast %427 : vector<6x16xf32> to vector<1x6x16xf32>
    tpu.vector_store %arg7[%c2_546, %c0_547, %c0_548], %430 {strides = array<i32>} : memref<6x6x16xf32, #tpu.memory_space<vmem>>, vector<1x6x16xf32>,
    %c3_549 = arith.constant 3 : index
    %c0_550 = arith.constant 0 : index
    %c0_551 = arith.constant 0 : index
    %431 = vector.load %arg6[%c3_549, %c0_550, %c0_551] : memref<8x8x8xf32, #tpu.memory_space<vmem>>, vector<1x6x8xf32>
    %432 = vector.shape_cast %431 : vector<1x6x8xf32> to vector<6x8xf32>
    %c0_552 = arith.constant 0 : index
    %c0_553 = arith.constant 0 : index
    %c0_554 = arith.constant 0 : index
    %c0_555 = arith.constant 0 : index
    %433 = vector.load %arg3[%c0_552, %c0_553, %c0_554, %c0_555] : memref<3x3x8x16xf32, #tpu.memory_space<vmem>>, vector<1x1x8x16xf32>
    %434 = vector.shape_cast %433 : vector<1x1x8x16xf32> to vector<8x16xf32>
    %cst_556 = arith.constant dense<0.000000e+00> : vector<6x16xf32>
    %435 = tpu.matmul %432, %434, %cst_556 {dimension_numbers = #tpu.dot_dimension_numbers<[1], [0], [0], [1], [0, 0, 1, 1], [], []>} : vector<6x8xf32>, vector<8x16xf32>, vector<6x16xf32> -> vector<6x16xf32>
    %c3_557 = arith.constant 3 : index
    %c1_558 = arith.constant 1 : index
    %c0_559 = arith.constant 0 : index
    %436 = vector.load %arg6[%c3_557, %c1_558, %c0_559] : memref<8x8x8xf32, #tpu.memory_space<vmem>>, vector<1x6x8xf32>
    %437 = vector.shape_cast %436 : vector<1x6x8xf32> to vector<6x8xf32>
    %c0_560 = arith.constant 0 : index
    %c1_561 = arith.constant 1 : index
    %c0_562 = arith.constant 0 : index
    %c0_563 = arith.constant 0 : index
    %438 = vector.load %arg3[%c0_560, %c1_561, %c0_562, %c0_563] : memref<3x3x8x16xf32, #tpu.memory_space<vmem>>, vector<1x1x8x16xf32>
    %439 = vector.shape_cast %438 : vector<1x1x8x16xf32> to vector<8x16xf32>
    %cst_564 = arith.constant dense<0.000000e+00> : vector<6x16xf32>
    %440 = tpu.matmul %437, %439, %cst_564 {dimension_numbers = #tpu.dot_dimension_numbers<[1], [0], [0], [1], [0, 0, 1, 1], [], []>} : vector<6x8xf32>, vector<8x16xf32>, vector<6x16xf32> -> vector<6x16xf32>
    %441 = arith.addf %435, %440 : vector<6x16xf32>
    %c3_565 = arith.constant 3 : index
    %c2_566 = arith.constant 2 : index
    %c0_567 = arith.constant 0 : index
    %442 = vector.load %arg6[%c3_565, %c2_566, %c0_567] : memref<8x8x8xf32, #tpu.memory_space<vmem>>, vector<1x6x8xf32>
    %443 = vector.shape_cast %442 : vector<1x6x8xf32> to vector<6x8xf32>
    %c0_568 = arith.constant 0 : index
    %c2_569 = arith.constant 2 : index
    %c0_570 = arith.constant 0 : index
    %c0_571 = arith.constant 0 : index
    %444 = vector.load %arg3[%c0_568, %c2_569, %c0_570, %c0_571] : memref<3x3x8x16xf32, #tpu.memory_space<vmem>>, vector<1x1x8x16xf32>
    %445 = vector.shape_cast %444 : vector<1x1x8x16xf32> to vector<8x16xf32>
    %cst_572 = arith.constant dense<0.000000e+00> : vector<6x16xf32>
    %446 = tpu.matmul %443, %445, %cst_572 {dimension_numbers = #tpu.dot_dimension_numbers<[1], [0], [0], [1], [0, 0, 1, 1], [], []>} : vector<6x8xf32>, vector<8x16xf32>, vector<6x16xf32> -> vector<6x16xf32>
    %447 = arith.addf %441, %446 : vector<6x16xf32>
    %c4_573 = arith.constant 4 : index
    %c0_574 = arith.constant 0 : index
    %c0_575 = arith.constant 0 : index
    %448 = vector.load %arg6[%c4_573, %c0_574, %c0_575] : memref<8x8x8xf32, #tpu.memory_space<vmem>>, vector<1x6x8xf32>
    %449 = vector.shape_cast %448 : vector<1x6x8xf32> to vector<6x8xf32>
    %c1_576 = arith.constant 1 : index
    %c0_577 = arith.constant 0 : index
    %c0_578 = arith.constant 0 : index
    %c0_579 = arith.constant 0 : index
    %450 = vector.load %arg3[%c1_576, %c0_577, %c0_578, %c0_579] : memref<3x3x8x16xf32, #tpu.memory_space<vmem>>, vector<1x1x8x16xf32>
    %451 = vector.shape_cast %450 : vector<1x1x8x16xf32> to vector<8x16xf32>
    %cst_580 = arith.constant dense<0.000000e+00> : vector<6x16xf32>
    %452 = tpu.matmul %449, %451, %cst_580 {dimension_numbers = #tpu.dot_dimension_numbers<[1], [0], [0], [1], [0, 0, 1, 1], [], []>} : vector<6x8xf32>, vector<8x16xf32>, vector<6x16xf32> -> vector<6x16xf32>
    %453 = arith.addf %447, %452 : vector<6x16xf32>
    %c4_581 = arith.constant 4 : index
    %c1_582 = arith.constant 1 : index
    %c0_583 = arith.constant 0 : index
    %454 = vector.load %arg6[%c4_581, %c1_582, %c0_583] : memref<8x8x8xf32, #tpu.memory_space<vmem>>, vector<1x6x8xf32>
    %455 = vector.shape_cast %454 : vector<1x6x8xf32> to vector<6x8xf32>
    %c1_584 = arith.constant 1 : index
    %c1_585 = arith.constant 1 : index
    %c0_586 = arith.constant 0 : index
    %c0_587 = arith.constant 0 : index
    %456 = vector.load %arg3[%c1_584, %c1_585, %c0_586, %c0_587] : memref<3x3x8x16xf32, #tpu.memory_space<vmem>>, vector<1x1x8x16xf32>
    %457 = vector.shape_cast %456 : vector<1x1x8x16xf32> to vector<8x16xf32>
    %cst_588 = arith.constant dense<0.000000e+00> : vector<6x16xf32>
    %458 = tpu.matmul %455, %457, %cst_588 {dimension_numbers = #tpu.dot_dimension_numbers<[1], [0], [0], [1], [0, 0, 1, 1], [], []>} : vector<6x8xf32>, vector<8x16xf32>, vector<6x16xf32> -> vector<6x16xf32>
    %459 = arith.addf %453, %458 : vector<6x16xf32>
    %c4_589 = arith.constant 4 : index
    %c2_590 = arith.constant 2 : index
    %c0_591 = arith.constant 0 : index
    %460 = vector.load %arg6[%c4_589, %c2_590, %c0_591] : memref<8x8x8xf32, #tpu.memory_space<vmem>>, vector<1x6x8xf32>
    %461 = vector.shape_cast %460 : vector<1x6x8xf32> to vector<6x8xf32>
    %c1_592 = arith.constant 1 : index
    %c2_593 = arith.constant 2 : index
    %c0_594 = arith.constant 0 : index
    %c0_595 = arith.constant 0 : index
    %462 = vector.load %arg3[%c1_592, %c2_593, %c0_594, %c0_595] : memref<3x3x8x16xf32, #tpu.memory_space<vmem>>, vector<1x1x8x16xf32>
    %463 = vector.shape_cast %462 : vector<1x1x8x16xf32> to vector<8x16xf32>
    %cst_596 = arith.constant dense<0.000000e+00> : vector<6x16xf32>
    %464 = tpu.matmul %461, %463, %cst_596 {dimension_numbers = #tpu.dot_dimension_numbers<[1], [0], [0], [1], [0, 0, 1, 1], [], []>} : vector<6x8xf32>, vector<8x16xf32>, vector<6x16xf32> -> vector<6x16xf32>
    %465 = arith.addf %459, %464 : vector<6x16xf32>
    %c5_597 = arith.constant 5 : index
    %c0_598 = arith.constant 0 : index
    %c0_599 = arith.constant 0 : index
    %466 = vector.load %arg6[%c5_597, %c0_598, %c0_599] : memref<8x8x8xf32, #tpu.memory_space<vmem>>, vector<1x6x8xf32>
    %467 = vector.shape_cast %466 : vector<1x6x8xf32> to vector<6x8xf32>
    %c2_600 = arith.constant 2 : index
    %c0_601 = arith.constant 0 : index
    %c0_602 = arith.constant 0 : index
    %c0_603 = arith.constant 0 : index
    %468 = vector.load %arg3[%c2_600, %c0_601, %c0_602, %c0_603] : memref<3x3x8x16xf32, #tpu.memory_space<vmem>>, vector<1x1x8x16xf32>
    %469 = vector.shape_cast %468 : vector<1x1x8x16xf32> to vector<8x16xf32>
    %cst_604 = arith.constant dense<0.000000e+00> : vector<6x16xf32>
    %470 = tpu.matmul %467, %469, %cst_604 {dimension_numbers = #tpu.dot_dimension_numbers<[1], [0], [0], [1], [0, 0, 1, 1], [], []>} : vector<6x8xf32>, vector<8x16xf32>, vector<6x16xf32> -> vector<6x16xf32>
    %471 = arith.addf %465, %470 : vector<6x16xf32>
    %c5_605 = arith.constant 5 : index
    %c1_606 = arith.constant 1 : index
    %c0_607 = arith.constant 0 : index
    %472 = vector.load %arg6[%c5_605, %c1_606, %c0_607] : memref<8x8x8xf32, #tpu.memory_space<vmem>>, vector<1x6x8xf32>
    %473 = vector.shape_cast %472 : vector<1x6x8xf32> to vector<6x8xf32>
    %c2_608 = arith.constant 2 : index
    %c1_609 = arith.constant 1 : index
    %c0_610 = arith.constant 0 : index
    %c0_611 = arith.constant 0 : index
    %474 = vector.load %arg3[%c2_608, %c1_609, %c0_610, %c0_611] : memref<3x3x8x16xf32, #tpu.memory_space<vmem>>, vector<1x1x8x16xf32>
    %475 = vector.shape_cast %474 : vector<1x1x8x16xf32> to vector<8x16xf32>
    %cst_612 = arith.constant dense<0.000000e+00> : vector<6x16xf32>
    %476 = tpu.matmul %473, %475, %cst_612 {dimension_numbers = #tpu.dot_dimension_numbers<[1], [0], [0], [1], [0, 0, 1, 1], [], []>} : vector<6x8xf32>, vector<8x16xf32>, vector<6x16xf32> -> vector<6x16xf32>
    %477 = arith.addf %471, %476 : vector<6x16xf32>
    %c5_613 = arith.constant 5 : index
    %c2_614 = arith.constant 2 : index
    %c0_615 = arith.constant 0 : index
    %478 = vector.load %arg6[%c5_613, %c2_614, %c0_615] : memref<8x8x8xf32, #tpu.memory_space<vmem>>, vector<1x6x8xf32>
    %479 = vector.shape_cast %478 : vector<1x6x8xf32> to vector<6x8xf32>
    %c2_616 = arith.constant 2 : index
    %c2_617 = arith.constant 2 : index
    %c0_618 = arith.constant 0 : index
    %c0_619 = arith.constant 0 : index
    %480 = vector.load %arg3[%c2_616, %c2_617, %c0_618, %c0_619] : memref<3x3x8x16xf32, #tpu.memory_space<vmem>>, vector<1x1x8x16xf32>
    %481 = vector.shape_cast %480 : vector<1x1x8x16xf32> to vector<8x16xf32>
    %cst_620 = arith.constant dense<0.000000e+00> : vector<6x16xf32>
    %482 = tpu.matmul %479, %481, %cst_620 {dimension_numbers = #tpu.dot_dimension_numbers<[1], [0], [0], [1], [0, 0, 1, 1], [], []>} : vector<6x8xf32>, vector<8x16xf32>, vector<6x16xf32> -> vector<6x16xf32>
    %483 = arith.addf %477, %482 : vector<6x16xf32>
    %cst_621 = arith.constant 0.000000e+00 : f32
    %484 = vector.broadcast %cst_621 : f32 to vector<6x16xf32>
    %485 = arith.cmpf oge, %483, %484 : vector<6x16xf32>
    %cst_622 = arith.constant 2.000000e-01 : f32
    %486 = vector.broadcast %cst_622 : f32 to vector<6x16xf32>
    %487 = arith.mulf %486, %483 : vector<6x16xf32>
    %488 = arith.select %485, %483, %487 : vector<6x16xi1>, vector<6x16xf32>
    %c3_623 = arith.constant 3 : index
    %c0_624 = arith.constant 0 : index
    %c0_625 = arith.constant 0 : index
    %489 = vector.load %arg7[%c3_623, %c0_624, %c0_625] : memref<6x6x16xf32, #tpu.memory_space<vmem>>, vector<1x6x16xf32>
    %490 = vector.shape_cast %489 : vector<1x6x16xf32> to vector<6x16xf32>
    %491 = vector.shape_cast %488 : vector<6x16xf32> to vector<1x6x16xf32>
    tpu.vector_store %arg7[%c3_623, %c0_624, %c0_625], %491 {strides = array<i32>} : memref<6x6x16xf32, #tpu.memory_space<vmem>>, vector<1x6x16xf32>,
    %c4_626 = arith.constant 4 : index
    %c0_627 = arith.constant 0 : index
    %c0_628 = arith.constant 0 : index
    %492 = vector.load %arg6[%c4_626, %c0_627, %c0_628] : memref<8x8x8xf32, #tpu.memory_space<vmem>>, vector<1x6x8xf32>
    %493 = vector.shape_cast %492 : vector<1x6x8xf32> to vector<6x8xf32>
    %c0_629 = arith.constant 0 : index
    %c0_630 = arith.constant 0 : index
    %c0_631 = arith.constant 0 : index
    %c0_632 = arith.constant 0 : index
    %494 = vector.load %arg3[%c0_629, %c0_630, %c0_631, %c0_632] : memref<3x3x8x16xf32, #tpu.memory_space<vmem>>, vector<1x1x8x16xf32>
    %495 = vector.shape_cast %494 : vector<1x1x8x16xf32> to vector<8x16xf32>
    %cst_633 = arith.constant dense<0.000000e+00> : vector<6x16xf32>
    %496 = tpu.matmul %493, %495, %cst_633 {dimension_numbers = #tpu.dot_dimension_numbers<[1], [0], [0], [1], [0, 0, 1, 1], [], []>} : vector<6x8xf32>, vector<8x16xf32>, vector<6x16xf32> -> vector<6x16xf32>
    %c4_634 = arith.constant 4 : index
    %c1_635 = arith.constant 1 : index
    %c0_636 = arith.constant 0 : index
    %497 = vector.load %arg6[%c4_634, %c1_635, %c0_636] : memref<8x8x8xf32, #tpu.memory_space<vmem>>, vector<1x6x8xf32>
    %498 = vector.shape_cast %497 : vector<1x6x8xf32> to vector<6x8xf32>
    %c0_637 = arith.constant 0 : index
    %c1_638 = arith.constant 1 : index
    %c0_639 = arith.constant 0 : index
    %c0_640 = arith.constant 0 : index
    %499 = vector.load %arg3[%c0_637, %c1_638, %c0_639, %c0_640] : memref<3x3x8x16xf32, #tpu.memory_space<vmem>>, vector<1x1x8x16xf32>
    %500 = vector.shape_cast %499 : vector<1x1x8x16xf32> to vector<8x16xf32>
    %cst_641 = arith.constant dense<0.000000e+00> : vector<6x16xf32>
    %501 = tpu.matmul %498, %500, %cst_641 {dimension_numbers = #tpu.dot_dimension_numbers<[1], [0], [0], [1], [0, 0, 1, 1], [], []>} : vector<6x8xf32>, vector<8x16xf32>, vector<6x16xf32> -> vector<6x16xf32>
    %502 = arith.addf %496, %501 : vector<6x16xf32>
    %c4_642 = arith.constant 4 : index
    %c2_643 = arith.constant 2 : index
    %c0_644 = arith.constant 0 : index
    %503 = vector.load %arg6[%c4_642, %c2_643, %c0_644] : memref<8x8x8xf32, #tpu.memory_space<vmem>>, vector<1x6x8xf32>
    %504 = vector.shape_cast %503 : vector<1x6x8xf32> to vector<6x8xf32>
    %c0_645 = arith.constant 0 : index
    %c2_646 = arith.constant 2 : index
    %c0_647 = arith.constant 0 : index
    %c0_648 = arith.constant 0 : index
    %505 = vector.load %arg3[%c0_645, %c2_646, %c0_647, %c0_648] : memref<3x3x8x16xf32, #tpu.memory_space<vmem>>, vector<1x1x8x16xf32>
    %506 = vector.shape_cast %505 : vector<1x1x8x16xf32> to vector<8x16xf32>
    %cst_649 = arith.constant dense<0.000000e+00> : vector<6x16xf32>
    %507 = tpu.matmul %504, %506, %cst_649 {dimension_numbers = #tpu.dot_dimension_numbers<[1], [0], [0], [1], [0, 0, 1, 1], [], []>} : vector<6x8xf32>, vector<8x16xf32>, vector<6x16xf32> -> vector<6x16xf32>
    %508 = arith.addf %502, %507 : vector<6x16xf32>
    %c5_650 = arith.constant 5 : index
    %c0_651 = arith.constant 0 : index
    %c0_652 = arith.constant 0 : index
    %509 = vector.load %arg6[%c5_650, %c0_651, %c0_652] : memref<8x8x8xf32, #tpu.memory_space<vmem>>, vector<1x6x8xf32>
    %510 = vector.shape_cast %509 : vector<1x6x8xf32> to vector<6x8xf32>
    %c1_653 = arith.constant 1 : index
    %c0_654 = arith.constant 0 : index
    %c0_655 = arith.constant 0 : index
    %c0_656 = arith.constant 0 : index
    %511 = vector.load %arg3[%c1_653, %c0_654, %c0_655, %c0_656] : memref<3x3x8x16xf32, #tpu.memory_space<vmem>>, vector<1x1x8x16xf32>
    %512 = vector.shape_cast %511 : vector<1x1x8x16xf32> to vector<8x16xf32>
    %cst_657 = arith.constant dense<0.000000e+00> : vector<6x16xf32>
    %513 = tpu.matmul %510, %512, %cst_657 {dimension_numbers = #tpu.dot_dimension_numbers<[1], [0], [0], [1], [0, 0, 1, 1], [], []>} : vector<6x8xf32>, vector<8x16xf32>, vector<6x16xf32> -> vector<6x16xf32>
    %514 = arith.addf %508, %513 : vector<6x16xf32>
    %c5_658 = arith.constant 5 : index
    %c1_659 = arith.constant 1 : index
    %c0_660 = arith.constant 0 : index
    %515 = vector.load %arg6[%c5_658, %c1_659, %c0_660] : memref<8x8x8xf32, #tpu.memory_space<vmem>>, vector<1x6x8xf32>
    %516 = vector.shape_cast %515 : vector<1x6x8xf32> to vector<6x8xf32>
    %c1_661 = arith.constant 1 : index
    %c1_662 = arith.constant 1 : index
    %c0_663 = arith.constant 0 : index
    %c0_664 = arith.constant 0 : index
    %517 = vector.load %arg3[%c1_661, %c1_662, %c0_663, %c0_664] : memref<3x3x8x16xf32, #tpu.memory_space<vmem>>, vector<1x1x8x16xf32>
    %518 = vector.shape_cast %517 : vector<1x1x8x16xf32> to vector<8x16xf32>
    %cst_665 = arith.constant dense<0.000000e+00> : vector<6x16xf32>
    %519 = tpu.matmul %516, %518, %cst_665 {dimension_numbers = #tpu.dot_dimension_numbers<[1], [0], [0], [1], [0, 0, 1, 1], [], []>} : vector<6x8xf32>, vector<8x16xf32>, vector<6x16xf32> -> vector<6x16xf32>
    %520 = arith.addf %514, %519 : vector<6x16xf32>
    %c5_666 = arith.constant 5 : index
    %c2_667 = arith.constant 2 : index
    %c0_668 = arith.constant 0 : index
    %521 = vector.load %arg6[%c5_666, %c2_667, %c0_668] : memref<8x8x8xf32, #tpu.memory_space<vmem>>, vector<1x6x8xf32>
    %522 = vector.shape_cast %521 : vector<1x6x8xf32> to vector<6x8xf32>
    %c1_669 = arith.constant 1 : index
    %c2_670 = arith.constant 2 : index
    %c0_671 = arith.constant 0 : index
    %c0_672 = arith.constant 0 : index
    %523 = vector.load %arg3[%c1_669, %c2_670, %c0_671, %c0_672] : memref<3x3x8x16xf32, #tpu.memory_space<vmem>>, vector<1x1x8x16xf32>
    %524 = vector.shape_cast %523 : vector<1x1x8x16xf32> to vector<8x16xf32>
    %cst_673 = arith.constant dense<0.000000e+00> : vector<6x16xf32>
    %525 = tpu.matmul %522, %524, %cst_673 {dimension_numbers = #tpu.dot_dimension_numbers<[1], [0], [0], [1], [0, 0, 1, 1], [], []>} : vector<6x8xf32>, vector<8x16xf32>, vector<6x16xf32> -> vector<6x16xf32>
    %526 = arith.addf %520, %525 : vector<6x16xf32>
    %c6_674 = arith.constant 6 : index
    %c0_675 = arith.constant 0 : index
    %c0_676 = arith.constant 0 : index
    %527 = vector.load %arg6[%c6_674, %c0_675, %c0_676] : memref<8x8x8xf32, #tpu.memory_space<vmem>>, vector<1x6x8xf32>
    %528 = vector.shape_cast %527 : vector<1x6x8xf32> to vector<6x8xf32>
    %c2_677 = arith.constant 2 : index
    %c0_678 = arith.constant 0 : index
    %c0_679 = arith.constant 0 : index
    %c0_680 = arith.constant 0 : index
    %529 = vector.load %arg3[%c2_677, %c0_678, %c0_679, %c0_680] : memref<3x3x8x16xf32, #tpu.memory_space<vmem>>, vector<1x1x8x16xf32>
    %530 = vector.shape_cast %529 : vector<1x1x8x16xf32> to vector<8x16xf32>
    %cst_681 = arith.constant dense<0.000000e+00> : vector<6x16xf32>
    %531 = tpu.matmul %528, %530, %cst_681 {dimension_numbers = #tpu.dot_dimension_numbers<[1], [0], [0], [1], [0, 0, 1, 1], [], []>} : vector<6x8xf32>, vector<8x16xf32>, vector<6x16xf32> -> vector<6x16xf32>
    %532 = arith.addf %526, %531 : vector<6x16xf32>
    %c6_682 = arith.constant 6 : index
    %c1_683 = arith.constant 1 : index
    %c0_684 = arith.constant 0 : index
    %533 = vector.load %arg6[%c6_682, %c1_683, %c0_684] : memref<8x8x8xf32, #tpu.memory_space<vmem>>, vector<1x6x8xf32>
    %534 = vector.shape_cast %533 : vector<1x6x8xf32> to vector<6x8xf32>
    %c2_685 = arith.constant 2 : index
    %c1_686 = arith.constant 1 : index
    %c0_687 = arith.constant 0 : index
    %c0_688 = arith.constant 0 : index
    %535 = vector.load %arg3[%c2_685, %c1_686, %c0_687, %c0_688] : memref<3x3x8x16xf32, #tpu.memory_space<vmem>>, vector<1x1x8x16xf32>
    %536 = vector.shape_cast %535 : vector<1x1x8x16xf32> to vector<8x16xf32>
    %cst_689 = arith.constant dense<0.000000e+00> : vector<6x16xf32>
    %537 = tpu.matmul %534, %536, %cst_689 {dimension_numbers = #tpu.dot_dimension_numbers<[1], [0], [0], [1], [0, 0, 1, 1], [], []>} : vector<6x8xf32>, vector<8x16xf32>, vector<6x16xf32> -> vector<6x16xf32>
    %538 = arith.addf %532, %537 : vector<6x16xf32>
    %c6_690 = arith.constant 6 : index
    %c2_691 = arith.constant 2 : index
    %c0_692 = arith.constant 0 : index
    %539 = vector.load %arg6[%c6_690, %c2_691, %c0_692] : memref<8x8x8xf32, #tpu.memory_space<vmem>>, vector<1x6x8xf32>
    %540 = vector.shape_cast %539 : vector<1x6x8xf32> to vector<6x8xf32>
    %c2_693 = arith.constant 2 : index
    %c2_694 = arith.constant 2 : index
    %c0_695 = arith.constant 0 : index
    %c0_696 = arith.constant 0 : index
    %541 = vector.load %arg3[%c2_693, %c2_694, %c0_695, %c0_696] : memref<3x3x8x16xf32, #tpu.memory_space<vmem>>, vector<1x1x8x16xf32>
    %542 = vector.shape_cast %541 : vector<1x1x8x16xf32> to vector<8x16xf32>
    %cst_697 = arith.constant dense<0.000000e+00> : vector<6x16xf32>
    %543 = tpu.matmul %540, %542, %cst_697 {dimension_numbers = #tpu.dot_dimension_numbers<[1], [0], [0], [1], [0, 0, 1, 1], [], []>} : vector<6x8xf32>, vector<8x16xf32>, vector<6x16xf32> -> vector<6x16xf32>
    %544 = arith.addf %538, %543 : vector<6x16xf32>
    %cst_698 = arith.constant 0.000000e+00 : f32
    %545 = vector.broadcast %cst_698 : f32 to vector<6x16xf32>
    %546 = arith.cmpf oge, %544, %545 : vector<6x16xf32>
    %cst_699 = arith.constant 2.000000e-01 : f32
    %547 = vector.broadcast %cst_699 : f32 to vector<6x16xf32>
    %548 = arith.mulf %547, %544 : vector<6x16xf32>
    %549 = arith.select %546, %544, %548 : vector<6x16xi1>, vector<6x16xf32>
    %c4_700 = arith.constant 4 : index
    %c0_701 = arith.constant 0 : index
    %c0_702 = arith.constant 0 : index
    %550 = vector.load %arg7[%c4_700, %c0_701, %c0_702] : memref<6x6x16xf32, #tpu.memory_space<vmem>>, vector<1x6x16xf32>
    %551 = vector.shape_cast %550 : vector<1x6x16xf32> to vector<6x16xf32>
    %552 = vector.shape_cast %549 : vector<6x16xf32> to vector<1x6x16xf32>
    tpu.vector_store %arg7[%c4_700, %c0_701, %c0_702], %552 {strides = array<i32>} : memref<6x6x16xf32, #tpu.memory_space<vmem>>, vector<1x6x16xf32>,
    %c5_703 = arith.constant 5 : index
    %c0_704 = arith.constant 0 : index
    %c0_705 = arith.constant 0 : index
    %553 = vector.load %arg6[%c5_703, %c0_704, %c0_705] : memref<8x8x8xf32, #tpu.memory_space<vmem>>, vector<1x6x8xf32>
    %554 = vector.shape_cast %553 : vector<1x6x8xf32> to vector<6x8xf32>
    %c0_706 = arith.constant 0 : index
    %c0_707 = arith.constant 0 : index
    %c0_708 = arith.constant 0 : index
    %c0_709 = arith.constant 0 : index
    %555 = vector.load %arg3[%c0_706, %c0_707, %c0_708, %c0_709] : memref<3x3x8x16xf32, #tpu.memory_space<vmem>>, vector<1x1x8x16xf32>
    %556 = vector.shape_cast %555 : vector<1x1x8x16xf32> to vector<8x16xf32>
    %cst_710 = arith.constant dense<0.000000e+00> : vector<6x16xf32>
    %557 = tpu.matmul %554, %556, %cst_710 {dimension_numbers = #tpu.dot_dimension_numbers<[1], [0], [0], [1], [0, 0, 1, 1], [], []>} : vector<6x8xf32>, vector<8x16xf32>, vector<6x16xf32> -> vector<6x16xf32>
    %c5_711 = arith.constant 5 : index
    %c1_712 = arith.constant 1 : index
    %c0_713 = arith.constant 0 : index
    %558 = vector.load %arg6[%c5_711, %c1_712, %c0_713] : memref<8x8x8xf32, #tpu.memory_space<vmem>>, vector<1x6x8xf32>
    %559 = vector.shape_cast %558 : vector<1x6x8xf32> to vector<6x8xf32>
    %c0_714 = arith.constant 0 : index
    %c1_715 = arith.constant 1 : index
    %c0_716 = arith.constant 0 : index
    %c0_717 = arith.constant 0 : index
    %560 = vector.load %arg3[%c0_714, %c1_715, %c0_716, %c0_717] : memref<3x3x8x16xf32, #tpu.memory_space<vmem>>, vector<1x1x8x16xf32>
    %561 = vector.shape_cast %560 : vector<1x1x8x16xf32> to vector<8x16xf32>
    %cst_718 = arith.constant dense<0.000000e+00> : vector<6x16xf32>
    %562 = tpu.matmul %559, %561, %cst_718 {dimension_numbers = #tpu.dot_dimension_numbers<[1], [0], [0], [1], [0, 0, 1, 1], [], []>} : vector<6x8xf32>, vector<8x16xf32>, vector<6x16xf32> -> vector<6x16xf32>
    %563 = arith.addf %557, %562 : vector<6x16xf32>
    %c5_719 = arith.constant 5 : index
    %c2_720 = arith.constant 2 : index
    %c0_721 = arith.constant 0 : index
    %564 = vector.load %arg6[%c5_719, %c2_720, %c0_721] : memref<8x8x8xf32, #tpu.memory_space<vmem>>, vector<1x6x8xf32>
    %565 = vector.shape_cast %564 : vector<1x6x8xf32> to vector<6x8xf32>
    %c0_722 = arith.constant 0 : index
    %c2_723 = arith.constant 2 : index
    %c0_724 = arith.constant 0 : index
    %c0_725 = arith.constant 0 : index
    %566 = vector.load %arg3[%c0_722, %c2_723, %c0_724, %c0_725] : memref<3x3x8x16xf32, #tpu.memory_space<vmem>>, vector<1x1x8x16xf32>
    %567 = vector.shape_cast %566 : vector<1x1x8x16xf32> to vector<8x16xf32>
    %cst_726 = arith.constant dense<0.000000e+00> : vector<6x16xf32>
    %568 = tpu.matmul %565, %567, %cst_726 {dimension_numbers = #tpu.dot_dimension_numbers<[1], [0], [0], [1], [0, 0, 1, 1], [], []>} : vector<6x8xf32>, vector<8x16xf32>, vector<6x16xf32> -> vector<6x16xf32>
    %569 = arith.addf %563, %568 : vector<6x16xf32>
    %c6_727 = arith.constant 6 : index
    %c0_728 = arith.constant 0 : index
    %c0_729 = arith.constant 0 : index
    %570 = vector.load %arg6[%c6_727, %c0_728, %c0_729] : memref<8x8x8xf32, #tpu.memory_space<vmem>>, vector<1x6x8xf32>
    %571 = vector.shape_cast %570 : vector<1x6x8xf32> to vector<6x8xf32>
    %c1_730 = arith.constant 1 : index
    %c0_731 = arith.constant 0 : index
    %c0_732 = arith.constant 0 : index
    %c0_733 = arith.constant 0 : index
    %572 = vector.load %arg3[%c1_730, %c0_731, %c0_732, %c0_733] : memref<3x3x8x16xf32, #tpu.memory_space<vmem>>, vector<1x1x8x16xf32>
    %573 = vector.shape_cast %572 : vector<1x1x8x16xf32> to vector<8x16xf32>
    %cst_734 = arith.constant dense<0.000000e+00> : vector<6x16xf32>
    %574 = tpu.matmul %571, %573, %cst_734 {dimension_numbers = #tpu.dot_dimension_numbers<[1], [0], [0], [1], [0, 0, 1, 1], [], []>} : vector<6x8xf32>, vector<8x16xf32>, vector<6x16xf32> -> vector<6x16xf32>
    %575 = arith.addf %569, %574 : vector<6x16xf32>
    %c6_735 = arith.constant 6 : index
    %c1_736 = arith.constant 1 : index
    %c0_737 = arith.constant 0 : index
    %576 = vector.load %arg6[%c6_735, %c1_736, %c0_737] : memref<8x8x8xf32, #tpu.memory_space<vmem>>, vector<1x6x8xf32>
    %577 = vector.shape_cast %576 : vector<1x6x8xf32> to vector<6x8xf32>
    %c1_738 = arith.constant 1 : index
    %c1_739 = arith.constant 1 : index
    %c0_740 = arith.constant 0 : index
    %c0_741 = arith.constant 0 : index
    %578 = vector.load %arg3[%c1_738, %c1_739, %c0_740, %c0_741] : memref<3x3x8x16xf32, #tpu.memory_space<vmem>>, vector<1x1x8x16xf32>
    %579 = vector.shape_cast %578 : vector<1x1x8x16xf32> to vector<8x16xf32>
    %cst_742 = arith.constant dense<0.000000e+00> : vector<6x16xf32>
    %580 = tpu.matmul %577, %579, %cst_742 {dimension_numbers = #tpu.dot_dimension_numbers<[1], [0], [0], [1], [0, 0, 1, 1], [], []>} : vector<6x8xf32>, vector<8x16xf32>, vector<6x16xf32> -> vector<6x16xf32>
    %581 = arith.addf %575, %580 : vector<6x16xf32>
    %c6_743 = arith.constant 6 : index
    %c2_744 = arith.constant 2 : index
    %c0_745 = arith.constant 0 : index
    %582 = vector.load %arg6[%c6_743, %c2_744, %c0_745] : memref<8x8x8xf32, #tpu.memory_space<vmem>>, vector<1x6x8xf32>
    %583 = vector.shape_cast %582 : vector<1x6x8xf32> to vector<6x8xf32>
    %c1_746 = arith.constant 1 : index
    %c2_747 = arith.constant 2 : index
    %c0_748 = arith.constant 0 : index
    %c0_749 = arith.constant 0 : index
    %584 = vector.load %arg3[%c1_746, %c2_747, %c0_748, %c0_749] : memref<3x3x8x16xf32, #tpu.memory_space<vmem>>, vector<1x1x8x16xf32>
    %585 = vector.shape_cast %584 : vector<1x1x8x16xf32> to vector<8x16xf32>
    %cst_750 = arith.constant dense<0.000000e+00> : vector<6x16xf32>
    %586 = tpu.matmul %583, %585, %cst_750 {dimension_numbers = #tpu.dot_dimension_numbers<[1], [0], [0], [1], [0, 0, 1, 1], [], []>} : vector<6x8xf32>, vector<8x16xf32>, vector<6x16xf32> -> vector<6x16xf32>
    %587 = arith.addf %581, %586 : vector<6x16xf32>
    %c7_751 = arith.constant 7 : index
    %c0_752 = arith.constant 0 : index
    %c0_753 = arith.constant 0 : index
    %588 = vector.load %arg6[%c7_751, %c0_752, %c0_753] : memref<8x8x8xf32, #tpu.memory_space<vmem>>, vector<1x6x8xf32>
    %589 = vector.shape_cast %588 : vector<1x6x8xf32> to vector<6x8xf32>
    %c2_754 = arith.constant 2 : index
    %c0_755 = arith.constant 0 : index
    %c0_756 = arith.constant 0 : index
    %c0_757 = arith.constant 0 : index
    %590 = vector.load %arg3[%c2_754, %c0_755, %c0_756, %c0_757] : memref<3x3x8x16xf32, #tpu.memory_space<vmem>>, vector<1x1x8x16xf32>
    %591 = vector.shape_cast %590 : vector<1x1x8x16xf32> to vector<8x16xf32>
    %cst_758 = arith.constant dense<0.000000e+00> : vector<6x16xf32>
    %592 = tpu.matmul %589, %591, %cst_758 {dimension_numbers = #tpu.dot_dimension_numbers<[1], [0], [0], [1], [0, 0, 1, 1], [], []>} : vector<6x8xf32>, vector<8x16xf32>, vector<6x16xf32> -> vector<6x16xf32>
    %593 = arith.addf %587, %592 : vector<6x16xf32>
    %c7_759 = arith.constant 7 : index
    %c1_760 = arith.constant 1 : index
    %c0_761 = arith.constant 0 : index
    %594 = vector.load %arg6[%c7_759, %c1_760, %c0_761] : memref<8x8x8xf32, #tpu.memory_space<vmem>>, vector<1x6x8xf32>
    %595 = vector.shape_cast %594 : vector<1x6x8xf32> to vector<6x8xf32>
    %c2_762 = arith.constant 2 : index
    %c1_763 = arith.constant 1 : index
    %c0_764 = arith.constant 0 : index
    %c0_765 = arith.constant 0 : index
    %596 = vector.load %arg3[%c2_762, %c1_763, %c0_764, %c0_765] : memref<3x3x8x16xf32, #tpu.memory_space<vmem>>, vector<1x1x8x16xf32>
    %597 = vector.shape_cast %596 : vector<1x1x8x16xf32> to vector<8x16xf32>
    %cst_766 = arith.constant dense<0.000000e+00> : vector<6x16xf32>
    %598 = tpu.matmul %595, %597, %cst_766 {dimension_numbers = #tpu.dot_dimension_numbers<[1], [0], [0], [1], [0, 0, 1, 1], [], []>} : vector<6x8xf32>, vector<8x16xf32>, vector<6x16xf32> -> vector<6x16xf32>
    %599 = arith.addf %593, %598 : vector<6x16xf32>
    %c7_767 = arith.constant 7 : index
    %c2_768 = arith.constant 2 : index
    %c0_769 = arith.constant 0 : index
    %600 = vector.load %arg6[%c7_767, %c2_768, %c0_769] : memref<8x8x8xf32, #tpu.memory_space<vmem>>, vector<1x6x8xf32>
    %601 = vector.shape_cast %600 : vector<1x6x8xf32> to vector<6x8xf32>
    %c2_770 = arith.constant 2 : index
    %c2_771 = arith.constant 2 : index
    %c0_772 = arith.constant 0 : index
    %c0_773 = arith.constant 0 : index
    %602 = vector.load %arg3[%c2_770, %c2_771, %c0_772, %c0_773] : memref<3x3x8x16xf32, #tpu.memory_space<vmem>>, vector<1x1x8x16xf32>
    %603 = vector.shape_cast %602 : vector<1x1x8x16xf32> to vector<8x16xf32>
    %cst_774 = arith.constant dense<0.000000e+00> : vector<6x16xf32>
    %604 = tpu.matmul %601, %603, %cst_774 {dimension_numbers = #tpu.dot_dimension_numbers<[1], [0], [0], [1], [0, 0, 1, 1], [], []>} : vector<6x8xf32>, vector<8x16xf32>, vector<6x16xf32> -> vector<6x16xf32>
    %605 = arith.addf %599, %604 : vector<6x16xf32>
    %cst_775 = arith.constant 0.000000e+00 : f32
    %606 = vector.broadcast %cst_775 : f32 to vector<6x16xf32>
    %607 = arith.cmpf oge, %605, %606 : vector<6x16xf32>
    %cst_776 = arith.constant 2.000000e-01 : f32
    %608 = vector.broadcast %cst_776 : f32 to vector<6x16xf32>
    %609 = arith.mulf %608, %605 : vector<6x16xf32>
    %610 = arith.select %607, %605, %609 : vector<6x16xi1>, vector<6x16xf32>
    %c5_777 = arith.constant 5 : index
    %c0_778 = arith.constant 0 : index
    %c0_779 = arith.constant 0 : index
    %611 = vector.load %arg7[%c5_777, %c0_778, %c0_779] : memref<6x6x16xf32, #tpu.memory_space<vmem>>, vector<1x6x16xf32>
    %612 = vector.shape_cast %611 : vector<1x6x16xf32> to vector<6x16xf32>
    %613 = vector.shape_cast %610 : vector<6x16xf32> to vector<1x6x16xf32>
    tpu.vector_store %arg7[%c5_777, %c0_778, %c0_779], %613 {strides = array<i32>} : memref<6x6x16xf32, #tpu.memory_space<vmem>>, vector<1x6x16xf32>,
    %c0_780 = arith.constant 0 : index
    %c0_781 = arith.constant 0 : index
    %c0_782 = arith.constant 0 : index
    %614 = vector.load %arg7[%c0_780, %c0_781, %c0_782] : memref<6x6x16xf32, #tpu.memory_space<vmem>>, vector<1x4x16xf32>
    %615 = vector.shape_cast %614 : vector<1x4x16xf32> to vector<4x16xf32>
    %c0_783 = arith.constant 0 : index
    %c0_784 = arith.constant 0 : index
    %c0_785 = arith.constant 0 : index
    %c0_786 = arith.constant 0 : index
    %616 = vector.load %arg4[%c0_783, %c0_784, %c0_785, %c0_786] : memref<3x3x16x8xf32, #tpu.memory_space<vmem>>, vector<1x1x16x8xf32>
    %617 = vector.shape_cast %616 : vector<1x1x16x8xf32> to vector<16x8xf32>
    %cst_787 = arith.constant dense<0.000000e+00> : vector<4x8xf32>
    %618 = tpu.matmul %615, %617, %cst_787 {dimension_numbers = #tpu.dot_dimension_numbers<[1], [0], [0], [1], [0, 0, 1, 1], [], []>} : vector<4x16xf32>, vector<16x8xf32>, vector<4x8xf32> -> vector<4x8xf32>
    %c0_788 = arith.constant 0 : index
    %c1_789 = arith.constant 1 : index
    %c0_790 = arith.constant 0 : index
    %619 = vector.load %arg7[%c0_788, %c1_789, %c0_790] : memref<6x6x16xf32, #tpu.memory_space<vmem>>, vector<1x4x16xf32>
    %620 = vector.shape_cast %619 : vector<1x4x16xf32> to vector<4x16xf32>
    %c0_791 = arith.constant 0 : index
    %c1_792 = arith.constant 1 : index
    %c0_793 = arith.constant 0 : index
    %c0_794 = arith.constant 0 : index
    %621 = vector.load %arg4[%c0_791, %c1_792, %c0_793, %c0_794] : memref<3x3x16x8xf32, #tpu.memory_space<vmem>>, vector<1x1x16x8xf32>
    %622 = vector.shape_cast %621 : vector<1x1x16x8xf32> to vector<16x8xf32>
    %cst_795 = arith.constant dense<0.000000e+00> : vector<4x8xf32>
    %623 = tpu.matmul %620, %622, %cst_795 {dimension_numbers = #tpu.dot_dimension_numbers<[1], [0], [0], [1], [0, 0, 1, 1], [], []>} : vector<4x16xf32>, vector<16x8xf32>, vector<4x8xf32> -> vector<4x8xf32>
    %624 = arith.addf %618, %623 : vector<4x8xf32>
    %c0_796 = arith.constant 0 : index
    %c2_797 = arith.constant 2 : index
    %c0_798 = arith.constant 0 : index
    %625 = vector.load %arg7[%c0_796, %c2_797, %c0_798] : memref<6x6x16xf32, #tpu.memory_space<vmem>>, vector<1x4x16xf32>
    %626 = vector.shape_cast %625 : vector<1x4x16xf32> to vector<4x16xf32>
    %c0_799 = arith.constant 0 : index
    %c2_800 = arith.constant 2 : index
    %c0_801 = arith.constant 0 : index
    %c0_802 = arith.constant 0 : index
    %627 = vector.load %arg4[%c0_799, %c2_800, %c0_801, %c0_802] : memref<3x3x16x8xf32, #tpu.memory_space<vmem>>, vector<1x1x16x8xf32>
    %628 = vector.shape_cast %627 : vector<1x1x16x8xf32> to vector<16x8xf32>
    %cst_803 = arith.constant dense<0.000000e+00> : vector<4x8xf32>
    %629 = tpu.matmul %626, %628, %cst_803 {dimension_numbers = #tpu.dot_dimension_numbers<[1], [0], [0], [1], [0, 0, 1, 1], [], []>} : vector<4x16xf32>, vector<16x8xf32>, vector<4x8xf32> -> vector<4x8xf32>
    %630 = arith.addf %624, %629 : vector<4x8xf32>
    %c1_804 = arith.constant 1 : index
    %c0_805 = arith.constant 0 : index
    %c0_806 = arith.constant 0 : index
    %631 = vector.load %arg7[%c1_804, %c0_805, %c0_806] : memref<6x6x16xf32, #tpu.memory_space<vmem>>, vector<1x4x16xf32>
    %632 = vector.shape_cast %631 : vector<1x4x16xf32> to vector<4x16xf32>
    %c1_807 = arith.constant 1 : index
    %c0_808 = arith.constant 0 : index
    %c0_809 = arith.constant 0 : index
    %c0_810 = arith.constant 0 : index
    %633 = vector.load %arg4[%c1_807, %c0_808, %c0_809, %c0_810] : memref<3x3x16x8xf32, #tpu.memory_space<vmem>>, vector<1x1x16x8xf32>
    %634 = vector.shape_cast %633 : vector<1x1x16x8xf32> to vector<16x8xf32>
    %cst_811 = arith.constant dense<0.000000e+00> : vector<4x8xf32>
    %635 = tpu.matmul %632, %634, %cst_811 {dimension_numbers = #tpu.dot_dimension_numbers<[1], [0], [0], [1], [0, 0, 1, 1], [], []>} : vector<4x16xf32>, vector<16x8xf32>, vector<4x8xf32> -> vector<4x8xf32>
    %636 = arith.addf %630, %635 : vector<4x8xf32>
    %c1_812 = arith.constant 1 : index
    %c1_813 = arith.constant 1 : index
    %c0_814 = arith.constant 0 : index
    %637 = vector.load %arg7[%c1_812, %c1_813, %c0_814] : memref<6x6x16xf32, #tpu.memory_space<vmem>>, vector<1x4x16xf32>
    %638 = vector.shape_cast %637 : vector<1x4x16xf32> to vector<4x16xf32>
    %c1_815 = arith.constant 1 : index
    %c1_816 = arith.constant 1 : index
    %c0_817 = arith.constant 0 : index
    %c0_818 = arith.constant 0 : index
    %639 = vector.load %arg4[%c1_815, %c1_816, %c0_817, %c0_818] : memref<3x3x16x8xf32, #tpu.memory_space<vmem>>, vector<1x1x16x8xf32>
    %640 = vector.shape_cast %639 : vector<1x1x16x8xf32> to vector<16x8xf32>
    %cst_819 = arith.constant dense<0.000000e+00> : vector<4x8xf32>
    %641 = tpu.matmul %638, %640, %cst_819 {dimension_numbers = #tpu.dot_dimension_numbers<[1], [0], [0], [1], [0, 0, 1, 1], [], []>} : vector<4x16xf32>, vector<16x8xf32>, vector<4x8xf32> -> vector<4x8xf32>
    %642 = arith.addf %636, %641 : vector<4x8xf32>
    %c1_820 = arith.constant 1 : index
    %c2_821 = arith.constant 2 : index
    %c0_822 = arith.constant 0 : index
    %643 = vector.load %arg7[%c1_820, %c2_821, %c0_822] : memref<6x6x16xf32, #tpu.memory_space<vmem>>, vector<1x4x16xf32>
    %644 = vector.shape_cast %643 : vector<1x4x16xf32> to vector<4x16xf32>
    %c1_823 = arith.constant 1 : index
    %c2_824 = arith.constant 2 : index
    %c0_825 = arith.constant 0 : index
    %c0_826 = arith.constant 0 : index
    %645 = vector.load %arg4[%c1_823, %c2_824, %c0_825, %c0_826] : memref<3x3x16x8xf32, #tpu.memory_space<vmem>>, vector<1x1x16x8xf32>
    %646 = vector.shape_cast %645 : vector<1x1x16x8xf32> to vector<16x8xf32>
    %cst_827 = arith.constant dense<0.000000e+00> : vector<4x8xf32>
    %647 = tpu.matmul %644, %646, %cst_827 {dimension_numbers = #tpu.dot_dimension_numbers<[1], [0], [0], [1], [0, 0, 1, 1], [], []>} : vector<4x16xf32>, vector<16x8xf32>, vector<4x8xf32> -> vector<4x8xf32>
    %648 = arith.addf %642, %647 : vector<4x8xf32>
    %c2_828 = arith.constant 2 : index
    %c0_829 = arith.constant 0 : index
    %c0_830 = arith.constant 0 : index
    %649 = vector.load %arg7[%c2_828, %c0_829, %c0_830] : memref<6x6x16xf32, #tpu.memory_space<vmem>>, vector<1x4x16xf32>
    %650 = vector.shape_cast %649 : vector<1x4x16xf32> to vector<4x16xf32>
    %c2_831 = arith.constant 2 : index
    %c0_832 = arith.constant 0 : index
    %c0_833 = arith.constant 0 : index
    %c0_834 = arith.constant 0 : index
    %651 = vector.load %arg4[%c2_831, %c0_832, %c0_833, %c0_834] : memref<3x3x16x8xf32, #tpu.memory_space<vmem>>, vector<1x1x16x8xf32>
    %652 = vector.shape_cast %651 : vector<1x1x16x8xf32> to vector<16x8xf32>
    %cst_835 = arith.constant dense<0.000000e+00> : vector<4x8xf32>
    %653 = tpu.matmul %650, %652, %cst_835 {dimension_numbers = #tpu.dot_dimension_numbers<[1], [0], [0], [1], [0, 0, 1, 1], [], []>} : vector<4x16xf32>, vector<16x8xf32>, vector<4x8xf32> -> vector<4x8xf32>
    %654 = arith.addf %648, %653 : vector<4x8xf32>
    %c2_836 = arith.constant 2 : index
    %c1_837 = arith.constant 1 : index
    %c0_838 = arith.constant 0 : index
    %655 = vector.load %arg7[%c2_836, %c1_837, %c0_838] : memref<6x6x16xf32, #tpu.memory_space<vmem>>, vector<1x4x16xf32>
    %656 = vector.shape_cast %655 : vector<1x4x16xf32> to vector<4x16xf32>
    %c2_839 = arith.constant 2 : index
    %c1_840 = arith.constant 1 : index
    %c0_841 = arith.constant 0 : index
    %c0_842 = arith.constant 0 : index
    %657 = vector.load %arg4[%c2_839, %c1_840, %c0_841, %c0_842] : memref<3x3x16x8xf32, #tpu.memory_space<vmem>>, vector<1x1x16x8xf32>
    %658 = vector.shape_cast %657 : vector<1x1x16x8xf32> to vector<16x8xf32>
    %cst_843 = arith.constant dense<0.000000e+00> : vector<4x8xf32>
    %659 = tpu.matmul %656, %658, %cst_843 {dimension_numbers = #tpu.dot_dimension_numbers<[1], [0], [0], [1], [0, 0, 1, 1], [], []>} : vector<4x16xf32>, vector<16x8xf32>, vector<4x8xf32> -> vector<4x8xf32>
    %660 = arith.addf %654, %659 : vector<4x8xf32>
    %c2_844 = arith.constant 2 : index
    %c2_845 = arith.constant 2 : index
    %c0_846 = arith.constant 0 : index
    %661 = vector.load %arg7[%c2_844, %c2_845, %c0_846] : memref<6x6x16xf32, #tpu.memory_space<vmem>>, vector<1x4x16xf32>
    %662 = vector.shape_cast %661 : vector<1x4x16xf32> to vector<4x16xf32>
    %c2_847 = arith.constant 2 : index
    %c2_848 = arith.constant 2 : index
    %c0_849 = arith.constant 0 : index
    %c0_850 = arith.constant 0 : index
    %663 = vector.load %arg4[%c2_847, %c2_848, %c0_849, %c0_850] : memref<3x3x16x8xf32, #tpu.memory_space<vmem>>, vector<1x1x16x8xf32>
    %664 = vector.shape_cast %663 : vector<1x1x16x8xf32> to vector<16x8xf32>
    %cst_851 = arith.constant dense<0.000000e+00> : vector<4x8xf32>
    %665 = tpu.matmul %662, %664, %cst_851 {dimension_numbers = #tpu.dot_dimension_numbers<[1], [0], [0], [1], [0, 0, 1, 1], [], []>} : vector<4x16xf32>, vector<16x8xf32>, vector<4x8xf32> -> vector<4x8xf32>
    %666 = arith.addf %660, %665 : vector<4x8xf32>
    %c0_852 = arith.constant 0 : index
    %c0_853 = arith.constant 0 : index
    %c0_854 = arith.constant 0 : index
    %c0_855 = arith.constant 0 : index
    %667 = vector.load %arg5[%c0_852, %c0_853, %c0_854, %c0_855] : memref<1x4x4x8xf32, #tpu.memory_space<vmem>>, vector<1x1x4x8xf32>
    %668 = vector.shape_cast %667 : vector<1x1x4x8xf32> to vector<4x8xf32>
    %669 = vector.shape_cast %666 : vector<4x8xf32> to vector<1x1x4x8xf32>
    tpu.vector_store %arg5[%c0_852, %c0_853, %c0_854, %c0_855], %669 {strides = array<i32>} : memref<1x4x4x8xf32, #tpu.memory_space<vmem>>, vector<1x1x4x8xf32>,
    %c1_856 = arith.constant 1 : index
    %c0_857 = arith.constant 0 : index
    %c0_858 = arith.constant 0 : index
    %670 = vector.load %arg7[%c1_856, %c0_857, %c0_858] : memref<6x6x16xf32, #tpu.memory_space<vmem>>, vector<1x4x16xf32>
    %671 = vector.shape_cast %670 : vector<1x4x16xf32> to vector<4x16xf32>
    %c0_859 = arith.constant 0 : index
    %c0_860 = arith.constant 0 : index
    %c0_861 = arith.constant 0 : index
    %c0_862 = arith.constant 0 : index
    %672 = vector.load %arg4[%c0_859, %c0_860, %c0_861, %c0_862] : memref<3x3x16x8xf32, #tpu.memory_space<vmem>>, vector<1x1x16x8xf32>
    %673 = vector.shape_cast %672 : vector<1x1x16x8xf32> to vector<16x8xf32>
    %cst_863 = arith.constant dense<0.000000e+00> : vector<4x8xf32>
    %674 = tpu.matmul %671, %673, %cst_863 {dimension_numbers = #tpu.dot_dimension_numbers<[1], [0], [0], [1], [0, 0, 1, 1], [], []>} : vector<4x16xf32>, vector<16x8xf32>, vector<4x8xf32> -> vector<4x8xf32>
    %c1_864 = arith.constant 1 : index
    %c1_865 = arith.constant 1 : index
    %c0_866 = arith.constant 0 : index
    %675 = vector.load %arg7[%c1_864, %c1_865, %c0_866] : memref<6x6x16xf32, #tpu.memory_space<vmem>>, vector<1x4x16xf32>
    %676 = vector.shape_cast %675 : vector<1x4x16xf32> to vector<4x16xf32>
    %c0_867 = arith.constant 0 : index
    %c1_868 = arith.constant 1 : index
    %c0_869 = arith.constant 0 : index
    %c0_870 = arith.constant 0 : index
    %677 = vector.load %arg4[%c0_867, %c1_868, %c0_869, %c0_870] : memref<3x3x16x8xf32, #tpu.memory_space<vmem>>, vector<1x1x16x8xf32>
    %678 = vector.shape_cast %677 : vector<1x1x16x8xf32> to vector<16x8xf32>
    %cst_871 = arith.constant dense<0.000000e+00> : vector<4x8xf32>
    %679 = tpu.matmul %676, %678, %cst_871 {dimension_numbers = #tpu.dot_dimension_numbers<[1], [0], [0], [1], [0, 0, 1, 1], [], []>} : vector<4x16xf32>, vector<16x8xf32>, vector<4x8xf32> -> vector<4x8xf32>
    %680 = arith.addf %674, %679 : vector<4x8xf32>
    %c1_872 = arith.constant 1 : index
    %c2_873 = arith.constant 2 : index
    %c0_874 = arith.constant 0 : index
    %681 = vector.load %arg7[%c1_872, %c2_873, %c0_874] : memref<6x6x16xf32, #tpu.memory_space<vmem>>, vector<1x4x16xf32>
    %682 = vector.shape_cast %681 : vector<1x4x16xf32> to vector<4x16xf32>
    %c0_875 = arith.constant 0 : index
    %c2_876 = arith.constant 2 : index
    %c0_877 = arith.constant 0 : index
    %c0_878 = arith.constant 0 : index
    %683 = vector.load %arg4[%c0_875, %c2_876, %c0_877, %c0_878] : memref<3x3x16x8xf32, #tpu.memory_space<vmem>>, vector<1x1x16x8xf32>
    %684 = vector.shape_cast %683 : vector<1x1x16x8xf32> to vector<16x8xf32>
    %cst_879 = arith.constant dense<0.000000e+00> : vector<4x8xf32>
    %685 = tpu.matmul %682, %684, %cst_879 {dimension_numbers = #tpu.dot_dimension_numbers<[1], [0], [0], [1], [0, 0, 1, 1], [], []>} : vector<4x16xf32>, vector<16x8xf32>, vector<4x8xf32> -> vector<4x8xf32>
    %686 = arith.addf %680, %685 : vector<4x8xf32>
    %c2_880 = arith.constant 2 : index
    %c0_881 = arith.constant 0 : index
    %c0_882 = arith.constant 0 : index
    %687 = vector.load %arg7[%c2_880, %c0_881, %c0_882] : memref<6x6x16xf32, #tpu.memory_space<vmem>>, vector<1x4x16xf32>
    %688 = vector.shape_cast %687 : vector<1x4x16xf32> to vector<4x16xf32>
    %c1_883 = arith.constant 1 : index
    %c0_884 = arith.constant 0 : index
    %c0_885 = arith.constant 0 : index
    %c0_886 = arith.constant 0 : index
    %689 = vector.load %arg4[%c1_883, %c0_884, %c0_885, %c0_886] : memref<3x3x16x8xf32, #tpu.memory_space<vmem>>, vector<1x1x16x8xf32>
    %690 = vector.shape_cast %689 : vector<1x1x16x8xf32> to vector<16x8xf32>
    %cst_887 = arith.constant dense<0.000000e+00> : vector<4x8xf32>
    %691 = tpu.matmul %688, %690, %cst_887 {dimension_numbers = #tpu.dot_dimension_numbers<[1], [0], [0], [1], [0, 0, 1, 1], [], []>} : vector<4x16xf32>, vector<16x8xf32>, vector<4x8xf32> -> vector<4x8xf32>
    %692 = arith.addf %686, %691 : vector<4x8xf32>
    %c2_888 = arith.constant 2 : index
    %c1_889 = arith.constant 1 : index
    %c0_890 = arith.constant 0 : index
    %693 = vector.load %arg7[%c2_888, %c1_889, %c0_890] : memref<6x6x16xf32, #tpu.memory_space<vmem>>, vector<1x4x16xf32>
    %694 = vector.shape_cast %693 : vector<1x4x16xf32> to vector<4x16xf32>
    %c1_891 = arith.constant 1 : index
    %c1_892 = arith.constant 1 : index
    %c0_893 = arith.constant 0 : index
    %c0_894 = arith.constant 0 : index
    %695 = vector.load %arg4[%c1_891, %c1_892, %c0_893, %c0_894] : memref<3x3x16x8xf32, #tpu.memory_space<vmem>>, vector<1x1x16x8xf32>
    %696 = vector.shape_cast %695 : vector<1x1x16x8xf32> to vector<16x8xf32>
    %cst_895 = arith.constant dense<0.000000e+00> : vector<4x8xf32>
    %697 = tpu.matmul %694, %696, %cst_895 {dimension_numbers = #tpu.dot_dimension_numbers<[1], [0], [0], [1], [0, 0, 1, 1], [], []>} : vector<4x16xf32>, vector<16x8xf32>, vector<4x8xf32> -> vector<4x8xf32>
    %698 = arith.addf %692, %697 : vector<4x8xf32>
    %c2_896 = arith.constant 2 : index
    %c2_897 = arith.constant 2 : index
    %c0_898 = arith.constant 0 : index
    %699 = vector.load %arg7[%c2_896, %c2_897, %c0_898] : memref<6x6x16xf32, #tpu.memory_space<vmem>>, vector<1x4x16xf32>
    %700 = vector.shape_cast %699 : vector<1x4x16xf32> to vector<4x16xf32>
    %c1_899 = arith.constant 1 : index
    %c2_900 = arith.constant 2 : index
    %c0_901 = arith.constant 0 : index
    %c0_902 = arith.constant 0 : index
    %701 = vector.load %arg4[%c1_899, %c2_900, %c0_901, %c0_902] : memref<3x3x16x8xf32, #tpu.memory_space<vmem>>, vector<1x1x16x8xf32>
    %702 = vector.shape_cast %701 : vector<1x1x16x8xf32> to vector<16x8xf32>
    %cst_903 = arith.constant dense<0.000000e+00> : vector<4x8xf32>
    %703 = tpu.matmul %700, %702, %cst_903 {dimension_numbers = #tpu.dot_dimension_numbers<[1], [0], [0], [1], [0, 0, 1, 1], [], []>} : vector<4x16xf32>, vector<16x8xf32>, vector<4x8xf32> -> vector<4x8xf32>
    %704 = arith.addf %698, %703 : vector<4x8xf32>
    %c3_904 = arith.constant 3 : index
    %c0_905 = arith.constant 0 : index
    %c0_906 = arith.constant 0 : index
    %705 = vector.load %arg7[%c3_904, %c0_905, %c0_906] : memref<6x6x16xf32, #tpu.memory_space<vmem>>, vector<1x4x16xf32>
    %706 = vector.shape_cast %705 : vector<1x4x16xf32> to vector<4x16xf32>
    %c2_907 = arith.constant 2 : index
    %c0_908 = arith.constant 0 : index
    %c0_909 = arith.constant 0 : index
    %c0_910 = arith.constant 0 : index
    %707 = vector.load %arg4[%c2_907, %c0_908, %c0_909, %c0_910] : memref<3x3x16x8xf32, #tpu.memory_space<vmem>>, vector<1x1x16x8xf32>
    %708 = vector.shape_cast %707 : vector<1x1x16x8xf32> to vector<16x8xf32>
    %cst_911 = arith.constant dense<0.000000e+00> : vector<4x8xf32>
    %709 = tpu.matmul %706, %708, %cst_911 {dimension_numbers = #tpu.dot_dimension_numbers<[1], [0], [0], [1], [0, 0, 1, 1], [], []>} : vector<4x16xf32>, vector<16x8xf32>, vector<4x8xf32> -> vector<4x8xf32>
    %710 = arith.addf %704, %709 : vector<4x8xf32>
    %c3_912 = arith.constant 3 : index
    %c1_913 = arith.constant 1 : index
    %c0_914 = arith.constant 0 : index
    %711 = vector.load %arg7[%c3_912, %c1_913, %c0_914] : memref<6x6x16xf32, #tpu.memory_space<vmem>>, vector<1x4x16xf32>
    %712 = vector.shape_cast %711 : vector<1x4x16xf32> to vector<4x16xf32>
    %c2_915 = arith.constant 2 : index
    %c1_916 = arith.constant 1 : index
    %c0_917 = arith.constant 0 : index
    %c0_918 = arith.constant 0 : index
    %713 = vector.load %arg4[%c2_915, %c1_916, %c0_917, %c0_918] : memref<3x3x16x8xf32, #tpu.memory_space<vmem>>, vector<1x1x16x8xf32>
    %714 = vector.shape_cast %713 : vector<1x1x16x8xf32> to vector<16x8xf32>
    %cst_919 = arith.constant dense<0.000000e+00> : vector<4x8xf32>
    %715 = tpu.matmul %712, %714, %cst_919 {dimension_numbers = #tpu.dot_dimension_numbers<[1], [0], [0], [1], [0, 0, 1, 1], [], []>} : vector<4x16xf32>, vector<16x8xf32>, vector<4x8xf32> -> vector<4x8xf32>
    %716 = arith.addf %710, %715 : vector<4x8xf32>
    %c3_920 = arith.constant 3 : index
    %c2_921 = arith.constant 2 : index
    %c0_922 = arith.constant 0 : index
    %717 = vector.load %arg7[%c3_920, %c2_921, %c0_922] : memref<6x6x16xf32, #tpu.memory_space<vmem>>, vector<1x4x16xf32>
    %718 = vector.shape_cast %717 : vector<1x4x16xf32> to vector<4x16xf32>
    %c2_923 = arith.constant 2 : index
    %c2_924 = arith.constant 2 : index
    %c0_925 = arith.constant 0 : index
    %c0_926 = arith.constant 0 : index
    %719 = vector.load %arg4[%c2_923, %c2_924, %c0_925, %c0_926] : memref<3x3x16x8xf32, #tpu.memory_space<vmem>>, vector<1x1x16x8xf32>
    %720 = vector.shape_cast %719 : vector<1x1x16x8xf32> to vector<16x8xf32>
    %cst_927 = arith.constant dense<0.000000e+00> : vector<4x8xf32>
    %721 = tpu.matmul %718, %720, %cst_927 {dimension_numbers = #tpu.dot_dimension_numbers<[1], [0], [0], [1], [0, 0, 1, 1], [], []>} : vector<4x16xf32>, vector<16x8xf32>, vector<4x8xf32> -> vector<4x8xf32>
    %722 = arith.addf %716, %721 : vector<4x8xf32>
    %c0_928 = arith.constant 0 : index
    %c1_929 = arith.constant 1 : index
    %c0_930 = arith.constant 0 : index
    %c0_931 = arith.constant 0 : index
    %723 = vector.load %arg5[%c0_928, %c1_929, %c0_930, %c0_931] : memref<1x4x4x8xf32, #tpu.memory_space<vmem>>, vector<1x1x4x8xf32>
    %724 = vector.shape_cast %723 : vector<1x1x4x8xf32> to vector<4x8xf32>
    %725 = vector.shape_cast %722 : vector<4x8xf32> to vector<1x1x4x8xf32>
    tpu.vector_store %arg5[%c0_928, %c1_929, %c0_930, %c0_931], %725 {strides = array<i32>} : memref<1x4x4x8xf32, #tpu.memory_space<vmem>>, vector<1x1x4x8xf32>,
    %c2_932 = arith.constant 2 : index
    %c0_933 = arith.constant 0 : index
    %c0_934 = arith.constant 0 : index
    %726 = vector.load %arg7[%c2_932, %c0_933, %c0_934] : memref<6x6x16xf32, #tpu.memory_space<vmem>>, vector<1x4x16xf32>
    %727 = vector.shape_cast %726 : vector<1x4x16xf32> to vector<4x16xf32>
    %c0_935 = arith.constant 0 : index
    %c0_936 = arith.constant 0 : index
    %c0_937 = arith.constant 0 : index
    %c0_938 = arith.constant 0 : index
    %728 = vector.load %arg4[%c0_935, %c0_936, %c0_937, %c0_938] : memref<3x3x16x8xf32, #tpu.memory_space<vmem>>, vector<1x1x16x8xf32>
    %729 = vector.shape_cast %728 : vector<1x1x16x8xf32> to vector<16x8xf32>
    %cst_939 = arith.constant dense<0.000000e+00> : vector<4x8xf32>
    %730 = tpu.matmul %727, %729, %cst_939 {dimension_numbers = #tpu.dot_dimension_numbers<[1], [0], [0], [1], [0, 0, 1, 1], [], []>} : vector<4x16xf32>, vector<16x8xf32>, vector<4x8xf32> -> vector<4x8xf32>
    %c2_940 = arith.constant 2 : index
    %c1_941 = arith.constant 1 : index
    %c0_942 = arith.constant 0 : index
    %731 = vector.load %arg7[%c2_940, %c1_941, %c0_942] : memref<6x6x16xf32, #tpu.memory_space<vmem>>, vector<1x4x16xf32>
    %732 = vector.shape_cast %731 : vector<1x4x16xf32> to vector<4x16xf32>
    %c0_943 = arith.constant 0 : index
    %c1_944 = arith.constant 1 : index
    %c0_945 = arith.constant 0 : index
    %c0_946 = arith.constant 0 : index
    %733 = vector.load %arg4[%c0_943, %c1_944, %c0_945, %c0_946] : memref<3x3x16x8xf32, #tpu.memory_space<vmem>>, vector<1x1x16x8xf32>
    %734 = vector.shape_cast %733 : vector<1x1x16x8xf32> to vector<16x8xf32>
    %cst_947 = arith.constant dense<0.000000e+00> : vector<4x8xf32>
    %735 = tpu.matmul %732, %734, %cst_947 {dimension_numbers = #tpu.dot_dimension_numbers<[1], [0], [0], [1], [0, 0, 1, 1], [], []>} : vector<4x16xf32>, vector<16x8xf32>, vector<4x8xf32> -> vector<4x8xf32>
    %736 = arith.addf %730, %735 : vector<4x8xf32>
    %c2_948 = arith.constant 2 : index
    %c2_949 = arith.constant 2 : index
    %c0_950 = arith.constant 0 : index
    %737 = vector.load %arg7[%c2_948, %c2_949, %c0_950] : memref<6x6x16xf32, #tpu.memory_space<vmem>>, vector<1x4x16xf32>
    %738 = vector.shape_cast %737 : vector<1x4x16xf32> to vector<4x16xf32>
    %c0_951 = arith.constant 0 : index
    %c2_952 = arith.constant 2 : index
    %c0_953 = arith.constant 0 : index
    %c0_954 = arith.constant 0 : index
    %739 = vector.load %arg4[%c0_951, %c2_952, %c0_953, %c0_954] : memref<3x3x16x8xf32, #tpu.memory_space<vmem>>, vector<1x1x16x8xf32>
    %740 = vector.shape_cast %739 : vector<1x1x16x8xf32> to vector<16x8xf32>
    %cst_955 = arith.constant dense<0.000000e+00> : vector<4x8xf32>
    %741 = tpu.matmul %738, %740, %cst_955 {dimension_numbers = #tpu.dot_dimension_numbers<[1], [0], [0], [1], [0, 0, 1, 1], [], []>} : vector<4x16xf32>, vector<16x8xf32>, vector<4x8xf32> -> vector<4x8xf32>
    %742 = arith.addf %736, %741 : vector<4x8xf32>
    %c3_956 = arith.constant 3 : index
    %c0_957 = arith.constant 0 : index
    %c0_958 = arith.constant 0 : index
    %743 = vector.load %arg7[%c3_956, %c0_957, %c0_958] : memref<6x6x16xf32, #tpu.memory_space<vmem>>, vector<1x4x16xf32>
    %744 = vector.shape_cast %743 : vector<1x4x16xf32> to vector<4x16xf32>
    %c1_959 = arith.constant 1 : index
    %c0_960 = arith.constant 0 : index
    %c0_961 = arith.constant 0 : index
    %c0_962 = arith.constant 0 : index
    %745 = vector.load %arg4[%c1_959, %c0_960, %c0_961, %c0_962] : memref<3x3x16x8xf32, #tpu.memory_space<vmem>>, vector<1x1x16x8xf32>
    %746 = vector.shape_cast %745 : vector<1x1x16x8xf32> to vector<16x8xf32>
    %cst_963 = arith.constant dense<0.000000e+00> : vector<4x8xf32>
    %747 = tpu.matmul %744, %746, %cst_963 {dimension_numbers = #tpu.dot_dimension_numbers<[1], [0], [0], [1], [0, 0, 1, 1], [], []>} : vector<4x16xf32>, vector<16x8xf32>, vector<4x8xf32> -> vector<4x8xf32>
    %748 = arith.addf %742, %747 : vector<4x8xf32>
    %c3_964 = arith.constant 3 : index
    %c1_965 = arith.constant 1 : index
    %c0_966 = arith.constant 0 : index
    %749 = vector.load %arg7[%c3_964, %c1_965, %c0_966] : memref<6x6x16xf32, #tpu.memory_space<vmem>>, vector<1x4x16xf32>
    %750 = vector.shape_cast %749 : vector<1x4x16xf32> to vector<4x16xf32>
    %c1_967 = arith.constant 1 : index
    %c1_968 = arith.constant 1 : index
    %c0_969 = arith.constant 0 : index
    %c0_970 = arith.constant 0 : index
    %751 = vector.load %arg4[%c1_967, %c1_968, %c0_969, %c0_970] : memref<3x3x16x8xf32, #tpu.memory_space<vmem>>, vector<1x1x16x8xf32>
    %752 = vector.shape_cast %751 : vector<1x1x16x8xf32> to vector<16x8xf32>
    %cst_971 = arith.constant dense<0.000000e+00> : vector<4x8xf32>
    %753 = tpu.matmul %750, %752, %cst_971 {dimension_numbers = #tpu.dot_dimension_numbers<[1], [0], [0], [1], [0, 0, 1, 1], [], []>} : vector<4x16xf32>, vector<16x8xf32>, vector<4x8xf32> -> vector<4x8xf32>
    %754 = arith.addf %748, %753 : vector<4x8xf32>
    %c3_972 = arith.constant 3 : index
    %c2_973 = arith.constant 2 : index
    %c0_974 = arith.constant 0 : index
    %755 = vector.load %arg7[%c3_972, %c2_973, %c0_974] : memref<6x6x16xf32, #tpu.memory_space<vmem>>, vector<1x4x16xf32>
    %756 = vector.shape_cast %755 : vector<1x4x16xf32> to vector<4x16xf32>
    %c1_975 = arith.constant 1 : index
    %c2_976 = arith.constant 2 : index
    %c0_977 = arith.constant 0 : index
    %c0_978 = arith.constant 0 : index
    %757 = vector.load %arg4[%c1_975, %c2_976, %c0_977, %c0_978] : memref<3x3x16x8xf32, #tpu.memory_space<vmem>>, vector<1x1x16x8xf32>
    %758 = vector.shape_cast %757 : vector<1x1x16x8xf32> to vector<16x8xf32>
    %cst_979 = arith.constant dense<0.000000e+00> : vector<4x8xf32>
    %759 = tpu.matmul %756, %758, %cst_979 {dimension_numbers = #tpu.dot_dimension_numbers<[1], [0], [0], [1], [0, 0, 1, 1], [], []>} : vector<4x16xf32>, vector<16x8xf32>, vector<4x8xf32> -> vector<4x8xf32>
    %760 = arith.addf %754, %759 : vector<4x8xf32>
    %c4_980 = arith.constant 4 : index
    %c0_981 = arith.constant 0 : index
    %c0_982 = arith.constant 0 : index
    %761 = vector.load %arg7[%c4_980, %c0_981, %c0_982] : memref<6x6x16xf32, #tpu.memory_space<vmem>>, vector<1x4x16xf32>
    %762 = vector.shape_cast %761 : vector<1x4x16xf32> to vector<4x16xf32>
    %c2_983 = arith.constant 2 : index
    %c0_984 = arith.constant 0 : index
    %c0_985 = arith.constant 0 : index
    %c0_986 = arith.constant 0 : index
    %763 = vector.load %arg4[%c2_983, %c0_984, %c0_985, %c0_986] : memref<3x3x16x8xf32, #tpu.memory_space<vmem>>, vector<1x1x16x8xf32>
    %764 = vector.shape_cast %763 : vector<1x1x16x8xf32> to vector<16x8xf32>
    %cst_987 = arith.constant dense<0.000000e+00> : vector<4x8xf32>
    %765 = tpu.matmul %762, %764, %cst_987 {dimension_numbers = #tpu.dot_dimension_numbers<[1], [0], [0], [1], [0, 0, 1, 1], [], []>} : vector<4x16xf32>, vector<16x8xf32>, vector<4x8xf32> -> vector<4x8xf32>
    %766 = arith.addf %760, %765 : vector<4x8xf32>
    %c4_988 = arith.constant 4 : index
    %c1_989 = arith.constant 1 : index
    %c0_990 = arith.constant 0 : index
    %767 = vector.load %arg7[%c4_988, %c1_989, %c0_990] : memref<6x6x16xf32, #tpu.memory_space<vmem>>, vector<1x4x16xf32>
    %768 = vector.shape_cast %767 : vector<1x4x16xf32> to vector<4x16xf32>
    %c2_991 = arith.constant 2 : index
    %c1_992 = arith.constant 1 : index
    %c0_993 = arith.constant 0 : index
    %c0_994 = arith.constant 0 : index
    %769 = vector.load %arg4[%c2_991, %c1_992, %c0_993, %c0_994] : memref<3x3x16x8xf32, #tpu.memory_space<vmem>>, vector<1x1x16x8xf32>
    %770 = vector.shape_cast %769 : vector<1x1x16x8xf32> to vector<16x8xf32>
    %cst_995 = arith.constant dense<0.000000e+00> : vector<4x8xf32>
    %771 = tpu.matmul %768, %770, %cst_995 {dimension_numbers = #tpu.dot_dimension_numbers<[1], [0], [0], [1], [0, 0, 1, 1], [], []>} : vector<4x16xf32>, vector<16x8xf32>, vector<4x8xf32> -> vector<4x8xf32>
    %772 = arith.addf %766, %771 : vector<4x8xf32>
    %c4_996 = arith.constant 4 : index
    %c2_997 = arith.constant 2 : index
    %c0_998 = arith.constant 0 : index
    %773 = vector.load %arg7[%c4_996, %c2_997, %c0_998] : memref<6x6x16xf32, #tpu.memory_space<vmem>>, vector<1x4x16xf32>
    %774 = vector.shape_cast %773 : vector<1x4x16xf32> to vector<4x16xf32>
    %c2_999 = arith.constant 2 : index
    %c2_1000 = arith.constant 2 : index
    %c0_1001 = arith.constant 0 : index
    %c0_1002 = arith.constant 0 : index
    %775 = vector.load %arg4[%c2_999, %c2_1000, %c0_1001, %c0_1002] : memref<3x3x16x8xf32, #tpu.memory_space<vmem>>, vector<1x1x16x8xf32>
    %776 = vector.shape_cast %775 : vector<1x1x16x8xf32> to vector<16x8xf32>
    %cst_1003 = arith.constant dense<0.000000e+00> : vector<4x8xf32>
    %777 = tpu.matmul %774, %776, %cst_1003 {dimension_numbers = #tpu.dot_dimension_numbers<[1], [0], [0], [1], [0, 0, 1, 1], [], []>} : vector<4x16xf32>, vector<16x8xf32>, vector<4x8xf32> -> vector<4x8xf32>
    %778 = arith.addf %772, %777 : vector<4x8xf32>
    %c0_1004 = arith.constant 0 : index
    %c2_1005 = arith.constant 2 : index
    %c0_1006 = arith.constant 0 : index
    %c0_1007 = arith.constant 0 : index
    %779 = vector.load %arg5[%c0_1004, %c2_1005, %c0_1006, %c0_1007] : memref<1x4x4x8xf32, #tpu.memory_space<vmem>>, vector<1x1x4x8xf32>
    %780 = vector.shape_cast %779 : vector<1x1x4x8xf32> to vector<4x8xf32>
    %781 = vector.shape_cast %778 : vector<4x8xf32> to vector<1x1x4x8xf32>
    tpu.vector_store %arg5[%c0_1004, %c2_1005, %c0_1006, %c0_1007], %781 {strides = array<i32>} : memref<1x4x4x8xf32, #tpu.memory_space<vmem>>, vector<1x1x4x8xf32>,
    %c3_1008 = arith.constant 3 : index
    %c0_1009 = arith.constant 0 : index
    %c0_1010 = arith.constant 0 : index
    %782 = vector.load %arg7[%c3_1008, %c0_1009, %c0_1010] : memref<6x6x16xf32, #tpu.memory_space<vmem>>, vector<1x4x16xf32>
    %783 = vector.shape_cast %782 : vector<1x4x16xf32> to vector<4x16xf32>
    %c0_1011 = arith.constant 0 : index
    %c0_1012 = arith.constant 0 : index
    %c0_1013 = arith.constant 0 : index
    %c0_1014 = arith.constant 0 : index
    %784 = vector.load %arg4[%c0_1011, %c0_1012, %c0_1013, %c0_1014] : memref<3x3x16x8xf32, #tpu.memory_space<vmem>>, vector<1x1x16x8xf32>
    %785 = vector.shape_cast %784 : vector<1x1x16x8xf32> to vector<16x8xf32>
    %cst_1015 = arith.constant dense<0.000000e+00> : vector<4x8xf32>
    %786 = tpu.matmul %783, %785, %cst_1015 {dimension_numbers = #tpu.dot_dimension_numbers<[1], [0], [0], [1], [0, 0, 1, 1], [], []>} : vector<4x16xf32>, vector<16x8xf32>, vector<4x8xf32> -> vector<4x8xf32>
    %c3_1016 = arith.constant 3 : index
    %c1_1017 = arith.constant 1 : index
    %c0_1018 = arith.constant 0 : index
    %787 = vector.load %arg7[%c3_1016, %c1_1017, %c0_1018] : memref<6x6x16xf32, #tpu.memory_space<vmem>>, vector<1x4x16xf32>
    %788 = vector.shape_cast %787 : vector<1x4x16xf32> to vector<4x16xf32>
    %c0_1019 = arith.constant 0 : index
    %c1_1020 = arith.constant 1 : index
    %c0_1021 = arith.constant 0 : index
    %c0_1022 = arith.constant 0 : index
    %789 = vector.load %arg4[%c0_1019, %c1_1020, %c0_1021, %c0_1022] : memref<3x3x16x8xf32, #tpu.memory_space<vmem>>, vector<1x1x16x8xf32>
    %790 = vector.shape_cast %789 : vector<1x1x16x8xf32> to vector<16x8xf32>
    %cst_1023 = arith.constant dense<0.000000e+00> : vector<4x8xf32>
    %791 = tpu.matmul %788, %790, %cst_1023 {dimension_numbers = #tpu.dot_dimension_numbers<[1], [0], [0], [1], [0, 0, 1, 1], [], []>} : vector<4x16xf32>, vector<16x8xf32>, vector<4x8xf32> -> vector<4x8xf32>
    %792 = arith.addf %786, %791 : vector<4x8xf32>
    %c3_1024 = arith.constant 3 : index
    %c2_1025 = arith.constant 2 : index
    %c0_1026 = arith.constant 0 : index
    %793 = vector.load %arg7[%c3_1024, %c2_1025, %c0_1026] : memref<6x6x16xf32, #tpu.memory_space<vmem>>, vector<1x4x16xf32>
    %794 = vector.shape_cast %793 : vector<1x4x16xf32> to vector<4x16xf32>
    %c0_1027 = arith.constant 0 : index
    %c2_1028 = arith.constant 2 : index
    %c0_1029 = arith.constant 0 : index
    %c0_1030 = arith.constant 0 : index
    %795 = vector.load %arg4[%c0_1027, %c2_1028, %c0_1029, %c0_1030] : memref<3x3x16x8xf32, #tpu.memory_space<vmem>>, vector<1x1x16x8xf32>
    %796 = vector.shape_cast %795 : vector<1x1x16x8xf32> to vector<16x8xf32>
    %cst_1031 = arith.constant dense<0.000000e+00> : vector<4x8xf32>
    %797 = tpu.matmul %794, %796, %cst_1031 {dimension_numbers = #tpu.dot_dimension_numbers<[1], [0], [0], [1], [0, 0, 1, 1], [], []>} : vector<4x16xf32>, vector<16x8xf32>, vector<4x8xf32> -> vector<4x8xf32>
    %798 = arith.addf %792, %797 : vector<4x8xf32>
    %c4_1032 = arith.constant 4 : index
    %c0_1033 = arith.constant 0 : index
    %c0_1034 = arith.constant 0 : index
    %799 = vector.load %arg7[%c4_1032, %c0_1033, %c0_1034] : memref<6x6x16xf32, #tpu.memory_space<vmem>>, vector<1x4x16xf32>
    %800 = vector.shape_cast %799 : vector<1x4x16xf32> to vector<4x16xf32>
    %c1_1035 = arith.constant 1 : index
    %c0_1036 = arith.constant 0 : index
    %c0_1037 = arith.constant 0 : index
    %c0_1038 = arith.constant 0 : index
    %801 = vector.load %arg4[%c1_1035, %c0_1036, %c0_1037, %c0_1038] : memref<3x3x16x8xf32, #tpu.memory_space<vmem>>, vector<1x1x16x8xf32>
    %802 = vector.shape_cast %801 : vector<1x1x16x8xf32> to vector<16x8xf32>
    %cst_1039 = arith.constant dense<0.000000e+00> : vector<4x8xf32>
    %803 = tpu.matmul %800, %802, %cst_1039 {dimension_numbers = #tpu.dot_dimension_numbers<[1], [0], [0], [1], [0, 0, 1, 1], [], []>} : vector<4x16xf32>, vector<16x8xf32>, vector<4x8xf32> -> vector<4x8xf32>
    %804 = arith.addf %798, %803 : vector<4x8xf32>
    %c4_1040 = arith.constant 4 : index
    %c1_1041 = arith.constant 1 : index
    %c0_1042 = arith.constant 0 : index
    %805 = vector.load %arg7[%c4_1040, %c1_1041, %c0_1042] : memref<6x6x16xf32, #tpu.memory_space<vmem>>, vector<1x4x16xf32>
    %806 = vector.shape_cast %805 : vector<1x4x16xf32> to vector<4x16xf32>
    %c1_1043 = arith.constant 1 : index
    %c1_1044 = arith.constant 1 : index
    %c0_1045 = arith.constant 0 : index
    %c0_1046 = arith.constant 0 : index
    %807 = vector.load %arg4[%c1_1043, %c1_1044, %c0_1045, %c0_1046] : memref<3x3x16x8xf32, #tpu.memory_space<vmem>>, vector<1x1x16x8xf32>
    %808 = vector.shape_cast %807 : vector<1x1x16x8xf32> to vector<16x8xf32>
    %cst_1047 = arith.constant dense<0.000000e+00> : vector<4x8xf32>
    %809 = tpu.matmul %806, %808, %cst_1047 {dimension_numbers = #tpu.dot_dimension_numbers<[1], [0], [0], [1], [0, 0, 1, 1], [], []>} : vector<4x16xf32>, vector<16x8xf32>, vector<4x8xf32> -> vector<4x8xf32>
    %810 = arith.addf %804, %809 : vector<4x8xf32>
    %c4_1048 = arith.constant 4 : index
    %c2_1049 = arith.constant 2 : index
    %c0_1050 = arith.constant 0 : index
    %811 = vector.load %arg7[%c4_1048, %c2_1049, %c0_1050] : memref<6x6x16xf32, #tpu.memory_space<vmem>>, vector<1x4x16xf32>
    %812 = vector.shape_cast %811 : vector<1x4x16xf32> to vector<4x16xf32>
    %c1_1051 = arith.constant 1 : index
    %c2_1052 = arith.constant 2 : index
    %c0_1053 = arith.constant 0 : index
    %c0_1054 = arith.constant 0 : index
    %813 = vector.load %arg4[%c1_1051, %c2_1052, %c0_1053, %c0_1054] : memref<3x3x16x8xf32, #tpu.memory_space<vmem>>, vector<1x1x16x8xf32>
    %814 = vector.shape_cast %813 : vector<1x1x16x8xf32> to vector<16x8xf32>
    %cst_1055 = arith.constant dense<0.000000e+00> : vector<4x8xf32>
    %815 = tpu.matmul %812, %814, %cst_1055 {dimension_numbers = #tpu.dot_dimension_numbers<[1], [0], [0], [1], [0, 0, 1, 1], [], []>} : vector<4x16xf32>, vector<16x8xf32>, vector<4x8xf32> -> vector<4x8xf32>
    %816 = arith.addf %810, %815 : vector<4x8xf32>
    %c5_1056 = arith.constant 5 : index
    %c0_1057 = arith.constant 0 : index
    %c0_1058 = arith.constant 0 : index
    %817 = vector.load %arg7[%c5_1056, %c0_1057, %c0_1058] : memref<6x6x16xf32, #tpu.memory_space<vmem>>, vector<1x4x16xf32>
    %818 = vector.shape_cast %817 : vector<1x4x16xf32> to vector<4x16xf32>
    %c2_1059 = arith.constant 2 : index
    %c0_1060 = arith.constant 0 : index
    %c0_1061 = arith.constant 0 : index
    %c0_1062 = arith.constant 0 : index
    %819 = vector.load %arg4[%c2_1059, %c0_1060, %c0_1061, %c0_1062] : memref<3x3x16x8xf32, #tpu.memory_space<vmem>>, vector<1x1x16x8xf32>
    %820 = vector.shape_cast %819 : vector<1x1x16x8xf32> to vector<16x8xf32>
    %cst_1063 = arith.constant dense<0.000000e+00> : vector<4x8xf32>
    %821 = tpu.matmul %818, %820, %cst_1063 {dimension_numbers = #tpu.dot_dimension_numbers<[1], [0], [0], [1], [0, 0, 1, 1], [], []>} : vector<4x16xf32>, vector<16x8xf32>, vector<4x8xf32> -> vector<4x8xf32>
    %822 = arith.addf %816, %821 : vector<4x8xf32>
    %c5_1064 = arith.constant 5 : index
    %c1_1065 = arith.constant 1 : index
    %c0_1066 = arith.constant 0 : index
    %823 = vector.load %arg7[%c5_1064, %c1_1065, %c0_1066] : memref<6x6x16xf32, #tpu.memory_space<vmem>>, vector<1x4x16xf32>
    %824 = vector.shape_cast %823 : vector<1x4x16xf32> to vector<4x16xf32>
    %c2_1067 = arith.constant 2 : index
    %c1_1068 = arith.constant 1 : index
    %c0_1069 = arith.constant 0 : index
    %c0_1070 = arith.constant 0 : index
    %825 = vector.load %arg4[%c2_1067, %c1_1068, %c0_1069, %c0_1070] : memref<3x3x16x8xf32, #tpu.memory_space<vmem>>, vector<1x1x16x8xf32>
    %826 = vector.shape_cast %825 : vector<1x1x16x8xf32> to vector<16x8xf32>
    %cst_1071 = arith.constant dense<0.000000e+00> : vector<4x8xf32>
    %827 = tpu.matmul %824, %826, %cst_1071 {dimension_numbers = #tpu.dot_dimension_numbers<[1], [0], [0], [1], [0, 0, 1, 1], [], []>} : vector<4x16xf32>, vector<16x8xf32>, vector<4x8xf32> -> vector<4x8xf32>
    %828 = arith.addf %822, %827 : vector<4x8xf32>
    %c5_1072 = arith.constant 5 : index
    %c2_1073 = arith.constant 2 : index
    %c0_1074 = arith.constant 0 : index
    %829 = vector.load %arg7[%c5_1072, %c2_1073, %c0_1074] : memref<6x6x16xf32, #tpu.memory_space<vmem>>, vector<1x4x16xf32>
    %830 = vector.shape_cast %829 : vector<1x4x16xf32> to vector<4x16xf32>
    %c2_1075 = arith.constant 2 : index
    %c2_1076 = arith.constant 2 : index
    %c0_1077 = arith.constant 0 : index
    %c0_1078 = arith.constant 0 : index
    %831 = vector.load %arg4[%c2_1075, %c2_1076, %c0_1077, %c0_1078] : memref<3x3x16x8xf32, #tpu.memory_space<vmem>>, vector<1x1x16x8xf32>
    %832 = vector.shape_cast %831 : vector<1x1x16x8xf32> to vector<16x8xf32>
    %cst_1079 = arith.constant dense<0.000000e+00> : vector<4x8xf32>
    %833 = tpu.matmul %830, %832, %cst_1079 {dimension_numbers = #tpu.dot_dimension_numbers<[1], [0], [0], [1], [0, 0, 1, 1], [], []>} : vector<4x16xf32>, vector<16x8xf32>, vector<4x8xf32> -> vector<4x8xf32>
    %834 = arith.addf %828, %833 : vector<4x8xf32>
    %c0_1080 = arith.constant 0 : index
    %c3_1081 = arith.constant 3 : index
    %c0_1082 = arith.constant 0 : index
    %c0_1083 = arith.constant 0 : index
    %835 = vector.load %arg5[%c0_1080, %c3_1081, %c0_1082, %c0_1083] : memref<1x4x4x8xf32, #tpu.memory_space<vmem>>, vector<1x1x4x8xf32>
    %836 = vector.shape_cast %835 : vector<1x1x4x8xf32> to vector<4x8xf32>
    %837 = vector.shape_cast %834 : vector<4x8xf32> to vector<1x1x4x8xf32>
    tpu.vector_store %arg5[%c0_1080, %c3_1081, %c0_1082, %c0_1083], %837 {strides = array<i32>} : memref<1x4x4x8xf32, #tpu.memory_space<vmem>>, vector<1x1x4x8xf32>,
    return
  }
  func.func @transform_0(%arg0: i32) -> (i32, i32, i32, i32) {
    %c0_i32 = arith.constant 0 : i32
    %c0_i32_0 = arith.constant 0 : i32
    %c0_i32_1 = arith.constant 0 : i32
    %c0_i32_2 = arith.constant 0 : i32
    return %arg0, %c0_i32, %c0_i32_0, %c0_i32_1 : i32, i32, i32, i32
  }
  func.func @transform_1(%arg0: i32) -> (i32, i32, i32, i32) {
    %c0_i32 = arith.constant 0 : i32
    %c0_i32_0 = arith.constant 0 : i32
    %c0_i32_1 = arith.constant 0 : i32
    %c0_i32_2 = arith.constant 0 : i32
    %c0_i32_3 = arith.constant 0 : i32
    return %c0_i32, %c0_i32_0, %c0_i32_1, %c0_i32_2 : i32, i32, i32, i32
  }
  func.func @transform_2(%arg0: i32) -> (i32, i32, i32, i32) {
    %c0_i32 = arith.constant 0 : i32
    %c0_i32_0 = arith.constant 0 : i32
    %c0_i32_1 = arith.constant 0 : i32
    %c0_i32_2 = arith.constant 0 : i32
    %c0_i32_3 = arith.constant 0 : i32
    return %c0_i32, %c0_i32_0, %c0_i32_1, %c0_i32_2 : i32, i32, i32, i32
  }
  func.func @transform_3(%arg0: i32) -> (i32, i32, i32, i32) {
    %c0_i32 = arith.constant 0 : i32
    %c0_i32_0 = arith.constant 0 : i32
    %c0_i32_1 = arith.constant 0 : i32
    %c0_i32_2 = arith.constant 0 : i32
    %c0_i32_3 = arith.constant 0 : i32
    return %c0_i32, %c0_i32_0, %c0_i32_1, %c0_i32_2 : i32, i32, i32, i32
  }
  func.func @transform_4(%arg0: i32) -> (i32, i32, i32, i32) {
    %c0_i32 = arith.constant 0 : i32
    %c0_i32_0 = arith.constant 0 : i32
    %c0_i32_1 = arith.constant 0 : i32
    %c0_i32_2 = arith.constant 0 : i32
    return %arg0, %c0_i32, %c0_i32_0, %c0_i32_1 : i32, i32, i32, i32
  }
}

</mosaic_0001>

<bundles_post_ra>
// kernel: _forward_impl.1
= control target key start
LH: loop header
LB: loop body
LE: loop exit
PB: predicated region body
PF: predicated region fallthrough
CT: control target
= control target key end

     0   :  { %9 = vsyncpa [#allocation5], 0  ;;  %s4665_s0 = inlined_call_operand.vmem [shape: f32[2,9,9,16], index: 0, kind: input, shape index: {}]   ;;  %s4666_s1 = inlined_call_operand.vmem [shape: f32[2,2,16,8], index: 1, kind: input, shape index: {}]   ;;  %s4667_s2 = inlined_call_operand.vmem [shape: f32[3,3,8,16], index: 2, kind: input, shape index: {}]   ;;  %s4668_s3 = inlined_call_operand.vmem [shape: f32[3,3,16,8], index: 3, kind: input, shape index: {}]   ;;  %s4669_s4 = inlined_call_operand.hbm [shape: f32[2,4,4,8], index: 4, kind: output, shape index: {}]  }
   0x1   :  { %11 = vsyncpa [#allocation5 + $0x1], 0  ;;  %s4044_s15 = smov 0   ;;  %s4046_s16 = smov 0  }
   0x2   :  { %s4048_s17 = smov 0   ;;  %s4050_s18 = smov 0  }
   0x3 LB: > { %s4065_s19 = sadd.s32 4294967295, %s4015_s18   ;;  %s3584_s20 = sadd.s32 4294967294, %s4015_s18   ;;  %s4015_s18 = sphi %s4050_s18, %s4675_s18   ;;  %s4011_s17 = sphi %s4048_s17, %s4674_s17   ;;  %s4007_s16 = sphi %s4046_s16, %s4673_s16   ;;  %s4003_s15 = sphi %s4044_s15, %s4672_s15  }
   0x4   : > { %s4069_s21 = sadd.s32 1, %s4015_s18   ;;  %s113_s22 = sadd.s32 1, %s4011_s17 }
   0x5   : > { %s110_s23 = ssub.s32 %s4015_s18, %s4069_s21  ;;  %p123_p0 = scmp.ne.s32.totalorder %s4011_s17, %s4007_s16 }
   0x6   : > { %p111_p1 = scmp.eq.s32.totalorder %s110_s23, 0  ;;  %p124_p2 = scmp.eq.s32.totalorder %s4065_s19, 1 }
   0x7   : > { %p129_p3 = scmp.ne.s32.totalorder %s4007_s16, %s4003_s15  ;;  %p130_p4 = scmp.eq.s32.totalorder %s3584_s20, 1 }
   0x8   : > { %s4080_s24 = scalar_select %p111_p1, %s4011_s17, %s113_s22  }
   0x9   : > { %p4082_p5 = por %p124_p2, %p123_p0  ;;  %p4086_p6 = por %p130_p4, %p129_p3 }
   0xa   : > { %p3587_p7 = scmp.ge.s32.totalorder %s4015_s18, 1  ;;  %p165_p8 = scmp.lt.s32.totalorder %s4015_s18, 3 }
   0xc   : > { %p166_p9 = pnand %p3587_p7, %p165_p8 }
   0xd   : > { %p191_p10 = scmp.lt.s32.totalorder (!%p166_p9), %s4065_s19, 1  ;;  %s188_s8 = sand.u32 (!%p166_p9), 1, %s4007_s16  }
   0xe   : > { %169 = sbr.rel (%p166_p9) target bundleno = 571 (0x23b), region = 36  ;;  %s3588_s9 = sshll.u32 (!%p166_p9), %s188_s8, 4 }
   0xf   : > { %s4621_s10 = scalar_lea.vmem (!%p166_p9), [#allocation4], %s3588_s9  ;;  %s3910_s11 = sshll.u32 (!%p166_p9), %s4065_s19, 4 }
  0x10   : > { %s3518_s14 = scalar_lea.hbm (!%p166_p9), %s4669_s4, %s3910_s11  ;;  %s3519_s20 = sshll.u32 (!%p166_p9), %s4621_s10, 4  ;;  %s3520_s20 = int_to_ptr.vmem [resolvable:$true] %s3519_s20 }
  0x11   : > { %s3521_s22 = sshll.u32 (!%p166_p9), %s3518_s14, 4  ;;  %s3522_s22 = int_to_ptr.hbm [resolvable:$true] %s3521_s22 }
  0x12   : > { %s3967_s23 = sshra.s32 (!%p166_p9), %s3522_s22, 4  ;;  %s3968_s23 = int_to_ptr.hbm [resolvable:$true] %s3967_s23 }
  0x13   : > { %v4095_v0 = vld [vmem:[%s4666_s1 + $0x28] sm:$0xff]  ;;  %v4100_v1 = vld [vmem:[%s4666_s1 + $0x20] sm:$0xff]  ;;  %v4105_v2 = vld [vmem:[%s4666_s1 + $0x38] sm:$0xff]  ;;  %s192_s13 = scalar_select %p191_p10, %s4065_s19, 1  ;;  %vm203_vm0 = vcmask 130048   ;;  %vm310_vm2 = vcmask 64512  }
  0x14   : > { %272 = vmatpush.msra.mxu2 %v4095_v0  ;;  %300 = vmatpush.msra.mxu3 %v4105_v2  ;;  %v4113_v3 = vld [vmem:[%s4666_s1 + $0x18] sm:$0xff]  ;;  %v4118_v4 = vld [vmem:[%s4666_s1 + $0x8] sm:$0xff]  ;;  %v4123_v5 = vld [vmem:[%s4666_s1 + $0x30] sm:$0xff]  ;;  %vm1339_vm11 = vcmask 128000   ;;  %s3507_s19 = scalar_lea.sflag [#allocation5], %s188_s8  ;;  %p3974_p0 = scmp.lt.s32.totalorder %s3968_s23, %s4669_s4 }
  0x15   : > { %221 = vmatpush.msra.mxu0 %v4113_v3  ;;  %244 = vmatpush.msra.mxu1 %v4118_v4  ;;  %v4131_v6 = vld [vmem:[%s4666_s1 + $0x10] sm:$0xff]  ;;  %v4136_v7 = vld [vmem:[%s4666_s1] sm:$0xff]  ;;  %s3911_s27 = smul.u32 144, %s192_s13  ;;  %v4256_v26 = vld [vmem:[%s4667_s2 + $0x8] sm:$0xff] }
  0x16   : > { %273 = vmatpush.msra.mxu2 %v4100_v1  ;;  %301 = vmatpush.msra.mxu3 %v4123_v5  ;;  %v4261_v27 = vld [vmem:[%s4667_s2] sm:$0xff]  ;;  %v4266_v28 = vld [vmem:[%s4667_s2 + $0x10] sm:$0xff]  ;;  %v4274_v29 = vld [vmem:[%s4667_s2 + $0x18] sm:$0xff] }
  0x17   : > { %222 = vmatpush.msra.mxu0 %v4131_v6  ;;  %245 = vmatpush.msra.mxu1 %v4136_v7  ;;  %s4147_s30 = scalar_lea.vmem %s4665_s0, %s3911_s27  ;;  %v4279_v30 = vld [vmem:[%s4667_s2 + $0x20] sm:$0xff]  ;;  %v4284_v31 = vld [vmem:[%s4667_s2 + $0x28] sm:$0xff]  ;;  %v4292_v32 = vld [vmem:[%s4667_s2 + $0x30] sm:$0xff]  ;;  %s3969_s27 = scalar_lea.hbm %s3968_s23, 16 }
  0x18   : > { %385 = vmatpush.msrb.mxu2 %v4095_v0  ;;  %412 = vmatpush.msrb.mxu3 %v4105_v2  ;;  %v3594_v8 = vld [vmem:[%s4147_s30 + $0x10] sm:$0xff]  ;;  %v199_v10 = vld [vmem:[%s4147_s30 + $0x1] sm:$0xff]  ;;  %v4297_v33 = vld [vmem:[%s4667_s2 + $0x38] sm:$0xff]  ;;  %p3970_p11 = scmp.ne.s32.totalorder %s3968_s23, %s3969_s27 }
  0x19   : > { %335 = vmatpush.msrb.mxu0 %v4113_v3  ;;  %358 = vmatpush.msrb.mxu1 %v4118_v4  ;;  %v3598_v9 = vld [vmem:[%s4147_s30 + $0x11] sm:$0xff]  ;;  %v196_v11 = vld [vmem:[%s4147_s30] sm:$0xff] }
  0x1a   : > { %386 = vmatpush.msrb.mxu2 %v4100_v1  ;;  %413 = vmatpush.msrb.mxu3 %v4123_v5  ;;  %v3608_v12 = vld [vmem:[%s4147_s30 + $0x20] sm:$0xff]  ;;  %v3622_v14 = vld [vmem:[%s4147_s30 + $0x30] sm:$0xff]  ;;  %p3971_p12 = pnand %p3970_p11, %p4082_p5 }
  0x1b   : > { %3597 = vmatmul.msk.f32.vlgmr.msra.gmra.mxu2 %vm203_vm0, %v3594_v8  ;;  %3601 = vmatmul.msk.f32.vlgmr.msra.gmra.mxu3 %vm203_vm0, %v3598_v9  ;;  %v3612_v13 = vld [vmem:[%s4147_s30 + $0x21] sm:$0xff]  ;;  %v3626_v15 = vld [vmem:[%s4147_s30 + $0x31] sm:$0xff] }
  0x1c   : > { %3592 = vmatmul.msk.f32.vlgmr.msra.gmra.mxu0 %vm203_vm0, %v199_v10  ;;  %3593 = vmatmul.msk.f32.vlgmr.msra.gmra.mxu1 %vm203_vm0, %v196_v11  ;;  %v3636_v16 = vld [vmem:[%s4147_s30 + $0x40] sm:$0xff]  ;;  %v3650_v18 = vld [vmem:[%s4147_s30 + $0x50] sm:$0xff]  ;;  %p3972_p13 = pneg %p3971_p12 }
  0x1d   : > { %336 = vmatpush.msrb.mxu0 %v4131_v6  ;;  %359 = vmatpush.msrb.mxu1 %v4136_v7  ;;  %v3640_v17 = vld [vmem:[%s4147_s30 + $0x41] sm:$0xff]  ;;  %v3654_v19 = vld [vmem:[%s4147_s30 + $0x51] sm:$0xff] }
  0x1e   : > { %497 = vmatpush.msra.mxu2 %v4095_v0  ;;  %524 = vmatpush.msra.mxu3 %v4105_v2  ;;  %v3664_v20 = vld [vmem:[%s4147_s30 + $0x60] sm:$0xff]  ;;  %v3678_v22 = vld [vmem:[%s4147_s30 + $0x70] sm:$0xff] }
  0x1f   : > { %447 = vmatpush.msra.mxu0 %v4113_v3  ;;  %470 = vmatpush.msra.mxu1 %v4118_v4  ;;  %v3668_v21 = vld [vmem:[%s4147_s30 + $0x61] sm:$0xff]  ;;  %v3682_v23 = vld [vmem:[%s4147_s30 + $0x71] sm:$0xff] }
  0x20   : > { %498 = vmatpush.msra.mxu2 %v4100_v1  ;;  %525 = vmatpush.msra.mxu3 %v4123_v5  ;;  %v3692_v24 = vld [vmem:[%s4147_s30 + $0x80] sm:$0xff] }
  0x21   : > { %448 = vmatpush.msra.mxu0 %v4131_v6  ;;  %471 = vmatpush.msra.mxu1 %v4136_v7  ;;  %v3696_v25 = vld [vmem:[%s4147_s30 + $0x81] sm:$0xff]  ;;  %s3973_s30 = scalar_lea.hbm %s4669_s4, 32 }
  0x22   : > { %v4305_v54 = vld [vmem:[%s4667_s2 + $0x40] sm:$0xff]  ;;  %p3975_p1 = scmp.lt.s32.totalorder %s3973_s30, %s3969_s27 }
  0x23   : > { %3611 = vmatmul.msk.f32.vlgmr.msrb.gmra.mxu2 %vm203_vm0, %v3608_v12  ;;  %3615 = vmatmul.msk.f32.vlgmr.msrb.gmra.mxu3 %vm203_vm0, %v3612_v13 }
  0x24   : > { %3606 = vmatmul.msk.f32.vlgmr.msrb.gmra.mxu0 %vm203_vm0, %v3598_v9  ;;  %3607 = vmatmul.msk.f32.vlgmr.msrb.gmra.mxu1 %vm203_vm0, %v3594_v8  ;;  %p3976_p2 = por %p3975_p1, %p3974_p0 }
  0x25   : > { %609 = vmatpush.msrb.mxu2 %v4095_v0  ;;  %636 = vmatpush.msrb.mxu3 %v4105_v2 }
  0x26   : > { %559 = vmatpush.msrb.mxu0 %v4113_v3  ;;  %582 = vmatpush.msrb.mxu1 %v4118_v4  ;;  %p3977_p3 = pnand %p3976_p2, %p3972_p13 }
  0x27   : > { %610 = vmatpush.msrb.mxu2 %v4100_v1  ;;  %637 = vmatpush.msrb.mxu3 %v4123_v5 }
  0x28   : > { %560 = vmatpush.msrb.mxu0 %v4131_v6  ;;  %583 = vmatpush.msrb.mxu1 %v4136_v7 }
  0x2b   : > { %3625 = vmatmul.msk.f32.vlgmr.msra.gmra.mxu2 %vm203_vm0, %v3622_v14  ;;  %3629 = vmatmul.msk.f32.vlgmr.msra.gmra.mxu3 %vm203_vm0, %v3626_v15 }
  0x2c   : > { %3620 = vmatmul.msk.f32.vlgmr.msra.gmra.mxu0 %vm203_vm0, %v3612_v13  ;;  %3621 = vmatmul.msk.f32.vlgmr.msra.gmra.mxu1 %vm203_vm0, %v3608_v12 }
  0x2d   : > { %721 = vmatpush.msra.mxu2 %v4095_v0  ;;  %748 = vmatpush.msra.mxu3 %v4105_v2 }
  0x2e   : > { %671 = vmatpush.msra.mxu0 %v4113_v3  ;;  %694 = vmatpush.msra.mxu1 %v4118_v4 }
  0x2f   : > { %722 = vmatpush.msra.mxu2 %v4100_v1  ;;  %749 = vmatpush.msra.mxu3 %v4123_v5 }
  0x30   : > { %672 = vmatpush.msra.mxu0 %v4131_v6  ;;  %695 = vmatpush.msra.mxu1 %v4136_v7 }
  0x33   : > { %3639 = vmatmul.msk.f32.vlgmr.msrb.gmra.mxu2 %vm203_vm0, %v3636_v16  ;;  %3643 = vmatmul.msk.f32.vlgmr.msrb.gmra.mxu3 %vm203_vm0, %v3640_v17 }
  0x34   : > { %3634 = vmatmul.msk.f32.vlgmr.msrb.gmra.mxu0 %vm203_vm0, %v3626_v15  ;;  %3635 = vmatmul.msk.f32.vlgmr.msrb.gmra.mxu1 %vm203_vm0, %v3622_v14 }
  0x35   : > { %833 = vmatpush.msrb.mxu2 %v4095_v0  ;;  %860 = vmatpush.msrb.mxu3 %v4105_v2 }
  0x36   : > { %783 = vmatpush.msrb.mxu0 %v4113_v3  ;;  %806 = vmatpush.msrb.mxu1 %v4118_v4 }
  0x37   : > { %834 = vmatpush.msrb.mxu2 %v4100_v1  ;;  %861 = vmatpush.msrb.mxu3 %v4123_v5 }
  0x38   : > { %784 = vmatpush.msrb.mxu0 %v4131_v6  ;;  %807 = vmatpush.msrb.mxu1 %v4136_v7 }
  0x3b   : > { %3653 = vmatmul.msk.f32.vlgmr.msra.gmra.mxu2 %vm203_vm0, %v3650_v18  ;;  %3657 = vmatmul.msk.f32.vlgmr.msra.gmra.mxu3 %vm203_vm0, %v3654_v19 }
  0x3c   : > { %3648 = vmatmul.msk.f32.vlgmr.msra.gmra.mxu0 %vm203_vm0, %v3640_v17  ;;  %3649 = vmatmul.msk.f32.vlgmr.msra.gmra.mxu1 %vm203_vm0, %v3636_v16 }
  0x3d   : > { %945 = vmatpush.msra.mxu2 %v4095_v0  ;;  %972 = vmatpush.msra.mxu3 %v4105_v2 }
  0x3e   : > { %895 = vmatpush.msra.mxu0 %v4113_v3  ;;  %918 = vmatpush.msra.mxu1 %v4118_v4 }
  0x3f   : > { %946 = vmatpush.msra.mxu2 %v4100_v1  ;;  %973 = vmatpush.msra.mxu3 %v4123_v5 }
  0x40   : > { %896 = vmatpush.msra.mxu0 %v4131_v6  ;;  %919 = vmatpush.msra.mxu1 %v4136_v7 }
  0x43   : > { %3667 = vmatmul.msk.f32.vlgmr.msrb.gmra.mxu2 %vm203_vm0, %v3664_v20  ;;  %3671 = vmatmul.msk.f32.vlgmr.msrb.gmra.mxu3 %vm203_vm0, %v3668_v21 }
  0x44   : > { %3662 = vmatmul.msk.f32.vlgmr.msrb.gmra.mxu0 %vm203_vm0, %v3654_v19  ;;  %3663 = vmatmul.msk.f32.vlgmr.msrb.gmra.mxu1 %vm203_vm0, %v3650_v18 }
  0x45   : > { %1057 = vmatpush.msrb.mxu2 %v4095_v0  ;;  %1084 = vmatpush.msrb.mxu3 %v4105_v2 }
  0x46   : > { %1007 = vmatpush.msrb.mxu0 %v4113_v3  ;;  %1030 = vmatpush.msrb.mxu1 %v4118_v4 }
  0x47   : > { %1058 = vmatpush.msrb.mxu2 %v4100_v1  ;;  %1085 = vmatpush.msrb.mxu3 %v4123_v5 }
  0x48   : > { %1008 = vmatpush.msrb.mxu0 %v4131_v6  ;;  %1031 = vmatpush.msrb.mxu1 %v4136_v7 }
  0x4b   : > { %3681 = vmatmul.msk.f32.vlgmr.msra.gmra.mxu2 %vm203_vm0, %v3678_v22  ;;  %3685 = vmatmul.msk.f32.vlgmr.msra.gmra.mxu3 %vm203_vm0, %v3682_v23 }
  0x4c   : > { %3676 = vmatmul.msk.f32.vlgmr.msra.gmra.mxu0 %vm203_vm0, %v3668_v21  ;;  %3677 = vmatmul.msk.f32.vlgmr.msra.gmra.mxu1 %vm203_vm0, %v3664_v20 }
  0x4d   : > { %1119 = vmatpush.msra.mxu0 %v4256_v26  ;;  %1142 = vmatpush.msra.mxu1 %v4261_v27 }
  0x4e   : > { %1168 = vmatpush.msra.mxu2 %v4266_v28  ;;  %1195 = vmatpush.msra.mxu3 %v4274_v29 }
  0x53   : > { %3695 = vmatmul.msk.f32.vlgmr.msrb.gmra.mxu2 %vm203_vm0, %v3692_v24  ;;  %3699 = vmatmul.msk.f32.vlgmr.msrb.gmra.mxu3 %vm203_vm0, %v3696_v25 }
  0x54   : > { %3690 = vmatmul.msk.f32.vlgmr.msrb.gmra.mxu0 %vm203_vm0, %v3682_v23  ;;  %3691 = vmatmul.msk.f32.vlgmr.msrb.gmra.mxu1 %vm203_vm0, %v3678_v22 }
  0x55   : > { %1222 = vmatpush.msrb.mxu0 %v4279_v30  ;;  %1249 = vmatpush.msrb.mxu1 %v4284_v31 }
  0x56   : > { %1276 = vmatpush.msrb.mxu2 %v4292_v32  ;;  %1303 = vmatpush.msrb.mxu3 %v4297_v33 }
  0x99   : > { %v224_v34 = vpop.f32.mrf.mxu0  ;;  %v247_v35 = vpop.f32.mrf.mxu1 }
  0x9a   : > { %v248_v36 = vadd.f32 %v247_v35, %v224_v34 }
  0x9e   : > { %v275_v37 = vpop.f32.mrf.mxu2  ;;  %v303_v38 = vpop.f32.mrf.mxu3 }
  0x9f   : > { %v278_v39 = vadd.f32 %v275_v37, %v248_v36 }
  0xa1   : > { %v306_v40 = vadd.f32 %v303_v38, %v278_v39  ;;  %v338_v41 = vpop.f32.mrf.mxu0  ;;  %v361_v42 = vpop.f32.mrf.mxu1 }
  0xa2   : > { %v362_v44 = vadd.f32 %v361_v42, %v338_v41 }
  0xa3   : > { %vm307_vm1 = vcmp.ge.f32.partialorder %v306_v40, 0.0  ;;  %v308_v43 = vmul.f32 0.2, %v306_v40 }
  0xa5   : > { %v309_v45 = vsel %vm307_vm1, %v306_v40, %v308_v43 }
  0xa6   : > { %311 = vst.msk [vmem:[#allocation2] sm:$0xff] %vm310_vm2, %v309_v45  ;;  %v388_v46 = vpop.f32.mrf.mxu2  ;;  %v415_v47 = vpop.f32.mrf.mxu3 }
  0xa7   : > { %v391_v48 = vadd.f32 %v388_v46, %v362_v44 }
  0xa9   : > { %v418_v49 = vadd.f32 %v415_v47, %v391_v48  ;;  %v450_v50 = vpop.f32.mrf.mxu0  ;;  %v473_v51 = vpop.f32.mrf.mxu1 }
  0xaa   : > { %v474_v53 = vadd.f32 %v473_v51, %v450_v50 }
  0xab   : > { %vm419_vm3 = vcmp.ge.f32.partialorder %v418_v49, 0.0  ;;  %v420_v52 = vmul.f32 0.2, %v418_v49 }
  0xad   : > { %v421_v55 = vsel %vm419_vm3, %v418_v49, %v420_v52  ;;  %v1098_v56 = vld [vmem:[#allocation2 + $0x1] sm:$0x3f] }
  0xae   : > { %v1096_v57 = vld [vmem:[#allocation2] sm:$0x3f]  ;;  %423 = vst.msk [vmem:[#allocation2 + $0x8] sm:$0xff] %vm310_vm2, %v421_v55  ;;  %v500_v59 = vpop.f32.mrf.mxu2  ;;  %3701 = vmatmul.msk.f32.vlgmr.msra.gmra.mxu0 %vm310_vm2, %v1098_v56  ;;  %v527_v60 = vpop.f32.mrf.mxu3 }
  0xaf   : > { %v1147_v58 = vld [vmem:[#allocation2 + $0x2] sm:$0x3f]  ;;  %3702 = vmatmul.msk.f32.vlgmr.msra.gmra.mxu1 %vm310_vm2, %v1096_v57  ;;  %v503_v61 = vadd.f32 %v500_v59, %v474_v53  ;;  %1330 = vmatpush.msra.mxu0 %v4305_v54 }
  0xb0   : > { %3704 = vmatmul.msk.f32.vlgmr.msra.gmra.mxu2 %vm310_vm2, %v1147_v58  ;;  %1363 = vmatpush.msra.mxu1 %v4256_v26 }
  0xb1   : > { %1386 = vmatpush.msra.mxu2 %v4261_v27  ;;  %v530_v62 = vadd.f32 %v527_v60, %v503_v61  ;;  %v562_v63 = vpop.f32.mrf.mxu0  ;;  %v585_v0 = vpop.f32.mrf.mxu1 }
  0xb2   : > { %v586_v2 = vadd.f32 %v585_v0, %v562_v63 }
  0xb3   : > { %vm531_vm4 = vcmp.ge.f32.partialorder %v530_v62, 0.0  ;;  %v532_v1 = vmul.f32 0.2, %v530_v62 }
  0xb5   : > { %v533_v3 = vsel %vm531_vm4, %v530_v62, %v532_v1  ;;  %v1174_v4 = vld [vmem:[#allocation2 + $0x8] sm:$0x3f] }
  0xb6   : > { %v1201_v5 = vld [vmem:[#allocation2 + $0x9] sm:$0x3f]  ;;  %535 = vst.msk [vmem:[#allocation2 + $0x10] sm:$0xff] %vm310_vm2, %v533_v3  ;;  %3706 = vmatmul.msk.f32.vlgmr.msra.gmra.mxu3 %vm310_vm2, %v1174_v4  ;;  %v612_v7 = vpop.f32.mrf.mxu2  ;;  %v639_v8 = vpop.f32.mrf.mxu3 }
  0xb7   : > { %v1228_v6 = vld [vmem:[#allocation2 + $0xa] sm:$0x3f]  ;;  %3708 = vmatmul.msk.f32.vlgmr.msrb.gmra.mxu0 %vm310_vm2, %v1201_v5  ;;  %v615_v9 = vadd.f32 %v612_v7, %v586_v2  ;;  %1411 = vmatpush.msra.mxu3 %v4266_v28 }
  0xb8   : > { %3710 = vmatmul.msk.f32.vlgmr.msrb.gmra.mxu1 %vm310_vm2, %v1228_v6  ;;  %1437 = vmatpush.msrb.mxu0 %v4274_v29  ;;  %v1343_v19 = vld [vmem:[#allocation2 + $0x9] sm:$0x3f] }
  0xb9   : > { %1463 = vmatpush.msrb.mxu1 %v4279_v30  ;;  %v642_v10 = vadd.f32 %v639_v8, %v615_v9  ;;  %v674_v11 = vpop.f32.mrf.mxu0  ;;  %v697_v12 = vpop.f32.mrf.mxu1  ;;  %v1341_v36 = vld [vmem:[#allocation2 + $0x8] sm:$0x3f] }
  0xba   : > { %v698_v14 = vadd.f32 %v697_v12, %v674_v11  ;;  %v1391_v37 = vld [vmem:[#allocation2 + $0xa] sm:$0x3f] }
  0xbb   : > { %vm643_vm5 = vcmp.ge.f32.partialorder %v642_v10, 0.0  ;;  %v644_v13 = vmul.f32 0.2, %v642_v10 }
  0xbd   : > { %v1255_v15 = vld [vmem:[#allocation2 + $0x10] sm:$0x3f]  ;;  %v645_v18 = vsel %vm643_vm5, %v642_v10, %v644_v13 }
  0xbe   : > { %v1282_v16 = vld [vmem:[#allocation2 + $0x11] sm:$0x3f]  ;;  %3712 = vmatmul.msk.f32.vlgmr.msrb.gmra.mxu2 %vm310_vm2, %v1255_v15  ;;  %647 = vst.msk [vmem:[#allocation2 + $0x18] sm:$0xff] %vm310_vm2, %v645_v18  ;;  %v724_v20 = vpop.f32.mrf.mxu2  ;;  %v751_v21 = vpop.f32.mrf.mxu3 }
  0xbf   : > { %v1309_v17 = vld [vmem:[#allocation2 + $0x12] sm:$0x3f]  ;;  %3714 = vmatmul.msk.f32.vlgmr.msrb.gmra.mxu3 %vm310_vm2, %v1282_v16  ;;  %v727_v22 = vadd.f32 %v724_v20, %v698_v14  ;;  %1489 = vmatpush.msrb.mxu2 %v4284_v31 }
  0xc0   : > { %3716 = vmatmul.msk.f32.vlgmr.msra.gmra.mxu0 %vm310_vm2, %v1309_v17  ;;  %3718 = vmatmul.msk.f32.vlgmr.msra.gmra.mxu1 %vm310_vm2, %v1343_v19  ;;  %v1417_v39 = vld [vmem:[#allocation2 + $0x10] sm:$0x3f] }
  0xc1   : > { %1515 = vmatpush.msrb.mxu3 %v4292_v32  ;;  %1541 = vmatpush.msra.mxu0 %v4297_v33  ;;  %v754_v23 = vadd.f32 %v751_v21, %v727_v22  ;;  %v786_v24 = vpop.f32.mrf.mxu0  ;;  %v809_v25 = vpop.f32.mrf.mxu1  ;;  %v1443_v40 = vld [vmem:[#allocation2 + $0x11] sm:$0x3f] }
  0xc2   : > { %1567 = vmatpush.msra.mxu1 %v4305_v54  ;;  %v810_v35 = vadd.f32 %v809_v25, %v786_v24  ;;  %v1469_v49 = vld [vmem:[#allocation2 + $0x12] sm:$0x3f] }
  0xc3   : > { %vm755_vm6 = vcmp.ge.f32.partialorder %v754_v23, 0.0  ;;  %v756_v34 = vmul.f32 0.2, %v754_v23  ;;  %v1580_v59 = vld [vmem:[#allocation2 + $0x11] sm:$0x3f] }
  0xc4   : > { %v1578_v60 = vld [vmem:[#allocation2 + $0x10] sm:$0x3f] }
  0xc5   : > { %v757_v38 = vsel %vm755_vm6, %v754_v23, %v756_v34  ;;  %v1495_v45 = vld [vmem:[#allocation2 + $0x18] sm:$0x3f]  ;;  %v1628_v61 = vld [vmem:[#allocation2 + $0x12] sm:$0x3f] }
  0xc6   : > { %3719 = vmatmul.msk.f32.vlgmr.msra.gmra.mxu2 %vm310_vm2, %v1341_v36  ;;  %759 = vst.msk [vmem:[#allocation2 + $0x20] sm:$0xff] %vm310_vm2, %v757_v38  ;;  %v836_v41 = vpop.f32.mrf.mxu2  ;;  %v863_v42 = vpop.f32.mrf.mxu3  ;;  %v1521_v47 = vld [vmem:[#allocation2 + $0x19] sm:$0x3f] }
  0xc7   : > { %3721 = vmatmul.msk.f32.vlgmr.msra.gmra.mxu3 %vm310_vm2, %v1391_v37  ;;  %v839_v43 = vadd.f32 %v836_v41, %v810_v35  ;;  %1600 = vmatpush.msra.mxu2 %v4256_v26  ;;  %v1547_v48 = vld [vmem:[#allocation2 + $0x1a] sm:$0x3f] }
  0xc8   : > { %3723 = vmatmul.msk.f32.vlgmr.msrb.gmra.mxu0 %vm310_vm2, %v1417_v39  ;;  %3725 = vmatmul.msk.f32.vlgmr.msrb.gmra.mxu1 %vm310_vm2, %v1443_v40  ;;  %v1654_v62 = vld [vmem:[#allocation2 + $0x18] sm:$0x3f] }
  0xc9   : > { %1623 = vmatpush.msra.mxu3 %v4261_v27  ;;  %1648 = vmatpush.msrb.mxu0 %v4266_v28  ;;  %v866_v44 = vadd.f32 %v863_v42, %v839_v43  ;;  %v898_v51 = vpop.f32.mrf.mxu0  ;;  %v921_v52 = vpop.f32.mrf.mxu1  ;;  %v1680_v3 = vld [vmem:[#allocation2 + $0x19] sm:$0x3f] }
  0xca   : > { %1674 = vmatpush.msrb.mxu1 %v4274_v29  ;;  %v922_v53 = vadd.f32 %v921_v52, %v898_v51  ;;  %v1706_v4 = vld [vmem:[#allocation2 + $0x1a] sm:$0x3f] }
  0xcb   : > { %vm867_vm7 = vcmp.ge.f32.partialorder %v866_v44, 0.0  ;;  %v868_v46 = vmul.f32 0.2, %v866_v44  ;;  %v1817_v11 = vld [vmem:[#allocation2 + $0x19] sm:$0x3f] }
  0xcc   : > { %v1815_v12 = vld [vmem:[#allocation2 + $0x18] sm:$0x3f] }
  0xcd   : > { %v869_v50 = vsel %vm867_vm7, %v866_v44, %v868_v46  ;;  %v1732_v1 = vld [vmem:[#allocation2 + $0x20] sm:$0x3f]  ;;  %v1865_v13 = vld [vmem:[#allocation2 + $0x1a] sm:$0x3f]  ;;  %v4422_v44 = vld [vmem:[%s4668_s3 + $0x8] sm:$0xff] }
  0xce   : > { %3727 = vmatmul.msk.f32.vlgmr.msrb.gmra.mxu2 %vm310_vm2, %v1469_v49  ;;  %871 = vst.msk [vmem:[#allocation2 + $0x28] sm:$0xff] %vm310_vm2, %v869_v50  ;;  %v948_v55 = vpop.f32.mrf.mxu2  ;;  %v975_v56 = vpop.f32.mrf.mxu3  ;;  %v1758_v2 = vld [vmem:[#allocation2 + $0x21] sm:$0x3f]  ;;  %v4417_v43 = vld [vmem:[%s4668_s3 + $0x18] sm:$0xff] }
  0xcf   : > { %3729 = vmatmul.msk.f32.vlgmr.msrb.gmra.mxu3 %vm310_vm2, %v1495_v45  ;;  %1700 = vmatpush.msrb.mxu2 %v4279_v30  ;;  %v951_v57 = vadd.f32 %v948_v55, %v922_v53  ;;  %v1784_v10 = vld [vmem:[#allocation2 + $0x22] sm:$0x3f]  ;;  %v4427_v45 = vld [vmem:[%s4668_s3 + $0x28] sm:$0xff] }
  0xd0   : > { %3731 = vmatmul.msk.f32.vlgmr.msra.gmra.mxu0 %vm310_vm2, %v1521_v47  ;;  %3733 = vmatmul.msk.f32.vlgmr.msra.gmra.mxu1 %vm310_vm2, %v1547_v48  ;;  %v1891_v19 = vld [vmem:[#allocation2 + $0x20] sm:$0x3f]  ;;  %v4435_v48 = vld [vmem:[%s4668_s3 + $0x10] sm:$0xff] }
  0xd1   : > { %1726 = vmatpush.msrb.mxu3 %v4284_v31  ;;  %1752 = vmatpush.msra.mxu0 %v4292_v32  ;;  %v978_v58 = vadd.f32 %v975_v56, %v951_v57  ;;  %v1010_v5 = vpop.f32.mrf.mxu0  ;;  %v1033_v6 = vpop.f32.mrf.mxu1  ;;  %v1917_v20 = vld [vmem:[#allocation2 + $0x21] sm:$0x3f] }
  0xd2   : > { %1778 = vmatpush.msra.mxu1 %v4297_v33  ;;  %v1034_v7 = vadd.f32 %v1033_v6, %v1010_v5  ;;  %v1943_v21 = vld [vmem:[#allocation2 + $0x22] sm:$0x3f]  ;;  %v4463_v5 = vld [vmem:[%s4668_s3 + $0x58] sm:$0xff] }
  0xd3   : > { %vm979_vm8 = vcmp.ge.f32.partialorder %v978_v58, 0.0  ;;  %v980_v63 = vmul.f32 0.2, %v978_v58  ;;  %v2054_v24 = vld [vmem:[#allocation2 + $0x21] sm:$0x3f] }
  0xd4   : > { %v2052_v25 = vld [vmem:[#allocation2 + $0x20] sm:$0x3f] }
  0xd5   : > { %v981_v0 = vsel %vm979_vm8, %v978_v58, %v980_v63  ;;  %v1969_v17 = vld [vmem:[#allocation2 + $0x28] sm:$0x3f]  ;;  %v2102_v34 = vld [vmem:[#allocation2 + $0x22] sm:$0x3f] }
  0xd6   : > { %3735 = vmatmul.msk.f32.vlgmr.msra.gmra.mxu2 %vm310_vm2, %v1580_v59  ;;  %983 = vst.msk [vmem:[#allocation2 + $0x30] sm:$0xff] %vm310_vm2, %v981_v0  ;;  %v1060_v8 = vpop.f32.mrf.mxu2  ;;  %v1087_v14 = vpop.f32.mrf.mxu3  ;;  %v1995_v22 = vld [vmem:[#allocation2 + $0x29] sm:$0x3f]  ;;  %v4440_v49 = vld [vmem:[%s4668_s3] sm:$0xff] }
  0xd7   : > { %3736 = vmatmul.msk.f32.vlgmr.msra.gmra.mxu3 %vm310_vm2, %v1578_v60  ;;  %1804 = vmatpush.msra.mxu2 %v4305_v54  ;;  %v1063_v9 = vadd.f32 %v1060_v8, %v1034_v7  ;;  %v2021_v23 = vld [vmem:[#allocation2 + $0x2a] sm:$0x3f]  ;;  %v4445_v50 = vld [vmem:[%s4668_s3 + $0x20] sm:$0xff]  ;;  %v4471_v7 = vld [vmem:[%s4668_s3 + $0x30] sm:$0xff] }
  0xd8   : > { %3738 = vmatmul.msk.f32.vlgmr.msrb.gmra.mxu0 %vm310_vm2, %v1628_v61  ;;  %3740 = vmatmul.msk.f32.vlgmr.msrb.gmra.mxu1 %vm310_vm2, %v1654_v62  ;;  %v2128_v35 = vld [vmem:[#allocation2 + $0x28] sm:$0x3f]  ;;  %v4476_v8 = vld [vmem:[%s4668_s3 + $0x40] sm:$0xff] }
  0xd9   : > { %1837 = vmatpush.msra.mxu3 %v4256_v26  ;;  %1860 = vmatpush.msrb.mxu0 %v4261_v27  ;;  %v1090_v15 = vadd.f32 %v1087_v14, %v1063_v9  ;;  %v2154_v36 = vld [vmem:[#allocation2 + $0x29] sm:$0x3f]  ;;  %v4481_v9 = vld [vmem:[%s4668_s3 + $0x50] sm:$0xff] }
  0xda   : > { %1885 = vmatpush.msrb.mxu1 %v4266_v28  ;;  %v2180_v37 = vld [vmem:[#allocation2 + $0x2a] sm:$0x3f] }
  0xdb   : > { %vm1091_vm9 = vcmp.ge.f32.partialorder %v1090_v15, 0.0  ;;  %v1092_v16 = vmul.f32 0.2, %v1090_v15  ;;  %v2291_v40 = vld [vmem:[#allocation2 + $0x29] sm:$0x3f] }
  0xdd   : > { %v1093_v18 = vsel %vm1091_vm9, %v1090_v15, %v1092_v16  ;;  %v2232_v38 = vld [vmem:[#allocation2 + $0x31] sm:$0x3f] }
  0xde   : > { %3742 = vmatmul.msk.f32.vlgmr.msrb.gmra.mxu2 %vm310_vm2, %v1680_v3  ;;  %1095 = vst.msk [vmem:[#allocation2 + $0x38] sm:$0xff] %vm310_vm2, %v1093_v18  ;;  %v2258_v39 = vld [vmem:[#allocation2 + $0x32] sm:$0x3f]  ;;  %v4453_v3 = vld [vmem:[%s4668_s3 + $0x38] sm:$0xff] }
  0xdf   : > { %3744 = vmatmul.msk.f32.vlgmr.msrb.gmra.mxu3 %vm310_vm2, %v1706_v4  ;;  %1911 = vmatpush.msrb.mxu2 %v4274_v29  ;;  %v4458_v4 = vld [vmem:[%s4668_s3 + $0x48] sm:$0xff] }
  0xe0   : > { %3746 = vmatmul.msk.f32.vlgmr.msra.gmra.mxu0 %vm310_vm2, %v1732_v1  ;;  %3748 = vmatmul.msk.f32.vlgmr.msra.gmra.mxu1 %vm310_vm2, %v1758_v2 }
  0xe1   : > { %1937 = vmatpush.msrb.mxu3 %v4279_v30  ;;  %1963 = vmatpush.msra.mxu0 %v4284_v31 }
  0xe2   : > { %1989 = vmatpush.msra.mxu1 %v4292_v32 }
  0xe5   : > { %v2443_v41 = vld [vmem:[#allocation2 + $0x38] sm:$0x3f] }
  0xe6   : > { %3750 = vmatmul.msk.f32.vlgmr.msra.gmra.mxu2 %vm310_vm2, %v1784_v10  ;;  %v2495_v42 = vld [vmem:[#allocation2 + $0x3a] sm:$0x3f] }
  0xe7   : > { %3752 = vmatmul.msk.f32.vlgmr.msra.gmra.mxu3 %vm310_vm2, %v1817_v11  ;;  %2015 = vmatpush.msra.mxu2 %v4297_v33 }
  0xe8   : > { %3753 = vmatmul.msk.f32.vlgmr.msrb.gmra.mxu0 %vm310_vm2, %v1815_v12  ;;  %3755 = vmatmul.msk.f32.vlgmr.msrb.gmra.mxu1 %vm310_vm2, %v1865_v13 }
  0xe9   : > { %2041 = vmatpush.msra.mxu3 %v4305_v54  ;;  %2074 = vmatpush.msrb.mxu0 %v4256_v26 }
  0xea   : > { %2097 = vmatpush.msrb.mxu1 %v4261_v27 }
  0xee   : > { %3757 = vmatmul.msk.f32.vlgmr.msrb.gmra.mxu2 %vm310_vm2, %v1891_v19 }
  0xef   : > { %3759 = vmatmul.msk.f32.vlgmr.msrb.gmra.mxu3 %vm310_vm2, %v1917_v20  ;;  %2122 = vmatpush.msrb.mxu2 %v4266_v28 }
  0xf0   : > { %3761 = vmatmul.msk.f32.vlgmr.msra.gmra.mxu0 %vm310_vm2, %v1943_v21  ;;  %3763 = vmatmul.msk.f32.vlgmr.msra.gmra.mxu1 %vm310_vm2, %v1969_v17 }
  0xf1   : > { %2148 = vmatpush.msrb.mxu3 %v4274_v29  ;;  %2174 = vmatpush.msra.mxu0 %v4279_v30 }
  0xf2   : > { %2200 = vmatpush.msra.mxu1 %v4284_v31 }
  0xf6   : > { %3765 = vmatmul.msk.f32.vlgmr.msra.gmra.mxu2 %vm310_vm2, %v1995_v22 }
  0xf7   : > { %3767 = vmatmul.msk.f32.vlgmr.msra.gmra.mxu3 %vm310_vm2, %v2021_v23  ;;  %2226 = vmatpush.msra.mxu2 %v4292_v32 }
  0xf8   : > { %3769 = vmatmul.msk.f32.vlgmr.msrb.gmra.mxu0 %vm310_vm2, %v2054_v24  ;;  %3770 = vmatmul.msk.f32.vlgmr.msrb.gmra.mxu1 %vm310_vm2, %v2052_v25 }
  0xf9   : > { %2252 = vmatpush.msra.mxu3 %v4297_v33  ;;  %2278 = vmatpush.msrb.mxu0 %v4305_v54 }
  0xfa   : > { %2311 = vmatpush.msrb.mxu1 %v4256_v26  ;;  %v2206_v26 = vld [vmem:[#allocation2 + $0x30] sm:$0x3f] }
  0xfe   : > { %3772 = vmatmul.msk.f32.vlgmr.msrb.gmra.mxu2 %vm310_vm2, %v2102_v34 }
  0xff   : > { %3774 = vmatmul.msk.f32.vlgmr.msrb.gmra.mxu3 %vm310_vm2, %v2128_v35  ;;  %2334 = vmatpush.msrb.mxu2 %v4261_v27  ;;  %v2289_v27 = vld [vmem:[#allocation2 + $0x28] sm:$0x3f] }
 0x100   : > { %3776 = vmatmul.msk.f32.vlgmr.msra.gmra.mxu0 %vm310_vm2, %v2154_v36  ;;  %3778 = vmatmul.msk.f32.vlgmr.msra.gmra.mxu1 %vm310_vm2, %v2180_v37 }
 0x101   : > { %2359 = vmatpush.msrb.mxu3 %v4266_v28  ;;  %2385 = vmatpush.msra.mxu0 %v4274_v29  ;;  %v2339_v28 = vld [vmem:[#allocation2 + $0x2a] sm:$0x3f]  ;;  %v2365_v29 = vld [vmem:[#allocation2 + $0x30] sm:$0x3f] }
 0x102   : > { %2411 = vmatpush.msra.mxu1 %v4279_v30  ;;  %v2391_v30 = vld [vmem:[#allocation2 + $0x31] sm:$0x3f] }
 0x106   : > { %3780 = vmatmul.msk.f32.vlgmr.msra.gmra.mxu2 %vm310_vm2, %v2206_v26  ;;  %v4495_v26 = vld [vmem:[%s4668_s3 + $0x88] sm:$0xff] }
 0x107   : > { %3782 = vmatmul.msk.f32.vlgmr.msra.gmra.mxu3 %vm310_vm2, %v2232_v38  ;;  %2437 = vmatpush.msra.mxu2 %v4284_v31  ;;  %v2469_v31 = vld [vmem:[#allocation2 + $0x39] sm:$0x3f]  ;;  %v4500_v38 = vld [vmem:[%s4668_s3 + $0x68] sm:$0xff] }
 0x108   : > { %3784 = vmatmul.msk.f32.vlgmr.msrb.gmra.mxu0 %vm310_vm2, %v2258_v39  ;;  %3786 = vmatmul.msk.f32.vlgmr.msrb.gmra.mxu1 %vm310_vm2, %v2291_v40  ;;  %v4505_v39 = vld [vmem:[%s4668_s3 + $0x78] sm:$0xff]  ;;  %v4512_v40 = vld [vmem:[%s4668_s3 + $0x60] sm:$0xff] }
 0x109   : > { %2463 = vmatpush.msra.mxu3 %v4292_v32  ;;  %2489 = vmatpush.msrb.mxu0 %v4297_v33  ;;  %v2417_v32 = vld [vmem:[#allocation2 + $0x32] sm:$0x3f] }
 0x10a   : > { %2515 = vmatpush.msrb.mxu1 %v4305_v54 }
 0x10e   : > { %3787 = vmatmul.msk.f32.vlgmr.msrb.gmra.mxu2 %vm310_vm2, %v2289_v27  ;;  %v4517_v27 = vld [vmem:[%s4668_s3 + $0x70] sm:$0xff] }
 0x10f   : > { %3789 = vmatmul.msk.f32.vlgmr.msrb.gmra.mxu3 %vm310_vm2, %v2339_v28  ;;  %2550 = vmatpush.msrb.mxu2 %v4417_v43  ;;  %v4522_v28 = vld [vmem:[%s4668_s3 + $0x80] sm:$0xff] }
 0x110   : > { %3791 = vmatmul.msk.f32.vlgmr.msra.gmra.mxu0 %vm310_vm2, %v2365_v29  ;;  %3793 = vmatmul.msk.f32.vlgmr.msra.gmra.mxu1 %vm310_vm2, %v2391_v30 }
 0x111   : > { %2573 = vmatpush.msrb.mxu3 %v4422_v44  ;;  %2600 = vmatpush.msra.mxu0 %v4427_v45 }
 0x112   : > { %2551 = vmatpush.msrb.mxu2 %v4435_v48  ;;  %2628 = vmatpush.msra.mxu1 %v4453_v3 }
 0x113   : > { %2574 = vmatpush.msrb.mxu3 %v4440_v49  ;;  %2601 = vmatpush.msra.mxu0 %v4445_v50 }
 0x114   : > { %2629 = vmatpush.msra.mxu1 %v4471_v7 }
 0x116   : > { %3795 = vmatmul.msk.f32.vlgmr.msra.gmra.mxu2 %vm310_vm2, %v2417_v32 }
 0x117   : > { %3797 = vmatmul.msk.f32.vlgmr.msra.gmra.mxu3 %vm310_vm2, %v2443_v41  ;;  %2656 = vmatpush.msra.mxu2 %v4458_v4 }
 0x118   : > { %3799 = vmatmul.msk.f32.vlgmr.msrb.gmra.mxu0 %vm310_vm2, %v2469_v31  ;;  %3801 = vmatmul.msk.f32.vlgmr.msrb.gmra.mxu1 %vm310_vm2, %v2495_v42 }
 0x119   : > { %2684 = vmatpush.msra.mxu3 %v4463_v5  ;;  %2657 = vmatpush.msra.mxu2 %v4476_v8 }
 0x11a   : > { %2712 = vmatpush.msrb.mxu0 %v4500_v38  ;;  %2740 = vmatpush.msrb.mxu1 %v4505_v39 }
 0x11b   : > { %2685 = vmatpush.msra.mxu3 %v4481_v9 }
 0x11c   : > { %2713 = vmatpush.msrb.mxu0 %v4512_v40  ;;  %2741 = vmatpush.msrb.mxu1 %v4517_v27 }
 0x12b   : > { %v1121_v33 = vpop.f32.mrf.mxu0 }
 0x12c   : > { %v1144_v54 = vpop.f32.mrf.mxu1 }
 0x12d   : > { %v1145_v52 = vadd.f32 %v1144_v54, %v1121_v33 }
 0x133   : > { %v1170_v51 = vpop.f32.mrf.mxu2 }
 0x134   : > { %v1224_v46 = vpop.f32.mrf.mxu0  ;;  %v1173_v53 = vadd.f32 %v1170_v51, %v1145_v52 }
 0x135   : > { %v1251_v47 = vpop.f32.mrf.mxu1 }
 0x139   : > { %v1197_v55 = vpop.f32.mrf.mxu3 }
 0x13a   : > { %v1200_v56 = vadd.f32 %v1197_v55, %v1173_v53 }
 0x13c   : > { %v1227_v57 = vadd.f32 %v1224_v46, %v1200_v56 }
 0x13d   : > { %v1332_v58 = vpop.f32.mrf.mxu0  ;;  %v1365_v59 = vpop.f32.mrf.mxu1 }
 0x13e   : > { %v1254_v60 = vadd.f32 %v1251_v47, %v1227_v57 }
 0x141   : > { %v1278_v61 = vpop.f32.mrf.mxu2 }
 0x142   : > { %v1305_v62 = vpop.f32.mrf.mxu3  ;;  %v1281_v63 = vadd.f32 %v1278_v61, %v1254_v60 }
 0x144   : > { %v1308_v0 = vadd.f32 %v1305_v62, %v1281_v63 }
 0x145   : > { %v1439_v1 = vpop.f32.mrf.mxu0  ;;  %v1465_v2 = vpop.f32.mrf.mxu1 }
 0x146   : > { %v1335_v6 = vadd.f32 %v1332_v58, %v1308_v0 }
 0x148   : > { %vm1336_vm10 = vcmp.ge.f32.partialorder %v1335_v6, 0.0  ;;  %v1337_v10 = vmul.f32 0.2, %v1335_v6 }
 0x149   : > { %v1388_v11 = vpop.f32.mrf.mxu2 }
 0x14a   : > { %v1413_v12 = vpop.f32.mrf.mxu3  ;;  %v1338_v13 = vsel %vm1336_vm10, %v1335_v6, %v1337_v10  ;;  %v1389_v14 = vadd.f32 %v1388_v11, %v1365_v59 }
 0x14b   : > { %1340 = vst.msk [vmem:[#allocation3] sm:$0x3f] %vm1339_vm11, %v1338_v13 }
 0x14c   : > { %v1416_v15 = vadd.f32 %v1413_v12, %v1389_v14 }
 0x14d   : > { %v1543_v16 = vpop.f32.mrf.mxu0  ;;  %v1569_v17 = vpop.f32.mrf.mxu1 }
 0x14e   : > { %v1442_v18 = vadd.f32 %v1439_v1, %v1416_v15 }
 0x150   : > { %v1468_v19 = vadd.f32 %v1465_v2, %v1442_v18 }
 0x151   : > { %v1491_v20 = vpop.f32.mrf.mxu2 }
 0x152   : > { %v1517_v21 = vpop.f32.mrf.mxu3  ;;  %v1494_v22 = vadd.f32 %v1491_v20, %v1468_v19  ;;  %v2529_v23 = vld [vmem:[#allocation3 + $0x1] sm:$0xf] }
 0x153   : > { %v2526_v24 = vld [vmem:[#allocation3] sm:$0xf]  ;;  %3804 = vmatmul.msk.f32.vlgmr.msrb.gmra.mxu2 %vm203_vm0, %v2529_v23 }
 0x154   : > { %v2579_v25 = vld [vmem:[#allocation3 + $0x2] sm:$0xf]  ;;  %3805 = vmatmul.msk.f32.vlgmr.msrb.gmra.mxu3 %vm203_vm0, %v2526_v24  ;;  %v1520_v34 = vadd.f32 %v1517_v21, %v1494_v22  ;;  %2768 = vmatpush.msrb.mxu2 %v4495_v26 }
 0x155   : > { %v1650_v35 = vpop.f32.mrf.mxu0  ;;  %v1676_v36 = vpop.f32.mrf.mxu1  ;;  %3808 = vmatmul.msk.f32.vlgmr.msra.gmra.mxu0 %vm203_vm0, %v2579_v25  ;;  %2800 = vmatpush.msrb.mxu3 %v4417_v43 }
 0x156   : > { %v1546_v37 = vadd.f32 %v1543_v16, %v1520_v34  ;;  %2769 = vmatpush.msrb.mxu2 %v4522_v28  ;;  %2823 = vmatpush.msra.mxu0 %v4422_v44 }
 0x157   : > { %2801 = vmatpush.msrb.mxu3 %v4435_v48 }
 0x158   : > { %v1572_v29 = vadd.f32 %v1569_v17, %v1546_v37  ;;  %2824 = vmatpush.msra.mxu0 %v4440_v49 }
 0x159   : > { %v1602_v30 = vpop.f32.mrf.mxu2 }
 0x15a   : > { %v1625_v41 = vpop.f32.mrf.mxu3  ;;  %vm1573_vm12 = vcmp.ge.f32.partialorder %v1572_v29, 0.0  ;;  %v1574_v31 = vmul.f32 0.2, %v1572_v29 }
 0x15b   : > { %v1626_v42 = vadd.f32 %v1625_v41, %v1602_v30 }
 0x15c   : > { %v1575_v32 = vsel %vm1573_vm12, %v1572_v29, %v1574_v31 }
 0x15d   : > { %v1653_v33 = vadd.f32 %v1650_v35, %v1626_v42  ;;  %v1754_v54 = vpop.f32.mrf.mxu0  ;;  %v1780_v46 = vpop.f32.mrf.mxu1  ;;  %1577 = vst.msk [vmem:[#allocation3 + $0x8] sm:$0x3f] %vm1339_vm11, %v1575_v32 }
 0x15f   : > { %v1679_v47 = vadd.f32 %v1676_v36, %v1653_v33 }
 0x161   : > { %v1702_v51 = vpop.f32.mrf.mxu2 }
 0x162   : > { %v1728_v52 = vpop.f32.mrf.mxu3  ;;  %v1705_v53 = vadd.f32 %v1702_v51, %v1679_v47 }
 0x164   : > { %v1731_v55 = vadd.f32 %v1728_v52, %v1705_v53  ;;  %v2607_v58 = vld [vmem:[#allocation3 + $0x8] sm:$0xf] }
 0x165   : > { %v1862_v56 = vpop.f32.mrf.mxu0  ;;  %v1887_v57 = vpop.f32.mrf.mxu1  ;;  %v2635_v59 = vld [vmem:[#allocation3 + $0x9] sm:$0xf]  ;;  %3811 = vmatmul.msk.f32.vlgmr.msra.gmra.mxu1 %vm203_vm0, %v2607_v58 }
 0x166   : > { %v2663_v60 = vld [vmem:[#allocation3 + $0xa] sm:$0xf]  ;;  %3814 = vmatmul.msk.f32.vlgmr.msra.gmra.mxu2 %vm203_vm0, %v2635_v59  ;;  %v1757_v61 = vadd.f32 %v1754_v54, %v1731_v55  ;;  %2849 = vmatpush.msra.mxu1 %v4427_v45 }
 0x167   : > { %3817 = vmatmul.msk.f32.vlgmr.msra.gmra.mxu3 %vm203_vm0, %v2663_v60  ;;  %2876 = vmatpush.msra.mxu2 %v4453_v3  ;;  %v2780_v12 = vld [vmem:[#allocation3 + $0x9] sm:$0xf] }
 0x168   : > { %2903 = vmatpush.msra.mxu3 %v4458_v4  ;;  %v1783_v62 = vadd.f32 %v1780_v46, %v1757_v61  ;;  %2850 = vmatpush.msra.mxu1 %v4445_v50  ;;  %v2777_v30 = vld [vmem:[#allocation3 + $0x8] sm:$0xf] }
 0x169   : > { %2877 = vmatpush.msra.mxu2 %v4471_v7  ;;  %v1806_v63 = vpop.f32.mrf.mxu2  ;;  %v2829_v42 = vld [vmem:[#allocation3 + $0xa] sm:$0xf] }
 0x16a   : > { %v1839_v0 = vpop.f32.mrf.mxu3  ;;  %2904 = vmatpush.msra.mxu3 %v4476_v8  ;;  %v1809_v1 = vadd.f32 %v1806_v63, %v1783_v62 }
 0x16b   : > { %v1863_v6 = vadd.f32 %v1862_v56, %v1839_v0 }
 0x16c   : > { %vm1810_vm13 = vcmp.ge.f32.partialorder %v1809_v1, 0.0  ;;  %v1811_v2 = vmul.f32 0.2, %v1809_v1 }
 0x16d   : > { %v1965_v10 = vpop.f32.mrf.mxu0  ;;  %v1991_v11 = vpop.f32.mrf.mxu1  ;;  %v1890_v14 = vadd.f32 %v1887_v57, %v1863_v6 }
 0x16e   : > { %v1812_v13 = vsel %vm1810_vm13, %v1809_v1, %v1811_v2 }
 0x16f   : > { %3829 = vmatmul.msk.f32.vlgmr.msrb.gmra.mxu3 %vm203_vm0, %v2780_v12  ;;  %1814 = vst.msk [vmem:[#allocation3 + $0x10] sm:$0x3f] %vm1339_vm11, %v1812_v13 }
 0x170   : > { %3011 = vmatpush.msrb.mxu3 %v4495_v26 }
 0x171   : > { %v1913_v15 = vpop.f32.mrf.mxu2 }
 0x172   : > { %v1939_v16 = vpop.f32.mrf.mxu3  ;;  %3012 = vmatpush.msrb.mxu3 %v4522_v28  ;;  %v1916_v17 = vadd.f32 %v1913_v15, %v1890_v14 }
 0x174   : > { %v1942_v18 = vadd.f32 %v1939_v16, %v1916_v17 }
 0x175   : > { %v2076_v19 = vpop.f32.mrf.mxu0  ;;  %v2099_v21 = vpop.f32.mrf.mxu1 }
 0x176   : > { %v1968_v20 = vadd.f32 %v1965_v10, %v1942_v18  ;;  %v2691_v22 = vld [vmem:[#allocation3 + $0x10] sm:$0xf]  ;;  %v2100_v33 = vadd.f32 %v2099_v21, %v2076_v19 }
 0x177   : > { %v2719_v23 = vld [vmem:[#allocation3 + $0x11] sm:$0xf]  ;;  %3820 = vmatmul.msk.f32.vlgmr.msrb.gmra.mxu0 %vm203_vm0, %v2691_v22 }
 0x178   : > { %v2747_v24 = vld [vmem:[#allocation3 + $0x12] sm:$0xf]  ;;  %3823 = vmatmul.msk.f32.vlgmr.msrb.gmra.mxu1 %vm203_vm0, %v2719_v23  ;;  %v1994_v34 = vadd.f32 %v1991_v11, %v1968_v20  ;;  %2930 = vmatpush.msrb.mxu0 %v4463_v5 }
 0x179   : > { %v2883_v25 = vld [vmem:[#allocation3 + $0x11] sm:$0xf]  ;;  %3826 = vmatmul.msk.f32.vlgmr.msrb.gmra.mxu2 %vm203_vm0, %v2747_v24  ;;  %v2017_v35 = vpop.f32.mrf.mxu2  ;;  %2957 = vmatpush.msrb.mxu1 %v4500_v38 }
 0x17a   : > { %3839 = vmatmul.msk.f32.vlgmr.msra.gmra.mxu3 %vm203_vm0, %v2883_v25  ;;  %v2043_v36 = vpop.f32.mrf.mxu3  ;;  %2984 = vmatpush.msrb.mxu2 %v4505_v39  ;;  %v2020_v37 = vadd.f32 %v2017_v35, %v1994_v34  ;;  %v2856_v32 = vld [vmem:[#allocation3 + $0x10] sm:$0xf] }
 0x17b   : > { %3119 = vmatpush.msra.mxu3 %v4453_v3  ;;  %2931 = vmatpush.msrb.mxu0 %v4481_v9  ;;  %v2910_v56 = vld [vmem:[#allocation3 + $0x12] sm:$0xf] }
 0x17c   : > { %2985 = vmatpush.msrb.mxu2 %v4517_v27  ;;  %v2046_v29 = vadd.f32 %v2043_v36, %v2020_v37  ;;  %2958 = vmatpush.msrb.mxu1 %v4512_v40  ;;  %v3023_v10 = vld [vmem:[#allocation3 + $0x11] sm:$0xf] }
 0x17d   : > { %3120 = vmatpush.msra.mxu3 %v4471_v7  ;;  %v2176_v31 = vpop.f32.mrf.mxu0  ;;  %v2202_v46 = vpop.f32.mrf.mxu1  ;;  %v3020_v11 = vld [vmem:[#allocation3 + $0x10] sm:$0xf] }
 0x17e   : > { %vm2047_vm14 = vcmp.ge.f32.partialorder %v2046_v29, 0.0  ;;  %v2048_v41 = vmul.f32 0.2, %v2046_v29  ;;  %v3072_v13 = vld [vmem:[#allocation3 + $0x12] sm:$0xf] }
 0x17f   : > { %3830 = vmatmul.msk.f32.vlgmr.msra.gmra.mxu0 %vm203_vm0, %v2777_v30 }
 0x180   : > { %3833 = vmatmul.msk.f32.vlgmr.msra.gmra.mxu1 %vm203_vm0, %v2829_v42  ;;  %v2049_v54 = vsel %vm2047_vm14, %v2046_v29, %v2048_v41  ;;  %3043 = vmatpush.msra.mxu0 %v4417_v43 }
 0x181   : > { %3836 = vmatmul.msk.f32.vlgmr.msra.gmra.mxu2 %vm203_vm0, %v2856_v32  ;;  %2051 = vst.msk [vmem:[#allocation3 + $0x18] sm:$0x3f] %vm1339_vm11, %v2049_v54  ;;  %v2124_v47 = vpop.f32.mrf.mxu2  ;;  %3066 = vmatpush.msra.mxu1 %v4422_v44 }
 0x182   : > { %v2150_v51 = vpop.f32.mrf.mxu3  ;;  %3092 = vmatpush.msra.mxu2 %v4427_v45  ;;  %v2127_v52 = vadd.f32 %v2124_v47, %v2100_v33  ;;  %3044 = vmatpush.msra.mxu0 %v4435_v48 }
 0x183   : > { %3067 = vmatpush.msra.mxu1 %v4440_v49 }
 0x184   : > { %3093 = vmatpush.msra.mxu2 %v4445_v50  ;;  %v2153_v53 = vadd.f32 %v2150_v51, %v2127_v52 }
 0x185   : > { %v2280_v57 = vpop.f32.mrf.mxu0  ;;  %v2313_v1 = vpop.f32.mrf.mxu1 }
 0x186   : > { %v2179_v55 = vadd.f32 %v2176_v31, %v2153_v53 }
 0x187   : > { %3842 = vmatmul.msk.f32.vlgmr.msrb.gmra.mxu0 %vm203_vm0, %v2910_v56 }
 0x188   : > { %v2205_v58 = vadd.f32 %v2202_v46, %v2179_v55  ;;  %v2937_v59 = vld [vmem:[#allocation3 + $0x18] sm:$0xf]  ;;  %3146 = vmatpush.msrb.mxu0 %v4458_v4 }
 0x189   : > { %v2964_v60 = vld [vmem:[#allocation3 + $0x19] sm:$0xf]  ;;  %v2228_v62 = vpop.f32.mrf.mxu2  ;;  %3845 = vmatmul.msk.f32.vlgmr.msrb.gmra.mxu1 %vm203_vm0, %v2937_v59 }
 0x18a   : > { %v2991_v61 = vld [vmem:[#allocation3 + $0x1a] sm:$0xf]  ;;  %v2254_v63 = vpop.f32.mrf.mxu3  ;;  %3848 = vmatmul.msk.f32.vlgmr.msrb.gmra.mxu2 %vm203_vm0, %v2964_v60  ;;  %v2231_v0 = vadd.f32 %v2228_v62, %v2205_v58  ;;  %3147 = vmatpush.msrb.mxu0 %v4476_v8 }
 0x18b   : > { %3851 = vmatmul.msk.f32.vlgmr.msrb.gmra.mxu3 %vm203_vm0, %v2991_v61  ;;  %3200 = vmatpush.msrb.mxu2 %v4500_v38  ;;  %v3099_v16 = vld [vmem:[#allocation3 + $0x18] sm:$0xf] }
 0x18c   : > { %3227 = vmatpush.msrb.mxu3 %v4505_v39  ;;  %v2257_v2 = vadd.f32 %v2254_v63, %v2231_v0  ;;  %3173 = vmatpush.msrb.mxu1 %v4463_v5  ;;  %v3126_v23 = vld [vmem:[#allocation3 + $0x19] sm:$0xf] }
 0x18d   : > { %3201 = vmatpush.msrb.mxu2 %v4512_v40  ;;  %v2387_v19 = vpop.f32.mrf.mxu0  ;;  %v2413_v21 = vpop.f32.mrf.mxu1  ;;  %v3153_v24 = vld [vmem:[#allocation3 + $0x1a] sm:$0xf] }
 0x18e   : > { %3228 = vmatpush.msrb.mxu3 %v4517_v27  ;;  %v2283_v6 = vadd.f32 %v2280_v57, %v2257_v2  ;;  %3174 = vmatpush.msrb.mxu1 %v4481_v9  ;;  %v3266_v36 = vld [vmem:[#allocation3 + $0x19] sm:$0xf] }
 0x18f   : > { %3855 = vmatmul.msk.f32.vlgmr.msra.gmra.mxu0 %vm203_vm0, %v3023_v10  ;;  %v3315_v37 = vld [vmem:[#allocation3 + $0x1a] sm:$0xf] }
 0x190   : > { %vm2284_vm15 = vcmp.ge.f32.partialorder %v2283_v6, 0.0  ;;  %v2285_v12 = vmul.f32 0.2, %v2283_v6  ;;  %3254 = vmatpush.msra.mxu0 %v4495_v26 }
 0x191   : > { %v2336_v14 = vpop.f32.mrf.mxu2  ;;  %3856 = vmatmul.msk.f32.vlgmr.msra.gmra.mxu1 %vm203_vm0, %v3020_v11 }
 0x192   : > { %v2361_v15 = vpop.f32.mrf.mxu3  ;;  %3859 = vmatmul.msk.f32.vlgmr.msra.gmra.mxu2 %vm203_vm0, %v3072_v13  ;;  %v2286_v17 = vsel %vm2284_vm15, %v2283_v6, %v2285_v12  ;;  %v2337_v18 = vadd.f32 %v2336_v14, %v2313_v1  ;;  %3255 = vmatpush.msra.mxu0 %v4522_v28 }
 0x193   : > { %3862 = vmatmul.msk.f32.vlgmr.msra.gmra.mxu3 %vm203_vm0, %v3099_v16  ;;  %3309 = vmatpush.msra.mxu2 %v4422_v44  ;;  %2288 = vst.msk [vmem:[#allocation3 + $0x20] sm:$0x3f] %vm1339_vm11, %v2286_v17 }
 0x194   : > { %3335 = vmatpush.msra.mxu3 %v4427_v45  ;;  %v2364_v20 = vadd.f32 %v2361_v15, %v2337_v18  ;;  %3286 = vmatpush.msra.mxu1 %v4417_v43 }
 0x195   : > { %3310 = vmatpush.msra.mxu2 %v4440_v49 }
 0x196   : > { %3336 = vmatpush.msra.mxu3 %v4445_v50  ;;  %v2390_v22 = vadd.f32 %v2387_v19, %v2364_v20  ;;  %3287 = vmatpush.msra.mxu1 %v4435_v48  ;;  %v2491_v50 = vpop.f32.mrf.mxu0 }
 0x197   : > { %3865 = vmatmul.msk.f32.vlgmr.msrb.gmra.mxu0 %vm203_vm0, %v3126_v23 }
 0x198   : > { %v2416_v44 = vadd.f32 %v2413_v21, %v2390_v22  ;;  %3362 = vmatpush.msrb.mxu0 %v4453_v3 }
 0x199   : > { %v2439_v45 = vpop.f32.mrf.mxu2  ;;  %3868 = vmatmul.msk.f32.vlgmr.msrb.gmra.mxu1 %vm203_vm0, %v3153_v24 }
 0x19a   : > { %v2442_v25 = vadd.f32 %v2439_v45, %v2416_v44  ;;  %v3180_v43 = vld [vmem:[#allocation3 + $0x20] sm:$0xf]  ;;  %3363 = vmatpush.msrb.mxu0 %v4471_v7  ;;  %3389 = vmatpush.msrb.mxu1 %v4458_v4  ;;  %v2465_v49 = vpop.f32.mrf.mxu3  ;;  %v2517_v4 = vpop.f32.mrf.mxu1 }
 0x19b   : > { %v3207_v34 = vld [vmem:[#allocation3 + $0x21] sm:$0xf]  ;;  %3871 = vmatmul.msk.f32.vlgmr.msrb.gmra.mxu2 %vm203_vm0, %v3180_v43 }
 0x19c   : > { %3874 = vmatmul.msk.f32.vlgmr.msrb.gmra.mxu3 %vm203_vm0, %v3207_v34  ;;  %v2468_v48 = vadd.f32 %v2465_v49, %v2442_v25  ;;  %3416 = vmatpush.msrb.mxu2 %v4463_v5  ;;  %v3234_v35 = vld [vmem:[#allocation3 + $0x22] sm:$0xf]  ;;  %v3263_v5 = vld [vmem:[#allocation3 + $0x18] sm:$0xf] }
 0x19d   : > { %3443 = vmatpush.msrb.mxu3 %v4500_v38  ;;  %3390 = vmatpush.msrb.mxu1 %v4476_v8 }
 0x19e   : > { %v2494_v3 = vadd.f32 %v2491_v50, %v2468_v48  ;;  %3417 = vmatpush.msrb.mxu2 %v4481_v9  ;;  %v3342_v9 = vld [vmem:[#allocation3 + $0x20] sm:$0xf] }
 0x19f   : > { %3444 = vmatpush.msrb.mxu3 %v4512_v40  ;;  %3877 = vmatmul.msk.f32.vlgmr.msra.gmra.mxu0 %vm203_vm0, %v3234_v35  ;;  %v3396_v40 = vld [vmem:[#allocation3 + $0x22] sm:$0xf] }
 0x1a0   : > { %v2520_v7 = vadd.f32 %v2517_v4, %v2494_v3  ;;  %3470 = vmatpush.msra.mxu0 %v4505_v39  ;;  %v3369_v39 = vld [vmem:[#allocation3 + $0x21] sm:$0xf] }
 0x1a1   : > { %3881 = vmatmul.msk.f32.vlgmr.msra.gmra.mxu1 %vm203_vm0, %v3266_v36 }
 0x1a2   : > { %vm2521_vm1 = vcmp.ge.f32.partialorder %v2520_v7, 0.0  ;;  %v2522_v38 = vmul.f32 0.2, %v2520_v7  ;;  %3471 = vmatpush.msra.mxu0 %v4517_v27  ;;  %3497 = vmatpush.msra.mxu1 %v4495_v26 }
 0x1a3   : > { %3882 = vmatmul.msk.f32.vlgmr.msra.gmra.mxu2 %vm203_vm0, %v3263_v5 }
 0x1a4   : > { %3885 = vmatmul.msk.f32.vlgmr.msra.gmra.mxu3 %vm203_vm0, %v3315_v37  ;;  %v2523_v8 = vsel %vm2521_vm1, %v2520_v7, %v2522_v38  ;;  %3498 = vmatpush.msra.mxu1 %v4522_v28 }
 0x1a5   : > { %2525 = vst.msk [vmem:[#allocation3 + $0x28] sm:$0x3f] %vm1339_vm11, %v2523_v8 }
 0x1a7   : > { %3888 = vmatmul.msk.f32.vlgmr.msrb.gmra.mxu0 %vm203_vm0, %v3342_v9 }
 0x1a9   : > { %3891 = vmatmul.msk.f32.vlgmr.msrb.gmra.mxu1 %vm203_vm0, %v3369_v39 }
 0x1ab   : > { %3894 = vmatmul.msk.f32.vlgmr.msrb.gmra.mxu2 %vm203_vm0, %v3396_v40 }
 0x1ac   : > { %v3423_v27 = vld [vmem:[#allocation3 + $0x28] sm:$0xf] }
 0x1ad   : > { %3897 = vmatmul.msk.f32.vlgmr.msrb.gmra.mxu3 %vm203_vm0, %v3423_v27  ;;  %v3450_v26 = vld [vmem:[#allocation3 + $0x29] sm:$0xf] }
 0x1ae   : > { %v3477_v29 = vld [vmem:[#allocation3 + $0x2a] sm:$0xf] }
 0x1af   : > { %3900 = vmatmul.msk.f32.vlgmr.msra.gmra.mxu0 %vm203_vm0, %v3450_v26 }
 0x1b1   : > { %3903 = vmatmul.msk.f32.vlgmr.msra.gmra.mxu1 %vm203_vm0, %v3477_v29  ;;  %vm2775_vm0 = vcmask 60416  }
 0x1d2   : > { %v2603_v31 = vpop.f32.mrf.mxu0 }
 0x1d6   : > { %v2553_v28 = vpop.f32.mrf.mxu2 }
 0x1d7   : > { %v2576_v30 = vpop.f32.mrf.mxu3 }
 0x1d8   : > { %v2577_v41 = vadd.f32 %v2576_v30, %v2553_v28 }
 0x1da   : > { %v2606_v32 = vadd.f32 %v2603_v31, %v2577_v41 }
 0x1e2   : > { %v2631_v42 = vpop.f32.mrf.mxu1 }
 0x1e3   : > { %v2634_v54 = vadd.f32 %v2631_v42, %v2606_v32 }
 0x1e9   : > { %v2659_v33 = vpop.f32.mrf.mxu2 }
 0x1ea   : > { %v2662_v46 = vadd.f32 %v2659_v33, %v2634_v54  ;;  %v2687_v47 = vpop.f32.mrf.mxu3 }
 0x1ec   : > { %v2690_v51 = vadd.f32 %v2687_v47, %v2662_v46 }
 0x1f2   : > { %v2803_v60 = vpop.f32.mrf.mxu3 }
 0x1f4   : > { %v2715_v52 = vpop.f32.mrf.mxu0 }
 0x1f5   : > { %v2743_v53 = vpop.f32.mrf.mxu1  ;;  %v2718_v55 = vadd.f32 %v2715_v52, %v2690_v51 }
 0x1f7   : > { %v2746_v56 = vadd.f32 %v2743_v53, %v2718_v55 }
 0x1fc   : > { %v2771_v57 = vpop.f32.mrf.mxu2  ;;  %v2826_v59 = vpop.f32.mrf.mxu0 }
 0x1fd   : > { %v2774_v58 = vadd.f32 %v2771_v57, %v2746_v56  ;;  %v2827_v61 = vadd.f32 %v2826_v59, %v2803_v60  ;;  %v2852_v62 = vpop.f32.mrf.mxu1  ;;  %v2906_v6 = vpop.f32.mrf.mxu3 }
 0x1ff   : > { %2776 = vst.msk [vmem:[%s4621_s10] sm:$0xf] %vm2775_vm0, %v2774_v58  ;;  %v2855_v63 = vadd.f32 %v2852_v62, %v2827_v61 }
 0x204   : > { %v2879_v0 = vpop.f32.mrf.mxu2  ;;  %v2933_v2 = vpop.f32.mrf.mxu0 }
 0x205   : > { %v2882_v1 = vadd.f32 %v2879_v0, %v2855_v63 }
 0x206   : > { %v2960_v11 = vpop.f32.mrf.mxu1 }
 0x207   : > { %v2909_v10 = vadd.f32 %v2906_v6, %v2882_v1 }
 0x209   : > { %v2936_v12 = vadd.f32 %v2933_v2, %v2909_v10 }
 0x20b   : > { %v2963_v13 = vadd.f32 %v2960_v11, %v2936_v12 }
 0x20c   : > { %v3046_v15 = vpop.f32.mrf.mxu0 }
 0x20d   : > { %v2987_v14 = vpop.f32.mrf.mxu2 }
 0x20e   : > { %v2990_v16 = vadd.f32 %v2987_v14, %v2963_v13  ;;  %v3014_v17 = vpop.f32.mrf.mxu3  ;;  %v3069_v18 = vpop.f32.mrf.mxu1 }
 0x20f   : > { %v3070_v20 = vadd.f32 %v3069_v18, %v3046_v15 }
 0x210   : > { %v3017_v19 = vadd.f32 %v3014_v17, %v2990_v16 }
 0x212   : > { %3852 = vst.msk [vmem:[%s4621_s10 + $0x4] sm:$0xf] %vm2775_vm0, %v3017_v19 }
 0x214   : > { %v3149_v22 = vpop.f32.mrf.mxu0 }
 0x215   : > { %v3095_v21 = vpop.f32.mrf.mxu2 }
 0x216   : > { %v3098_v23 = vadd.f32 %v3095_v21, %v3070_v20  ;;  %v3122_v44 = vpop.f32.mrf.mxu3  ;;  %v3176_v24 = vpop.f32.mrf.mxu1 }
 0x218   : > { %v3125_v45 = vadd.f32 %v3122_v44, %v3098_v23 }
 0x21a   : > { %v3152_v25 = vadd.f32 %v3149_v22, %v3125_v45 }
 0x21c   : > { %v3179_v43 = vadd.f32 %v3176_v24, %v3152_v25  ;;  %v3257_v34 = vpop.f32.mrf.mxu0 }
 0x21e   : > { %v3203_v49 = vpop.f32.mrf.mxu2  ;;  %v3289_v3 = vpop.f32.mrf.mxu1 }
 0x21f   : > { %v3230_v48 = vpop.f32.mrf.mxu3  ;;  %v3206_v50 = vadd.f32 %v3203_v49, %v3179_v43 }
 0x221   : > { %v3233_v35 = vadd.f32 %v3230_v48, %v3206_v50 }
 0x223   : > { %v3260_v4 = vadd.f32 %v3257_v34, %v3233_v35 }
 0x224   : > { %v3365_v5 = vpop.f32.mrf.mxu0 }
 0x225   : > { %3878 = vst.msk [vmem:[%s4621_s10 + $0x8] sm:$0xf] %vm2775_vm0, %v3260_v4 }
 0x226   : > { %v3312_v7 = vpop.f32.mrf.mxu2  ;;  %v3392_v8 = vpop.f32.mrf.mxu1 }
 0x227   : > { %v3313_v36 = vadd.f32 %v3312_v7, %v3289_v3  ;;  %v3338_v38 = vpop.f32.mrf.mxu3 }
 0x229   : > { %v3341_v37 = vadd.f32 %v3338_v38, %v3313_v36 }
 0x22b   : > { %v3368_v9 = vadd.f32 %v3365_v5, %v3341_v37 }
 0x22c   : > { %v3473_v28 = vpop.f32.mrf.mxu0 }
 0x22d   : > { %v3395_v39 = vadd.f32 %v3392_v8, %v3368_v9 }
 0x22e   : > { %v3419_v40 = vpop.f32.mrf.mxu2  ;;  %v3500_v41 = vpop.f32.mrf.mxu1 }
 0x22f   : > { %v3422_v27 = vadd.f32 %v3419_v40, %v3395_v39 }
 0x230   : > { %v3446_v26 = vpop.f32.mrf.mxu3 }
 0x231   : > { %v3449_v29 = vadd.f32 %v3446_v26, %v3422_v27 }
 0x233   : > { %v3476_v30 = vadd.f32 %v3473_v28, %v3449_v29 }
 0x235   : > { %v3503_v31 = vadd.f32 %v3500_v41, %v3476_v30 }
 0x237   : > { %3904 = vst.msk [vmem:[%s4621_s10 + $0xc] sm:$0xf] %vm2775_vm0, %v3503_v31 }
 0x238   : > { %3980 = shalt.err (!%p3977_p3)
}
 0x239   : > { %s4017_s7 = smov 64   ;;  %s4018_s8 = smov 4  }
 0x23a   : > { %3912 = dma.vmem_to_hbm [thread:$0]  (%p4082_p5), %s3520_s20, 256, %s3522_s22, %s3507_s19, %s4017_s7, %s4017_s7, %s4018_s8  }
 0x23b PF: > { %p3918_p4 = scmp.ge.s32.totalorder %s4015_s18, 2  ;;  %s3536_s9 = sand.u32 1, %s4003_s15  }
 0x23c   : > { %s3537_s10 = scalar_lea.sflag [#allocation5], %s3536_s9 }
 0x23d   : > { %p3915_p7 = pnand %p3918_p4, %p4086_p6 }
 0x23f   : > { %p3916_p8 = pneg %p3915_p7 }
 0x241   : > { %3998 = dma.done.wait (%p3916_p8), %s3537_s10, 256  }
 0x242   : > { %4000 = vsyncadd (%p3916_p8), %s3537_s10, 4294967040  ;;  %p14_p9 = scmp.ge.s32.totalorder %s4069_s21, 4   ;;  %s4672_s15 = smov %s4007_s16 }
 0x243   : > { %s4673_s16 = smov %s4011_s17  ;;  %s4674_s17 = smov %s4080_s24 }
 0x244   : > { %s4675_s18 = smov %s4069_s21  ;;  %16 = sbr.rel (!%p14_p9) target bundleno = 3 (0x3), region = 113 }
 0x249   :  { %3543 = vsyncpa [#allocation5], 1 }
 0x24a   :  { %3545 = vsyncpa [#allocation5 + $0x1], 1 }

</bundles_post_ra>
